<compile_context>
chip_gen: v5e
topology: v5e:2x2
jax: 0.10.0
libtpu: 0.0.40
codegen_flags: <defaults>
</compile_context>

<pallas_src>
import jax
import jax.numpy as jnp
from jax import lax
from jax.experimental import pallas as pl
from jax.experimental.pallas import tpu as pltpu  # noqa: F401  (TPU backend)

NUM_LAYERS = 20
FEATURES = 200
FEATURES_PADDED = 256  # next multiple of 128 -> lane-dense layout


def _mlp_kernel(x_ref, w_ref, b_ref, o_ref):
    """Single invocation: all layers unrolled, all weights resident in VMEM.

    x_ref: (B, 256)   w_ref: (L, 256, 256)   b_ref: (L, 1, 256)   o_ref: (B, 256)
    """
    def body(i, act):
        y = jnp.dot(act, w_ref[i], preferred_element_type=jnp.float32) + b_ref[i]
        return jnp.maximum(y, 0.0)

    act = lax.fori_loop(0, NUM_LAYERS, body, x_ref[...], unroll=True)
    o_ref[...] = act.astype(o_ref.dtype)


def simple_net_forward(x, weights, biases):
    """x: (B, 200) f32; weights: (20, 200, 200); biases: (20, 1, 200)."""
    B, F = x.shape
    L = weights.shape[0]
    FP = FEATURES_PADDED
    pad = FP - F

    # Zero-pad feature dims; padded lanes stay exactly 0 through ReLU layers.
    x_p = jnp.pad(x, ((0, 0), (0, pad)))
    w_p = jnp.pad(weights, ((0, 0), (0, pad), (0, pad)))
    b_p = jnp.pad(biases, ((0, 0), (0, 0), (0, pad)))

    out_p = pl.pallas_call(
        _mlp_kernel,
        out_shape=jax.ShapeDtypeStruct((B, FP), x.dtype),
        in_specs=[
            pl.BlockSpec((B, FP), lambda: (0, 0)),        # activations in
            pl.BlockSpec((L, FP, FP), lambda: (0, 0, 0)),  # all weights (one DMA)
            pl.BlockSpec((L, 1, FP), lambda: (0, 0, 0)),   # all biases
        ],
        out_specs=pl.BlockSpec((B, FP), lambda: (0, 0)),
    )(x_p, w_p, b_p)
    return out_p[:, :F]


def init_params(key):
    """Deterministic init mimicking torch.nn.Linear default (U[-1/sqrt(in), +])."""
    bound = 1.0 / jnp.sqrt(jnp.float32(FEATURES))
    kw, kb = jax.random.split(key)
    # (L, in, out) so the kernel does act @ W[i] with no transpose.
    weights = jax.random.uniform(
        kw, (NUM_LAYERS, FEATURES, FEATURES), jnp.float32, -bound, bound)
    biases = jax.random.uniform(
        kb, (NUM_LAYERS, 1, FEATURES), jnp.float32, -bound, bound)
    return weights, biases


def reference_forward(x, weights, biases):
    act = x
    for i in range(NUM_LAYERS):
        act = jnp.maximum(act @ weights[i] + biases[i], 0.0)
    return act


if __name__ == "__main__":
    key = jax.random.PRNGKey(0)
    k_x, k_p = jax.random.split(key)

    B = 8
    x = jax.random.normal(k_x, (B, FEATURES), jnp.float32)
    weights, biases = init_params(k_p)

    out = simple_net_forward(x, weights, biases)
    out = jax.block_until_ready(out)

    ref = reference_forward(x, weights, biases)
    assert out.shape == (B, FEATURES)
    assert jnp.allclose(out, ref, atol=1e-4, rtol=1e-4), "mismatch vs JAX reference"

    print("KERNEL_OK")
</pallas_src>

<mosaic_0001>
module attributes {stable_mosaic.version = 11 : i64} {
  func.func @_mlp_kernel(%arg0: memref<8x256xf32, #tpu.memory_space<vmem>>, %arg1: memref<20x256x256xf32, #tpu.memory_space<vmem>>, %arg2: memref<20x1x256xf32, #tpu.memory_space<vmem>>, %arg3: memref<8x256xf32, #tpu.memory_space<vmem>>) attributes {dimension_semantics = [], scalar_prefetch = 0 : i64, scratch_operands = 0 : i64, tpu.core_type = #tpu.core_type<tc>} {
    %c0 = arith.constant 0 : index
    %c0_0 = arith.constant 0 : index
    %0 = vector.load %arg0[%c0, %c0_0] : memref<8x256xf32, #tpu.memory_space<vmem>>, vector<8x256xf32>
    %c0_i32 = arith.constant 0 : i32
    %1 = arith.index_cast %c0_i32 : i32 to index
    %c0_1 = arith.constant 0 : index
    %c0_2 = arith.constant 0 : index
    %2 = vector.load %arg1[%1, %c0_1, %c0_2] : memref<20x256x256xf32, #tpu.memory_space<vmem>>, vector<1x256x256xf32>
    %3 = vector.shape_cast %2 : vector<1x256x256xf32> to vector<256x256xf32>
    %cst = arith.constant dense<0.000000e+00> : vector<8x256xf32>
    %4 = tpu.matmul %0, %3, %cst {dimension_numbers = #tpu.dot_dimension_numbers<[1], [0], [0], [1], [0, 0, 1, 1], [], []>} : vector<8x256xf32>, vector<256x256xf32>, vector<8x256xf32> -> vector<8x256xf32>
    %5 = arith.index_cast %c0_i32 : i32 to index
    %c0_3 = arith.constant 0 : index
    %c0_4 = arith.constant 0 : index
    %6 = vector.load %arg2[%5, %c0_3, %c0_4] : memref<20x1x256xf32, #tpu.memory_space<vmem>>, vector<1x1x256xf32>
    %7 = vector.shape_cast %6 : vector<1x1x256xf32> to vector<1x256xf32>
    %8 = vector.broadcast %7 : vector<1x256xf32> to vector<8x256xf32>
    %9 = arith.addf %4, %8 : vector<8x256xf32>
    %cst_5 = arith.constant 0.000000e+00 : f32
    %10 = vector.broadcast %cst_5 : f32 to vector<8x256xf32>
    %11 = arith.maximumf %9, %10 : vector<8x256xf32>
    %c1_i32 = arith.constant 1 : i32
    %12 = arith.index_cast %c1_i32 : i32 to index
    %c0_6 = arith.constant 0 : index
    %c0_7 = arith.constant 0 : index
    %13 = vector.load %arg1[%12, %c0_6, %c0_7] : memref<20x256x256xf32, #tpu.memory_space<vmem>>, vector<1x256x256xf32>
    %14 = vector.shape_cast %13 : vector<1x256x256xf32> to vector<256x256xf32>
    %cst_8 = arith.constant dense<0.000000e+00> : vector<8x256xf32>
    %15 = tpu.matmul %11, %14, %cst_8 {dimension_numbers = #tpu.dot_dimension_numbers<[1], [0], [0], [1], [0, 0, 1, 1], [], []>} : vector<8x256xf32>, vector<256x256xf32>, vector<8x256xf32> -> vector<8x256xf32>
    %16 = arith.index_cast %c1_i32 : i32 to index
    %c0_9 = arith.constant 0 : index
    %c0_10 = arith.constant 0 : index
    %17 = vector.load %arg2[%16, %c0_9, %c0_10] : memref<20x1x256xf32, #tpu.memory_space<vmem>>, vector<1x1x256xf32>
    %18 = vector.shape_cast %17 : vector<1x1x256xf32> to vector<1x256xf32>
    %19 = vector.broadcast %18 : vector<1x256xf32> to vector<8x256xf32>
    %20 = arith.addf %15, %19 : vector<8x256xf32>
    %cst_11 = arith.constant 0.000000e+00 : f32
    %21 = vector.broadcast %cst_11 : f32 to vector<8x256xf32>
    %22 = arith.maximumf %20, %21 : vector<8x256xf32>
    %c2_i32 = arith.constant 2 : i32
    %23 = arith.index_cast %c2_i32 : i32 to index
    %c0_12 = arith.constant 0 : index
    %c0_13 = arith.constant 0 : index
    %24 = vector.load %arg1[%23, %c0_12, %c0_13] : memref<20x256x256xf32, #tpu.memory_space<vmem>>, vector<1x256x256xf32>
    %25 = vector.shape_cast %24 : vector<1x256x256xf32> to vector<256x256xf32>
    %cst_14 = arith.constant dense<0.000000e+00> : vector<8x256xf32>
    %26 = tpu.matmul %22, %25, %cst_14 {dimension_numbers = #tpu.dot_dimension_numbers<[1], [0], [0], [1], [0, 0, 1, 1], [], []>} : vector<8x256xf32>, vector<256x256xf32>, vector<8x256xf32> -> vector<8x256xf32>
    %27 = arith.index_cast %c2_i32 : i32 to index
    %c0_15 = arith.constant 0 : index
    %c0_16 = arith.constant 0 : index
    %28 = vector.load %arg2[%27, %c0_15, %c0_16] : memref<20x1x256xf32, #tpu.memory_space<vmem>>, vector<1x1x256xf32>
    %29 = vector.shape_cast %28 : vector<1x1x256xf32> to vector<1x256xf32>
    %30 = vector.broadcast %29 : vector<1x256xf32> to vector<8x256xf32>
    %31 = arith.addf %26, %30 : vector<8x256xf32>
    %cst_17 = arith.constant 0.000000e+00 : f32
    %32 = vector.broadcast %cst_17 : f32 to vector<8x256xf32>
    %33 = arith.maximumf %31, %32 : vector<8x256xf32>
    %c3_i32 = arith.constant 3 : i32
    %34 = arith.index_cast %c3_i32 : i32 to index
    %c0_18 = arith.constant 0 : index
    %c0_19 = arith.constant 0 : index
    %35 = vector.load %arg1[%34, %c0_18, %c0_19] : memref<20x256x256xf32, #tpu.memory_space<vmem>>, vector<1x256x256xf32>
    %36 = vector.shape_cast %35 : vector<1x256x256xf32> to vector<256x256xf32>
    %cst_20 = arith.constant dense<0.000000e+00> : vector<8x256xf32>
    %37 = tpu.matmul %33, %36, %cst_20 {dimension_numbers = #tpu.dot_dimension_numbers<[1], [0], [0], [1], [0, 0, 1, 1], [], []>} : vector<8x256xf32>, vector<256x256xf32>, vector<8x256xf32> -> vector<8x256xf32>
    %38 = arith.index_cast %c3_i32 : i32 to index
    %c0_21 = arith.constant 0 : index
    %c0_22 = arith.constant 0 : index
    %39 = vector.load %arg2[%38, %c0_21, %c0_22] : memref<20x1x256xf32, #tpu.memory_space<vmem>>, vector<1x1x256xf32>
    %40 = vector.shape_cast %39 : vector<1x1x256xf32> to vector<1x256xf32>
    %41 = vector.broadcast %40 : vector<1x256xf32> to vector<8x256xf32>
    %42 = arith.addf %37, %41 : vector<8x256xf32>
    %cst_23 = arith.constant 0.000000e+00 : f32
    %43 = vector.broadcast %cst_23 : f32 to vector<8x256xf32>
    %44 = arith.maximumf %42, %43 : vector<8x256xf32>
    %c4_i32 = arith.constant 4 : i32
    %45 = arith.index_cast %c4_i32 : i32 to index
    %c0_24 = arith.constant 0 : index
    %c0_25 = arith.constant 0 : index
    %46 = vector.load %arg1[%45, %c0_24, %c0_25] : memref<20x256x256xf32, #tpu.memory_space<vmem>>, vector<1x256x256xf32>
    %47 = vector.shape_cast %46 : vector<1x256x256xf32> to vector<256x256xf32>
    %cst_26 = arith.constant dense<0.000000e+00> : vector<8x256xf32>
    %48 = tpu.matmul %44, %47, %cst_26 {dimension_numbers = #tpu.dot_dimension_numbers<[1], [0], [0], [1], [0, 0, 1, 1], [], []>} : vector<8x256xf32>, vector<256x256xf32>, vector<8x256xf32> -> vector<8x256xf32>
    %49 = arith.index_cast %c4_i32 : i32 to index
    %c0_27 = arith.constant 0 : index
    %c0_28 = arith.constant 0 : index
    %50 = vector.load %arg2[%49, %c0_27, %c0_28] : memref<20x1x256xf32, #tpu.memory_space<vmem>>, vector<1x1x256xf32>
    %51 = vector.shape_cast %50 : vector<1x1x256xf32> to vector<1x256xf32>
    %52 = vector.broadcast %51 : vector<1x256xf32> to vector<8x256xf32>
    %53 = arith.addf %48, %52 : vector<8x256xf32>
    %cst_29 = arith.constant 0.000000e+00 : f32
    %54 = vector.broadcast %cst_29 : f32 to vector<8x256xf32>
    %55 = arith.maximumf %53, %54 : vector<8x256xf32>
    %c5_i32 = arith.constant 5 : i32
    %56 = arith.index_cast %c5_i32 : i32 to index
    %c0_30 = arith.constant 0 : index
    %c0_31 = arith.constant 0 : index
    %57 = vector.load %arg1[%56, %c0_30, %c0_31] : memref<20x256x256xf32, #tpu.memory_space<vmem>>, vector<1x256x256xf32>
    %58 = vector.shape_cast %57 : vector<1x256x256xf32> to vector<256x256xf32>
    %cst_32 = arith.constant dense<0.000000e+00> : vector<8x256xf32>
    %59 = tpu.matmul %55, %58, %cst_32 {dimension_numbers = #tpu.dot_dimension_numbers<[1], [0], [0], [1], [0, 0, 1, 1], [], []>} : vector<8x256xf32>, vector<256x256xf32>, vector<8x256xf32> -> vector<8x256xf32>
    %60 = arith.index_cast %c5_i32 : i32 to index
    %c0_33 = arith.constant 0 : index
    %c0_34 = arith.constant 0 : index
    %61 = vector.load %arg2[%60, %c0_33, %c0_34] : memref<20x1x256xf32, #tpu.memory_space<vmem>>, vector<1x1x256xf32>
    %62 = vector.shape_cast %61 : vector<1x1x256xf32> to vector<1x256xf32>
    %63 = vector.broadcast %62 : vector<1x256xf32> to vector<8x256xf32>
    %64 = arith.addf %59, %63 : vector<8x256xf32>
    %cst_35 = arith.constant 0.000000e+00 : f32
    %65 = vector.broadcast %cst_35 : f32 to vector<8x256xf32>
    %66 = arith.maximumf %64, %65 : vector<8x256xf32>
    %c6_i32 = arith.constant 6 : i32
    %67 = arith.index_cast %c6_i32 : i32 to index
    %c0_36 = arith.constant 0 : index
    %c0_37 = arith.constant 0 : index
    %68 = vector.load %arg1[%67, %c0_36, %c0_37] : memref<20x256x256xf32, #tpu.memory_space<vmem>>, vector<1x256x256xf32>
    %69 = vector.shape_cast %68 : vector<1x256x256xf32> to vector<256x256xf32>
    %cst_38 = arith.constant dense<0.000000e+00> : vector<8x256xf32>
    %70 = tpu.matmul %66, %69, %cst_38 {dimension_numbers = #tpu.dot_dimension_numbers<[1], [0], [0], [1], [0, 0, 1, 1], [], []>} : vector<8x256xf32>, vector<256x256xf32>, vector<8x256xf32> -> vector<8x256xf32>
    %71 = arith.index_cast %c6_i32 : i32 to index
    %c0_39 = arith.constant 0 : index
    %c0_40 = arith.constant 0 : index
    %72 = vector.load %arg2[%71, %c0_39, %c0_40] : memref<20x1x256xf32, #tpu.memory_space<vmem>>, vector<1x1x256xf32>
    %73 = vector.shape_cast %72 : vector<1x1x256xf32> to vector<1x256xf32>
    %74 = vector.broadcast %73 : vector<1x256xf32> to vector<8x256xf32>
    %75 = arith.addf %70, %74 : vector<8x256xf32>
    %cst_41 = arith.constant 0.000000e+00 : f32
    %76 = vector.broadcast %cst_41 : f32 to vector<8x256xf32>
    %77 = arith.maximumf %75, %76 : vector<8x256xf32>
    %c7_i32 = arith.constant 7 : i32
    %78 = arith.index_cast %c7_i32 : i32 to index
    %c0_42 = arith.constant 0 : index
    %c0_43 = arith.constant 0 : index
    %79 = vector.load %arg1[%78, %c0_42, %c0_43] : memref<20x256x256xf32, #tpu.memory_space<vmem>>, vector<1x256x256xf32>
    %80 = vector.shape_cast %79 : vector<1x256x256xf32> to vector<256x256xf32>
    %cst_44 = arith.constant dense<0.000000e+00> : vector<8x256xf32>
    %81 = tpu.matmul %77, %80, %cst_44 {dimension_numbers = #tpu.dot_dimension_numbers<[1], [0], [0], [1], [0, 0, 1, 1], [], []>} : vector<8x256xf32>, vector<256x256xf32>, vector<8x256xf32> -> vector<8x256xf32>
    %82 = arith.index_cast %c7_i32 : i32 to index
    %c0_45 = arith.constant 0 : index
    %c0_46 = arith.constant 0 : index
    %83 = vector.load %arg2[%82, %c0_45, %c0_46] : memref<20x1x256xf32, #tpu.memory_space<vmem>>, vector<1x1x256xf32>
    %84 = vector.shape_cast %83 : vector<1x1x256xf32> to vector<1x256xf32>
    %85 = vector.broadcast %84 : vector<1x256xf32> to vector<8x256xf32>
    %86 = arith.addf %81, %85 : vector<8x256xf32>
    %cst_47 = arith.constant 0.000000e+00 : f32
    %87 = vector.broadcast %cst_47 : f32 to vector<8x256xf32>
    %88 = arith.maximumf %86, %87 : vector<8x256xf32>
    %c8_i32 = arith.constant 8 : i32
    %89 = arith.index_cast %c8_i32 : i32 to index
    %c0_48 = arith.constant 0 : index
    %c0_49 = arith.constant 0 : index
    %90 = vector.load %arg1[%89, %c0_48, %c0_49] : memref<20x256x256xf32, #tpu.memory_space<vmem>>, vector<1x256x256xf32>
    %91 = vector.shape_cast %90 : vector<1x256x256xf32> to vector<256x256xf32>
    %cst_50 = arith.constant dense<0.000000e+00> : vector<8x256xf32>
    %92 = tpu.matmul %88, %91, %cst_50 {dimension_numbers = #tpu.dot_dimension_numbers<[1], [0], [0], [1], [0, 0, 1, 1], [], []>} : vector<8x256xf32>, vector<256x256xf32>, vector<8x256xf32> -> vector<8x256xf32>
    %93 = arith.index_cast %c8_i32 : i32 to index
    %c0_51 = arith.constant 0 : index
    %c0_52 = arith.constant 0 : index
    %94 = vector.load %arg2[%93, %c0_51, %c0_52] : memref<20x1x256xf32, #tpu.memory_space<vmem>>, vector<1x1x256xf32>
    %95 = vector.shape_cast %94 : vector<1x1x256xf32> to vector<1x256xf32>
    %96 = vector.broadcast %95 : vector<1x256xf32> to vector<8x256xf32>
    %97 = arith.addf %92, %96 : vector<8x256xf32>
    %cst_53 = arith.constant 0.000000e+00 : f32
    %98 = vector.broadcast %cst_53 : f32 to vector<8x256xf32>
    %99 = arith.maximumf %97, %98 : vector<8x256xf32>
    %c9_i32 = arith.constant 9 : i32
    %100 = arith.index_cast %c9_i32 : i32 to index
    %c0_54 = arith.constant 0 : index
    %c0_55 = arith.constant 0 : index
    %101 = vector.load %arg1[%100, %c0_54, %c0_55] : memref<20x256x256xf32, #tpu.memory_space<vmem>>, vector<1x256x256xf32>
    %102 = vector.shape_cast %101 : vector<1x256x256xf32> to vector<256x256xf32>
    %cst_56 = arith.constant dense<0.000000e+00> : vector<8x256xf32>
    %103 = tpu.matmul %99, %102, %cst_56 {dimension_numbers = #tpu.dot_dimension_numbers<[1], [0], [0], [1], [0, 0, 1, 1], [], []>} : vector<8x256xf32>, vector<256x256xf32>, vector<8x256xf32> -> vector<8x256xf32>
    %104 = arith.index_cast %c9_i32 : i32 to index
    %c0_57 = arith.constant 0 : index
    %c0_58 = arith.constant 0 : index
    %105 = vector.load %arg2[%104, %c0_57, %c0_58] : memref<20x1x256xf32, #tpu.memory_space<vmem>>, vector<1x1x256xf32>
    %106 = vector.shape_cast %105 : vector<1x1x256xf32> to vector<1x256xf32>
    %107 = vector.broadcast %106 : vector<1x256xf32> to vector<8x256xf32>
    %108 = arith.addf %103, %107 : vector<8x256xf32>
    %cst_59 = arith.constant 0.000000e+00 : f32
    %109 = vector.broadcast %cst_59 : f32 to vector<8x256xf32>
    %110 = arith.maximumf %108, %109 : vector<8x256xf32>
    %c10_i32 = arith.constant 10 : i32
    %111 = arith.index_cast %c10_i32 : i32 to index
    %c0_60 = arith.constant 0 : index
    %c0_61 = arith.constant 0 : index
    %112 = vector.load %arg1[%111, %c0_60, %c0_61] : memref<20x256x256xf32, #tpu.memory_space<vmem>>, vector<1x256x256xf32>
    %113 = vector.shape_cast %112 : vector<1x256x256xf32> to vector<256x256xf32>
    %cst_62 = arith.constant dense<0.000000e+00> : vector<8x256xf32>
    %114 = tpu.matmul %110, %113, %cst_62 {dimension_numbers = #tpu.dot_dimension_numbers<[1], [0], [0], [1], [0, 0, 1, 1], [], []>} : vector<8x256xf32>, vector<256x256xf32>, vector<8x256xf32> -> vector<8x256xf32>
    %115 = arith.index_cast %c10_i32 : i32 to index
    %c0_63 = arith.constant 0 : index
    %c0_64 = arith.constant 0 : index
    %116 = vector.load %arg2[%115, %c0_63, %c0_64] : memref<20x1x256xf32, #tpu.memory_space<vmem>>, vector<1x1x256xf32>
    %117 = vector.shape_cast %116 : vector<1x1x256xf32> to vector<1x256xf32>
    %118 = vector.broadcast %117 : vector<1x256xf32> to vector<8x256xf32>
    %119 = arith.addf %114, %118 : vector<8x256xf32>
    %cst_65 = arith.constant 0.000000e+00 : f32
    %120 = vector.broadcast %cst_65 : f32 to vector<8x256xf32>
    %121 = arith.maximumf %119, %120 : vector<8x256xf32>
    %c11_i32 = arith.constant 11 : i32
    %122 = arith.index_cast %c11_i32 : i32 to index
    %c0_66 = arith.constant 0 : index
    %c0_67 = arith.constant 0 : index
    %123 = vector.load %arg1[%122, %c0_66, %c0_67] : memref<20x256x256xf32, #tpu.memory_space<vmem>>, vector<1x256x256xf32>
    %124 = vector.shape_cast %123 : vector<1x256x256xf32> to vector<256x256xf32>
    %cst_68 = arith.constant dense<0.000000e+00> : vector<8x256xf32>
    %125 = tpu.matmul %121, %124, %cst_68 {dimension_numbers = #tpu.dot_dimension_numbers<[1], [0], [0], [1], [0, 0, 1, 1], [], []>} : vector<8x256xf32>, vector<256x256xf32>, vector<8x256xf32> -> vector<8x256xf32>
    %126 = arith.index_cast %c11_i32 : i32 to index
    %c0_69 = arith.constant 0 : index
    %c0_70 = arith.constant 0 : index
    %127 = vector.load %arg2[%126, %c0_69, %c0_70] : memref<20x1x256xf32, #tpu.memory_space<vmem>>, vector<1x1x256xf32>
    %128 = vector.shape_cast %127 : vector<1x1x256xf32> to vector<1x256xf32>
    %129 = vector.broadcast %128 : vector<1x256xf32> to vector<8x256xf32>
    %130 = arith.addf %125, %129 : vector<8x256xf32>
    %cst_71 = arith.constant 0.000000e+00 : f32
    %131 = vector.broadcast %cst_71 : f32 to vector<8x256xf32>
    %132 = arith.maximumf %130, %131 : vector<8x256xf32>
    %c12_i32 = arith.constant 12 : i32
    %133 = arith.index_cast %c12_i32 : i32 to index
    %c0_72 = arith.constant 0 : index
    %c0_73 = arith.constant 0 : index
    %134 = vector.load %arg1[%133, %c0_72, %c0_73] : memref<20x256x256xf32, #tpu.memory_space<vmem>>, vector<1x256x256xf32>
    %135 = vector.shape_cast %134 : vector<1x256x256xf32> to vector<256x256xf32>
    %cst_74 = arith.constant dense<0.000000e+00> : vector<8x256xf32>
    %136 = tpu.matmul %132, %135, %cst_74 {dimension_numbers = #tpu.dot_dimension_numbers<[1], [0], [0], [1], [0, 0, 1, 1], [], []>} : vector<8x256xf32>, vector<256x256xf32>, vector<8x256xf32> -> vector<8x256xf32>
    %137 = arith.index_cast %c12_i32 : i32 to index
    %c0_75 = arith.constant 0 : index
    %c0_76 = arith.constant 0 : index
    %138 = vector.load %arg2[%137, %c0_75, %c0_76] : memref<20x1x256xf32, #tpu.memory_space<vmem>>, vector<1x1x256xf32>
    %139 = vector.shape_cast %138 : vector<1x1x256xf32> to vector<1x256xf32>
    %140 = vector.broadcast %139 : vector<1x256xf32> to vector<8x256xf32>
    %141 = arith.addf %136, %140 : vector<8x256xf32>
    %cst_77 = arith.constant 0.000000e+00 : f32
    %142 = vector.broadcast %cst_77 : f32 to vector<8x256xf32>
    %143 = arith.maximumf %141, %142 : vector<8x256xf32>
    %c13_i32 = arith.constant 13 : i32
    %144 = arith.index_cast %c13_i32 : i32 to index
    %c0_78 = arith.constant 0 : index
    %c0_79 = arith.constant 0 : index
    %145 = vector.load %arg1[%144, %c0_78, %c0_79] : memref<20x256x256xf32, #tpu.memory_space<vmem>>, vector<1x256x256xf32>
    %146 = vector.shape_cast %145 : vector<1x256x256xf32> to vector<256x256xf32>
    %cst_80 = arith.constant dense<0.000000e+00> : vector<8x256xf32>
    %147 = tpu.matmul %143, %146, %cst_80 {dimension_numbers = #tpu.dot_dimension_numbers<[1], [0], [0], [1], [0, 0, 1, 1], [], []>} : vector<8x256xf32>, vector<256x256xf32>, vector<8x256xf32> -> vector<8x256xf32>
    %148 = arith.index_cast %c13_i32 : i32 to index
    %c0_81 = arith.constant 0 : index
    %c0_82 = arith.constant 0 : index
    %149 = vector.load %arg2[%148, %c0_81, %c0_82] : memref<20x1x256xf32, #tpu.memory_space<vmem>>, vector<1x1x256xf32>
    %150 = vector.shape_cast %149 : vector<1x1x256xf32> to vector<1x256xf32>
    %151 = vector.broadcast %150 : vector<1x256xf32> to vector<8x256xf32>
    %152 = arith.addf %147, %151 : vector<8x256xf32>
    %cst_83 = arith.constant 0.000000e+00 : f32
    %153 = vector.broadcast %cst_83 : f32 to vector<8x256xf32>
    %154 = arith.maximumf %152, %153 : vector<8x256xf32>
    %c14_i32 = arith.constant 14 : i32
    %155 = arith.index_cast %c14_i32 : i32 to index
    %c0_84 = arith.constant 0 : index
    %c0_85 = arith.constant 0 : index
    %156 = vector.load %arg1[%155, %c0_84, %c0_85] : memref<20x256x256xf32, #tpu.memory_space<vmem>>, vector<1x256x256xf32>
    %157 = vector.shape_cast %156 : vector<1x256x256xf32> to vector<256x256xf32>
    %cst_86 = arith.constant dense<0.000000e+00> : vector<8x256xf32>
    %158 = tpu.matmul %154, %157, %cst_86 {dimension_numbers = #tpu.dot_dimension_numbers<[1], [0], [0], [1], [0, 0, 1, 1], [], []>} : vector<8x256xf32>, vector<256x256xf32>, vector<8x256xf32> -> vector<8x256xf32>
    %159 = arith.index_cast %c14_i32 : i32 to index
    %c0_87 = arith.constant 0 : index
    %c0_88 = arith.constant 0 : index
    %160 = vector.load %arg2[%159, %c0_87, %c0_88] : memref<20x1x256xf32, #tpu.memory_space<vmem>>, vector<1x1x256xf32>
    %161 = vector.shape_cast %160 : vector<1x1x256xf32> to vector<1x256xf32>
    %162 = vector.broadcast %161 : vector<1x256xf32> to vector<8x256xf32>
    %163 = arith.addf %158, %162 : vector<8x256xf32>
    %cst_89 = arith.constant 0.000000e+00 : f32
    %164 = vector.broadcast %cst_89 : f32 to vector<8x256xf32>
    %165 = arith.maximumf %163, %164 : vector<8x256xf32>
    %c15_i32 = arith.constant 15 : i32
    %166 = arith.index_cast %c15_i32 : i32 to index
    %c0_90 = arith.constant 0 : index
    %c0_91 = arith.constant 0 : index
    %167 = vector.load %arg1[%166, %c0_90, %c0_91] : memref<20x256x256xf32, #tpu.memory_space<vmem>>, vector<1x256x256xf32>
    %168 = vector.shape_cast %167 : vector<1x256x256xf32> to vector<256x256xf32>
    %cst_92 = arith.constant dense<0.000000e+00> : vector<8x256xf32>
    %169 = tpu.matmul %165, %168, %cst_92 {dimension_numbers = #tpu.dot_dimension_numbers<[1], [0], [0], [1], [0, 0, 1, 1], [], []>} : vector<8x256xf32>, vector<256x256xf32>, vector<8x256xf32> -> vector<8x256xf32>
    %170 = arith.index_cast %c15_i32 : i32 to index
    %c0_93 = arith.constant 0 : index
    %c0_94 = arith.constant 0 : index
    %171 = vector.load %arg2[%170, %c0_93, %c0_94] : memref<20x1x256xf32, #tpu.memory_space<vmem>>, vector<1x1x256xf32>
    %172 = vector.shape_cast %171 : vector<1x1x256xf32> to vector<1x256xf32>
    %173 = vector.broadcast %172 : vector<1x256xf32> to vector<8x256xf32>
    %174 = arith.addf %169, %173 : vector<8x256xf32>
    %cst_95 = arith.constant 0.000000e+00 : f32
    %175 = vector.broadcast %cst_95 : f32 to vector<8x256xf32>
    %176 = arith.maximumf %174, %175 : vector<8x256xf32>
    %c16_i32 = arith.constant 16 : i32
    %177 = arith.index_cast %c16_i32 : i32 to index
    %c0_96 = arith.constant 0 : index
    %c0_97 = arith.constant 0 : index
    %178 = vector.load %arg1[%177, %c0_96, %c0_97] : memref<20x256x256xf32, #tpu.memory_space<vmem>>, vector<1x256x256xf32>
    %179 = vector.shape_cast %178 : vector<1x256x256xf32> to vector<256x256xf32>
    %cst_98 = arith.constant dense<0.000000e+00> : vector<8x256xf32>
    %180 = tpu.matmul %176, %179, %cst_98 {dimension_numbers = #tpu.dot_dimension_numbers<[1], [0], [0], [1], [0, 0, 1, 1], [], []>} : vector<8x256xf32>, vector<256x256xf32>, vector<8x256xf32> -> vector<8x256xf32>
    %181 = arith.index_cast %c16_i32 : i32 to index
    %c0_99 = arith.constant 0 : index
    %c0_100 = arith.constant 0 : index
    %182 = vector.load %arg2[%181, %c0_99, %c0_100] : memref<20x1x256xf32, #tpu.memory_space<vmem>>, vector<1x1x256xf32>
    %183 = vector.shape_cast %182 : vector<1x1x256xf32> to vector<1x256xf32>
    %184 = vector.broadcast %183 : vector<1x256xf32> to vector<8x256xf32>
    %185 = arith.addf %180, %184 : vector<8x256xf32>
    %cst_101 = arith.constant 0.000000e+00 : f32
    %186 = vector.broadcast %cst_101 : f32 to vector<8x256xf32>
    %187 = arith.maximumf %185, %186 : vector<8x256xf32>
    %c17_i32 = arith.constant 17 : i32
    %188 = arith.index_cast %c17_i32 : i32 to index
    %c0_102 = arith.constant 0 : index
    %c0_103 = arith.constant 0 : index
    %189 = vector.load %arg1[%188, %c0_102, %c0_103] : memref<20x256x256xf32, #tpu.memory_space<vmem>>, vector<1x256x256xf32>
    %190 = vector.shape_cast %189 : vector<1x256x256xf32> to vector<256x256xf32>
    %cst_104 = arith.constant dense<0.000000e+00> : vector<8x256xf32>
    %191 = tpu.matmul %187, %190, %cst_104 {dimension_numbers = #tpu.dot_dimension_numbers<[1], [0], [0], [1], [0, 0, 1, 1], [], []>} : vector<8x256xf32>, vector<256x256xf32>, vector<8x256xf32> -> vector<8x256xf32>
    %192 = arith.index_cast %c17_i32 : i32 to index
    %c0_105 = arith.constant 0 : index
    %c0_106 = arith.constant 0 : index
    %193 = vector.load %arg2[%192, %c0_105, %c0_106] : memref<20x1x256xf32, #tpu.memory_space<vmem>>, vector<1x1x256xf32>
    %194 = vector.shape_cast %193 : vector<1x1x256xf32> to vector<1x256xf32>
    %195 = vector.broadcast %194 : vector<1x256xf32> to vector<8x256xf32>
    %196 = arith.addf %191, %195 : vector<8x256xf32>
    %cst_107 = arith.constant 0.000000e+00 : f32
    %197 = vector.broadcast %cst_107 : f32 to vector<8x256xf32>
    %198 = arith.maximumf %196, %197 : vector<8x256xf32>
    %c18_i32 = arith.constant 18 : i32
    %199 = arith.index_cast %c18_i32 : i32 to index
    %c0_108 = arith.constant 0 : index
    %c0_109 = arith.constant 0 : index
    %200 = vector.load %arg1[%199, %c0_108, %c0_109] : memref<20x256x256xf32, #tpu.memory_space<vmem>>, vector<1x256x256xf32>
    %201 = vector.shape_cast %200 : vector<1x256x256xf32> to vector<256x256xf32>
    %cst_110 = arith.constant dense<0.000000e+00> : vector<8x256xf32>
    %202 = tpu.matmul %198, %201, %cst_110 {dimension_numbers = #tpu.dot_dimension_numbers<[1], [0], [0], [1], [0, 0, 1, 1], [], []>} : vector<8x256xf32>, vector<256x256xf32>, vector<8x256xf32> -> vector<8x256xf32>
    %203 = arith.index_cast %c18_i32 : i32 to index
    %c0_111 = arith.constant 0 : index
    %c0_112 = arith.constant 0 : index
    %204 = vector.load %arg2[%203, %c0_111, %c0_112] : memref<20x1x256xf32, #tpu.memory_space<vmem>>, vector<1x1x256xf32>
    %205 = vector.shape_cast %204 : vector<1x1x256xf32> to vector<1x256xf32>
    %206 = vector.broadcast %205 : vector<1x256xf32> to vector<8x256xf32>
    %207 = arith.addf %202, %206 : vector<8x256xf32>
    %cst_113 = arith.constant 0.000000e+00 : f32
    %208 = vector.broadcast %cst_113 : f32 to vector<8x256xf32>
    %209 = arith.maximumf %207, %208 : vector<8x256xf32>
    %c19_i32 = arith.constant 19 : i32
    %210 = arith.index_cast %c19_i32 : i32 to index
    %c0_114 = arith.constant 0 : index
    %c0_115 = arith.constant 0 : index
    %211 = vector.load %arg1[%210, %c0_114, %c0_115] : memref<20x256x256xf32, #tpu.memory_space<vmem>>, vector<1x256x256xf32>
    %212 = vector.shape_cast %211 : vector<1x256x256xf32> to vector<256x256xf32>
    %cst_116 = arith.constant dense<0.000000e+00> : vector<8x256xf32>
    %213 = tpu.matmul %209, %212, %cst_116 {dimension_numbers = #tpu.dot_dimension_numbers<[1], [0], [0], [1], [0, 0, 1, 1], [], []>} : vector<8x256xf32>, vector<256x256xf32>, vector<8x256xf32> -> vector<8x256xf32>
    %214 = arith.index_cast %c19_i32 : i32 to index
    %c0_117 = arith.constant 0 : index
    %c0_118 = arith.constant 0 : index
    %215 = vector.load %arg2[%214, %c0_117, %c0_118] : memref<20x1x256xf32, #tpu.memory_space<vmem>>, vector<1x1x256xf32>
    %216 = vector.shape_cast %215 : vector<1x1x256xf32> to vector<1x256xf32>
    %217 = vector.broadcast %216 : vector<1x256xf32> to vector<8x256xf32>
    %218 = arith.addf %213, %217 : vector<8x256xf32>
    %cst_119 = arith.constant 0.000000e+00 : f32
    %219 = vector.broadcast %cst_119 : f32 to vector<8x256xf32>
    %220 = arith.maximumf %218, %219 : vector<8x256xf32>
    %c20_i32 = arith.constant 20 : i32
    %c0_120 = arith.constant 0 : index
    %c0_121 = arith.constant 0 : index
    %221 = vector.load %arg3[%c0_120, %c0_121] : memref<8x256xf32, #tpu.memory_space<vmem>>, vector<8x256xf32>
    tpu.vector_store %arg3[%c0_120, %c0_121], %220 {strides = array<i32>} : memref<8x256xf32, #tpu.memory_space<vmem>>, vector<8x256xf32>,
    return
  }
}

</mosaic_0001>

<bundles_post_ra>
// kernel: tpu_custom_call.1
= control target key start
LH: loop header
LB: loop body
LE: loop exit
PB: predicated region body
PF: predicated region fallthrough
CT: control target
= control target key end

     0   :  { %8 = vsyncpa [#allocation3], 0  ;;  %s3310_s0 = inlined_call_operand.hbm [shape: f32[8,256], index: 0, kind: input, shape index: {}]   ;;  %s3311_s1 = inlined_call_operand.hbm [shape: f32[20,256,256], index: 1, kind: input, shape index: {}]   ;;  %s3312_s2 = inlined_call_operand.hbm [shape: f32[20,1,256], index: 2, kind: input, shape index: {}]   ;;  %s3313_s3 = inlined_call_operand.hbm [shape: f32[8,256], index: 3, kind: output, shape index: {}]  }
   0x1   :  { %9 = vsyncpa [#allocation6], 0  ;;  %s26_s14 = sshll.u32 %s3311_s1, 4  ;;  %s27_s14 = int_to_ptr.hbm [resolvable:$true] %s26_s14 }
   0x2   :  { %10 = vsyncpa [#allocation4], 0  ;;  %s3270_s15 = smov [#allocation5]   ;;  %s16_s19 = sshll.u32 %s3310_s0, 4  ;;  %s17_s19 = int_to_ptr.hbm [resolvable:$true] %s16_s19 }
   0x3   :  { %s28_s16 = sshll.u32 %s3270_s15, 4  ;;  %s3271_s20 = smov 256   ;;  %s29_s16 = int_to_ptr.vmem [resolvable:$true] %s28_s16 }
   0x4   :  { %s3272_s21 = smov 16   ;;  %s3273_s22 = smov [#allocation2]  }
   0x5   :  { %34 = dma.hbm_to_vmem [thread:$0]  %s27_s14, 163840, %s29_s16, [#allocation6], %s3271_s20, %s3271_s20, %s3272_s21  }
   0x6   :  { %s18_s23 = sshll.u32 %s3273_s22, 4  ;;  %s39_s26 = sshll.u32 %s3312_s2, 4  ;;  %s19_s23 = int_to_ptr.vmem [resolvable:$true] %s18_s23  ;;  %s40_s26 = int_to_ptr.hbm [resolvable:$true] %s39_s26 }
   0x7   :  { %21 = dma.hbm_to_vmem [thread:$0]  %s17_s19, 256, %s19_s23, [#allocation3]  }
   0x8   :  { %s3274_s1 = smov [#allocation7]   ;;  %s3275_s28 = smov 32  }
   0x9   :  { %s41_s27 = sshll.u32 %s3274_s1, 4  ;;  %s3276_s29 = smov 2   ;;  %s42_s27 = int_to_ptr.vmem [resolvable:$true] %s41_s27 }
   0xa   :  { %47 = dma.hbm_to_vmem [thread:$0]  %s40_s26, 640, %s42_s27, [#allocation6], %s3275_s28, %s3275_s28, %s3276_s29  }
   0xb   :  { %3264 = dma.done.wait [#allocation3], 256  }
   0xc   :  { %3265 = vsyncadd [#allocation3], 4294967040 }
   0xd   :  { %3266 = dma.done.wait [#allocation6], 164480  }
   0xe   :  { %3267 = vsyncadd [#allocation6], 4294802816  ;;  %v93_v0 = vld [vmem:[#allocation5 + $0xf8] sm:$0xff]  ;;  %v91_v1 = vld [vmem:[#allocation5 + $0xe8] sm:$0xff]  ;;  %s3277_s0 = smov [#allocation8]   ;;  %s3149_s5 = sshll.u32 %s3313_s3, 4  ;;  %s3150_s5 = int_to_ptr.hbm [resolvable:$true] %s3149_s5 }
   0xf   :  { %v125_v2 = vld [vmem:[#allocation5 + $0x1f8] sm:$0xff]  ;;  %172 = vmatpush.msra.mxu2 %v93_v0  ;;  %v92_v3 = vld [vmem:[#allocation5 + $0xf0] sm:$0xff]  ;;  %v123_v4 = vld [vmem:[#allocation5 + $0x1e8] sm:$0xff]  ;;  %s3147_s2 = sshll.u32 %s3277_s0, 4  ;;  %s3148_s2 = int_to_ptr.vmem [resolvable:$true] %s3147_s2 }
  0x10   :  { %192 = vmatpush.msra.mxu3 %v125_v2  ;;  %132 = vmatpush.msra.mxu0 %v92_v3  ;;  %v89_v5 = vld [vmem:[#allocation5 + $0xd8] sm:$0xff]  ;;  %v90_v6 = vld [vmem:[#allocation5 + $0xe0] sm:$0xff]  ;;  %v124_v7 = vld [vmem:[#allocation5 + $0x1f0] sm:$0xff] }
  0x11   :  { %173 = vmatpush.msra.mxu2 %v91_v1  ;;  %v121_v8 = vld [vmem:[#allocation5 + $0x1d8] sm:$0xff]  ;;  %v88_v9 = vld [vmem:[#allocation5 + $0xd0] sm:$0xff]  ;;  %v122_v10 = vld [vmem:[#allocation5 + $0x1e0] sm:$0xff]  ;;  %152 = vmatpush.msra.mxu1 %v124_v7 }
  0x12   :  { %193 = vmatpush.msra.mxu3 %v123_v4  ;;  %133 = vmatpush.msra.mxu0 %v90_v6  ;;  %v87_v11 = vld [vmem:[#allocation5 + $0xc8] sm:$0xff]  ;;  %v86_v13 = vld [vmem:[#allocation5 + $0xc0] sm:$0xff]  ;;  %v120_v14 = vld [vmem:[#allocation5 + $0x1d0] sm:$0xff] }
  0x13   :  { %v119_v12 = vld [vmem:[#allocation5 + $0x1c8] sm:$0xff]  ;;  %174 = vmatpush.msra.mxu2 %v89_v5  ;;  %153 = vmatpush.msra.mxu1 %v122_v10  ;;  %v85_v15 = vld [vmem:[#allocation5 + $0xb8] sm:$0xff]  ;;  %v84_v17 = vld [vmem:[#allocation5 + $0xb0] sm:$0xff] }
  0x14   :  { %194 = vmatpush.msra.mxu3 %v121_v8  ;;  %134 = vmatpush.msra.mxu0 %v88_v9  ;;  %v117_v16 = vld [vmem:[#allocation5 + $0x1b8] sm:$0xff]  ;;  %v118_v18 = vld [vmem:[#allocation5 + $0x1c0] sm:$0xff]  ;;  %v83_v19 = vld [vmem:[#allocation5 + $0xa8] sm:$0xff] }
  0x15   :  { %175 = vmatpush.msra.mxu2 %v87_v11  ;;  %154 = vmatpush.msra.mxu1 %v120_v14  ;;  %v115_v20 = vld [vmem:[#allocation5 + $0x1a8] sm:$0xff]  ;;  %v82_v21 = vld [vmem:[#allocation5 + $0xa0] sm:$0xff]  ;;  %v116_v22 = vld [vmem:[#allocation5 + $0x1b0] sm:$0xff] }
  0x16   :  { %195 = vmatpush.msra.mxu3 %v119_v12  ;;  %135 = vmatpush.msra.mxu0 %v86_v13  ;;  %v81_v23 = vld [vmem:[#allocation5 + $0x98] sm:$0xff]  ;;  %v80_v25 = vld [vmem:[#allocation5 + $0x90] sm:$0xff]  ;;  %v114_v26 = vld [vmem:[#allocation5 + $0x1a0] sm:$0xff] }
  0x17   :  { %176 = vmatpush.msra.mxu2 %v85_v15  ;;  %155 = vmatpush.msra.mxu1 %v118_v18  ;;  %v113_v24 = vld [vmem:[#allocation5 + $0x198] sm:$0xff]  ;;  %v79_v27 = vld [vmem:[#allocation5 + $0x88] sm:$0xff]  ;;  %v78_v29 = vld [vmem:[#allocation5 + $0x80] sm:$0xff] }
  0x18   :  { %196 = vmatpush.msra.mxu3 %v117_v16  ;;  %136 = vmatpush.msra.mxu0 %v84_v17  ;;  %v111_v28 = vld [vmem:[#allocation5 + $0x188] sm:$0xff]  ;;  %v112_v30 = vld [vmem:[#allocation5 + $0x190] sm:$0xff]  ;;  %v77_v31 = vld [vmem:[#allocation5 + $0x78] sm:$0xff] }
  0x19   :  { %177 = vmatpush.msra.mxu2 %v83_v19  ;;  %156 = vmatpush.msra.mxu1 %v116_v22  ;;  %v109_v32 = vld [vmem:[#allocation5 + $0x178] sm:$0xff]  ;;  %v76_v33 = vld [vmem:[#allocation5 + $0x70] sm:$0xff]  ;;  %v110_v34 = vld [vmem:[#allocation5 + $0x180] sm:$0xff] }
  0x1a   :  { %197 = vmatpush.msra.mxu3 %v115_v20  ;;  %137 = vmatpush.msra.mxu0 %v82_v21  ;;  %v75_v35 = vld [vmem:[#allocation5 + $0x68] sm:$0xff]  ;;  %v74_v37 = vld [vmem:[#allocation5 + $0x60] sm:$0xff]  ;;  %v108_v38 = vld [vmem:[#allocation5 + $0x170] sm:$0xff] }
  0x1b   :  { %178 = vmatpush.msra.mxu2 %v81_v23  ;;  %157 = vmatpush.msra.mxu1 %v114_v26  ;;  %v107_v36 = vld [vmem:[#allocation5 + $0x168] sm:$0xff]  ;;  %v73_v39 = vld [vmem:[#allocation5 + $0x58] sm:$0xff]  ;;  %v72_v41 = vld [vmem:[#allocation5 + $0x50] sm:$0xff] }
  0x1c   :  { %198 = vmatpush.msra.mxu3 %v113_v24  ;;  %138 = vmatpush.msra.mxu0 %v80_v25  ;;  %v105_v40 = vld [vmem:[#allocation5 + $0x158] sm:$0xff]  ;;  %v106_v42 = vld [vmem:[#allocation5 + $0x160] sm:$0xff]  ;;  %v71_v43 = vld [vmem:[#allocation5 + $0x48] sm:$0xff] }
  0x1d   :  { %179 = vmatpush.msra.mxu2 %v79_v27  ;;  %158 = vmatpush.msra.mxu1 %v112_v30  ;;  %v103_v44 = vld [vmem:[#allocation5 + $0x148] sm:$0xff]  ;;  %v70_v45 = vld [vmem:[#allocation5 + $0x40] sm:$0xff]  ;;  %v104_v46 = vld [vmem:[#allocation5 + $0x150] sm:$0xff] }
  0x1e   :  { %199 = vmatpush.msra.mxu3 %v111_v28  ;;  %139 = vmatpush.msra.mxu0 %v78_v29  ;;  %v69_v47 = vld [vmem:[#allocation5 + $0x38] sm:$0xff]  ;;  %v68_v49 = vld [vmem:[#allocation5 + $0x30] sm:$0xff]  ;;  %v102_v50 = vld [vmem:[#allocation5 + $0x140] sm:$0xff] }
  0x1f   :  { %180 = vmatpush.msra.mxu2 %v77_v31  ;;  %159 = vmatpush.msra.mxu1 %v110_v34  ;;  %v101_v48 = vld [vmem:[#allocation5 + $0x138] sm:$0xff]  ;;  %v67_v51 = vld [vmem:[#allocation5 + $0x28] sm:$0xff]  ;;  %v66_v53 = vld [vmem:[#allocation5 + $0x20] sm:$0xff] }
  0x20   :  { %200 = vmatpush.msra.mxu3 %v109_v32  ;;  %140 = vmatpush.msra.mxu0 %v76_v33  ;;  %v99_v52 = vld [vmem:[#allocation5 + $0x128] sm:$0xff]  ;;  %v100_v54 = vld [vmem:[#allocation5 + $0x130] sm:$0xff]  ;;  %v65_v55 = vld [vmem:[#allocation5 + $0x18] sm:$0xff] }
  0x21   :  { %181 = vmatpush.msra.mxu2 %v75_v35  ;;  %160 = vmatpush.msra.mxu1 %v108_v38  ;;  %v97_v56 = vld [vmem:[#allocation5 + $0x118] sm:$0xff]  ;;  %v64_v57 = vld [vmem:[#allocation5 + $0x10] sm:$0xff]  ;;  %v98_v58 = vld [vmem:[#allocation5 + $0x120] sm:$0xff] }
  0x22   :  { %201 = vmatpush.msra.mxu3 %v107_v36  ;;  %141 = vmatpush.msra.mxu0 %v74_v37  ;;  %v63_v59 = vld [vmem:[#allocation5 + $0x8] sm:$0xff]  ;;  %v60_v61 = vld [vmem:[#allocation2] sm:$0xff]  ;;  %v61_v62 = vld [vmem:[#allocation2 + $0x8] sm:$0xff] }
  0x23   :  { %182 = vmatpush.msra.mxu2 %v73_v39  ;;  %161 = vmatpush.msra.mxu1 %v106_v42  ;;  %v95_v60 = vld [vmem:[#allocation5 + $0x108] sm:$0xff]  ;;  %v62_v63 = vld [vmem:[#allocation5] sm:$0xff]  ;;  %v96_v0 = vld [vmem:[#allocation5 + $0x110] sm:$0xff] }
  0x24   :  { %202 = vmatpush.msra.mxu3 %v105_v40  ;;  %142 = vmatpush.msra.mxu0 %v72_v41  ;;  %v246_v1 = vld [vmem:[#allocation5 + $0x2f8] sm:$0xff]  ;;  %v94_v2 = vld [vmem:[#allocation5 + $0x100] sm:$0xff]  ;;  %v245_v3 = vld [vmem:[#allocation5 + $0x2f0] sm:$0xff] }
  0x25   :  { %183 = vmatpush.msra.mxu2 %v71_v43  ;;  %162 = vmatpush.msra.mxu1 %v104_v46  ;;  %v244_v4 = vld [vmem:[#allocation5 + $0x2e8] sm:$0xff]  ;;  %v243_v5 = vld [vmem:[#allocation5 + $0x2e0] sm:$0xff]  ;;  %v277_v6 = vld [vmem:[#allocation5 + $0x3f0] sm:$0xff] }
  0x26   :  { %203 = vmatpush.msra.mxu3 %v103_v44  ;;  %143 = vmatpush.msra.mxu0 %v70_v45  ;;  %v278_v7 = vld [vmem:[#allocation5 + $0x3f8] sm:$0xff]  ;;  %v241_v9 = vld [vmem:[#allocation5 + $0x2d0] sm:$0xff]  ;;  %v275_v10 = vld [vmem:[#allocation5 + $0x3e0] sm:$0xff] }
  0x27   :  { %184 = vmatpush.msra.mxu2 %v69_v47  ;;  %163 = vmatpush.msra.mxu1 %v102_v50  ;;  %v242_v8 = vld [vmem:[#allocation5 + $0x2d8] sm:$0xff]  ;;  %v276_v11 = vld [vmem:[#allocation5 + $0x3e8] sm:$0xff]  ;;  %v239_v13 = vld [vmem:[#allocation5 + $0x2c0] sm:$0xff] }
  0x28   :  { %204 = vmatpush.msra.mxu3 %v101_v48  ;;  %144 = vmatpush.msra.mxu0 %v68_v49  ;;  %v240_v12 = vld [vmem:[#allocation5 + $0x2c8] sm:$0xff]  ;;  %v273_v14 = vld [vmem:[#allocation5 + $0x3d0] sm:$0xff]  ;;  %v274_v15 = vld [vmem:[#allocation5 + $0x3d8] sm:$0xff] }
  0x29   :  { %185 = vmatpush.msra.mxu2 %v67_v51  ;;  %164 = vmatpush.msra.mxu1 %v100_v54  ;;  %v238_v16 = vld [vmem:[#allocation5 + $0x2b8] sm:$0xff]  ;;  %v237_v17 = vld [vmem:[#allocation5 + $0x2b0] sm:$0xff]  ;;  %v271_v18 = vld [vmem:[#allocation5 + $0x3c0] sm:$0xff] }
  0x2a   :  { %205 = vmatpush.msra.mxu3 %v99_v52  ;;  %145 = vmatpush.msra.mxu0 %v66_v53  ;;  %v272_v19 = vld [vmem:[#allocation5 + $0x3c8] sm:$0xff]  ;;  %v235_v21 = vld [vmem:[#allocation5 + $0x2a0] sm:$0xff]  ;;  %v269_v22 = vld [vmem:[#allocation5 + $0x3b0] sm:$0xff] }
  0x2b   :  { %186 = vmatpush.msra.mxu2 %v65_v55  ;;  %165 = vmatpush.msra.mxu1 %v98_v58  ;;  %v236_v20 = vld [vmem:[#allocation5 + $0x2a8] sm:$0xff]  ;;  %v270_v23 = vld [vmem:[#allocation5 + $0x3b8] sm:$0xff]  ;;  %v233_v25 = vld [vmem:[#allocation5 + $0x290] sm:$0xff] }
  0x2c   :  { %206 = vmatpush.msra.mxu3 %v97_v56  ;;  %146 = vmatpush.msra.mxu0 %v64_v57  ;;  %v234_v24 = vld [vmem:[#allocation5 + $0x298] sm:$0xff]  ;;  %v267_v26 = vld [vmem:[#allocation5 + $0x3a0] sm:$0xff]  ;;  %v268_v27 = vld [vmem:[#allocation5 + $0x3a8] sm:$0xff] }
  0x2d   :  { %187 = vmatpush.msra.mxu2 %v63_v59  ;;  %166 = vmatpush.msra.mxu1 %v96_v0  ;;  %v232_v28 = vld [vmem:[#allocation5 + $0x288] sm:$0xff]  ;;  %v231_v29 = vld [vmem:[#allocation5 + $0x280] sm:$0xff]  ;;  %v265_v30 = vld [vmem:[#allocation5 + $0x390] sm:$0xff] }
  0x2e   :  { %207 = vmatpush.msra.mxu3 %v95_v60  ;;  %188 = vmatmul.f32.vlgmr.msra.gmra.mxu2 %v60_v61  ;;  %v266_v31 = vld [vmem:[#allocation5 + $0x398] sm:$0xff]  ;;  %v229_v33 = vld [vmem:[#allocation5 + $0x270] sm:$0xff]  ;;  %v263_v34 = vld [vmem:[#allocation5 + $0x380] sm:$0xff] }
  0x2f   :  { %208 = vmatmul.f32.vlgmr.msra.gmra.mxu3 %v61_v62  ;;  %147 = vmatpush.msra.mxu0 %v62_v63  ;;  %v230_v32 = vld [vmem:[#allocation5 + $0x278] sm:$0xff]  ;;  %v264_v35 = vld [vmem:[#allocation5 + $0x388] sm:$0xff]  ;;  %v227_v37 = vld [vmem:[#allocation5 + $0x260] sm:$0xff] }
  0x30   :  { %148 = vmatmul.f32.vlgmr.msra.gmra.mxu0 %v60_v61  ;;  %326 = vmatpush.msrb.mxu2 %v246_v1  ;;  %v228_v36 = vld [vmem:[#allocation5 + $0x268] sm:$0xff]  ;;  %v261_v38 = vld [vmem:[#allocation5 + $0x370] sm:$0xff]  ;;  %v262_v39 = vld [vmem:[#allocation5 + $0x378] sm:$0xff] }
  0x31   :  { %167 = vmatpush.msra.mxu1 %v94_v2  ;;  %286 = vmatpush.msrb.mxu0 %v245_v3  ;;  %v226_v40 = vld [vmem:[#allocation5 + $0x258] sm:$0xff]  ;;  %v225_v41 = vld [vmem:[#allocation5 + $0x250] sm:$0xff]  ;;  %v259_v42 = vld [vmem:[#allocation5 + $0x360] sm:$0xff] }
  0x32   :  { %168 = vmatmul.f32.vlgmr.msra.gmra.mxu1 %v61_v62  ;;  %327 = vmatpush.msrb.mxu2 %v244_v4  ;;  %v260_v43 = vld [vmem:[#allocation5 + $0x368] sm:$0xff]  ;;  %v223_v45 = vld [vmem:[#allocation5 + $0x240] sm:$0xff]  ;;  %v257_v46 = vld [vmem:[#allocation5 + $0x350] sm:$0xff] }
  0x33   :  { %287 = vmatpush.msrb.mxu0 %v243_v5  ;;  %306 = vmatpush.msrb.mxu1 %v277_v6  ;;  %v224_v44 = vld [vmem:[#allocation5 + $0x248] sm:$0xff]  ;;  %v258_v47 = vld [vmem:[#allocation5 + $0x358] sm:$0xff]  ;;  %v221_v48 = vld [vmem:[#allocation5 + $0x230] sm:$0xff] }
  0x34   :  { %346 = vmatpush.msrb.mxu3 %v278_v7  ;;  %328 = vmatpush.msrb.mxu2 %v242_v8  ;;  %v255_v49 = vld [vmem:[#allocation5 + $0x340] sm:$0xff]  ;;  %v222_v50 = vld [vmem:[#allocation5 + $0x238] sm:$0xff]  ;;  %v256_v51 = vld [vmem:[#allocation5 + $0x348] sm:$0xff] }
  0x35   :  { %288 = vmatpush.msrb.mxu0 %v241_v9  ;;  %307 = vmatpush.msrb.mxu1 %v275_v10  ;;  %v219_v52 = vld [vmem:[#allocation5 + $0x220] sm:$0xff]  ;;  %v253_v53 = vld [vmem:[#allocation5 + $0x330] sm:$0xff]  ;;  %v220_v54 = vld [vmem:[#allocation5 + $0x228] sm:$0xff] }
  0x36   :  { %347 = vmatpush.msrb.mxu3 %v276_v11  ;;  %329 = vmatpush.msrb.mxu2 %v240_v12  ;;  %v254_v55 = vld [vmem:[#allocation5 + $0x338] sm:$0xff]  ;;  %v217_v56 = vld [vmem:[#allocation5 + $0x210] sm:$0xff]  ;;  %v251_v57 = vld [vmem:[#allocation5 + $0x320] sm:$0xff] }
  0x37   :  { %289 = vmatpush.msrb.mxu0 %v239_v13  ;;  %308 = vmatpush.msrb.mxu1 %v273_v14  ;;  %v218_v58 = vld [vmem:[#allocation5 + $0x218] sm:$0xff]  ;;  %v252_v59 = vld [vmem:[#allocation5 + $0x328] sm:$0xff]  ;;  %v215_v60 = vld [vmem:[#allocation5 + $0x200] sm:$0xff] }
  0x38   :  { %348 = vmatpush.msrb.mxu3 %v274_v15  ;;  %330 = vmatpush.msrb.mxu2 %v238_v16  ;;  %v249_v61 = vld [vmem:[#allocation5 + $0x310] sm:$0xff]  ;;  %v216_v62 = vld [vmem:[#allocation5 + $0x208] sm:$0xff]  ;;  %v250_v63 = vld [vmem:[#allocation5 + $0x318] sm:$0xff] }
  0x39   :  { %290 = vmatpush.msrb.mxu0 %v237_v17  ;;  %309 = vmatpush.msrb.mxu1 %v271_v18  ;;  %v247_v0 = vld [vmem:[#allocation5 + $0x300] sm:$0xff]  ;;  %v248_v1 = vld [vmem:[#allocation5 + $0x308] sm:$0xff]  ;;  %v399_v2 = vld [vmem:[#allocation5 + $0x4f0] sm:$0xff] }
  0x3a   :  { %349 = vmatpush.msrb.mxu3 %v272_v19  ;;  %331 = vmatpush.msrb.mxu2 %v236_v20  ;;  %v400_v3 = vld [vmem:[#allocation5 + $0x4f8] sm:$0xff]  ;;  %v397_v4 = vld [vmem:[#allocation5 + $0x4e0] sm:$0xff]  ;;  %v398_v5 = vld [vmem:[#allocation5 + $0x4e8] sm:$0xff] }
  0x3b   :  { %291 = vmatpush.msrb.mxu0 %v235_v21  ;;  %310 = vmatpush.msrb.mxu1 %v269_v22  ;;  %v395_v6 = vld [vmem:[#allocation5 + $0x4d0] sm:$0xff]  ;;  %v396_v7 = vld [vmem:[#allocation5 + $0x4d8] sm:$0xff]  ;;  %v429_v10 = vld [vmem:[#allocation5 + $0x5e0] sm:$0xff] }
  0x3c   :  { %350 = vmatpush.msrb.mxu3 %v270_v23  ;;  %332 = vmatpush.msrb.mxu2 %v234_v24  ;;  %v431_v8 = vld [vmem:[#allocation5 + $0x5f0] sm:$0xff]  ;;  %v432_v9 = vld [vmem:[#allocation5 + $0x5f8] sm:$0xff]  ;;  %v393_v11 = vld [vmem:[#allocation5 + $0x4c0] sm:$0xff] }
  0x3d   :  { %292 = vmatpush.msrb.mxu0 %v233_v25  ;;  %311 = vmatpush.msrb.mxu1 %v267_v26  ;;  %v394_v12 = vld [vmem:[#allocation5 + $0x4c8] sm:$0xff]  ;;  %v427_v14 = vld [vmem:[#allocation5 + $0x5d0] sm:$0xff]  ;;  %v428_v15 = vld [vmem:[#allocation5 + $0x5d8] sm:$0xff] }
  0x3e   :  { %351 = vmatpush.msrb.mxu3 %v268_v27  ;;  %333 = vmatpush.msrb.mxu2 %v232_v28  ;;  %v430_v13 = vld [vmem:[#allocation5 + $0x5e8] sm:$0xff]  ;;  %v391_v16 = vld [vmem:[#allocation5 + $0x4b0] sm:$0xff]  ;;  %v392_v17 = vld [vmem:[#allocation5 + $0x4b8] sm:$0xff] }
  0x3f   :  { %293 = vmatpush.msrb.mxu0 %v231_v29  ;;  %312 = vmatpush.msrb.mxu1 %v265_v30  ;;  %v425_v18 = vld [vmem:[#allocation5 + $0x5c0] sm:$0xff]  ;;  %v426_v19 = vld [vmem:[#allocation5 + $0x5c8] sm:$0xff]  ;;  %v423_v22 = vld [vmem:[#allocation5 + $0x5b0] sm:$0xff] }
  0x40   :  { %352 = vmatpush.msrb.mxu3 %v266_v31  ;;  %334 = vmatpush.msrb.mxu2 %v230_v32  ;;  %v389_v20 = vld [vmem:[#allocation5 + $0x4a0] sm:$0xff]  ;;  %v390_v21 = vld [vmem:[#allocation5 + $0x4a8] sm:$0xff]  ;;  %v424_v23 = vld [vmem:[#allocation5 + $0x5b8] sm:$0xff] }
  0x41   :  { %294 = vmatpush.msrb.mxu0 %v229_v33  ;;  %313 = vmatpush.msrb.mxu1 %v263_v34  ;;  %v387_v24 = vld [vmem:[#allocation5 + $0x490] sm:$0xff]  ;;  %v388_v25 = vld [vmem:[#allocation5 + $0x498] sm:$0xff]  ;;  %v421_v26 = vld [vmem:[#allocation5 + $0x5a0] sm:$0xff] }
  0x42   :  { %353 = vmatpush.msrb.mxu3 %v264_v35  ;;  %335 = vmatpush.msrb.mxu2 %v228_v36  ;;  %v422_v27 = vld [vmem:[#allocation5 + $0x5a8] sm:$0xff]  ;;  %v385_v28 = vld [vmem:[#allocation5 + $0x480] sm:$0xff]  ;;  %v419_v30 = vld [vmem:[#allocation5 + $0x590] sm:$0xff] }
  0x43   :  { %295 = vmatpush.msrb.mxu0 %v227_v37  ;;  %314 = vmatpush.msrb.mxu1 %v261_v38  ;;  %v386_v29 = vld [vmem:[#allocation5 + $0x488] sm:$0xff]  ;;  %v420_v31 = vld [vmem:[#allocation5 + $0x598] sm:$0xff]  ;;  %v383_v32 = vld [vmem:[#allocation5 + $0x470] sm:$0xff] }
  0x44   :  { %354 = vmatpush.msrb.mxu3 %v262_v39  ;;  %336 = vmatpush.msrb.mxu2 %v226_v40  ;;  %v384_v33 = vld [vmem:[#allocation5 + $0x478] sm:$0xff]  ;;  %v126_v34 = vld [vmem:[#allocation7] sm:$0x3]  ;;  %v418_v36 = vld [vmem:[#allocation5 + $0x588] sm:$0xff] }
  0x45   :  { %296 = vmatpush.msrb.mxu0 %v225_v41  ;;  %315 = vmatpush.msrb.mxu1 %v259_v42  ;;  %v417_v35 = vld [vmem:[#allocation5 + $0x580] sm:$0xff]  ;;  %v382_v38 = vld [vmem:[#allocation5 + $0x468] sm:$0xff]  ;;  %v415_v39 = vld [vmem:[#allocation5 + $0x570] sm:$0xff]  ;;  %v128_v41 = vperm.slane %v126_v34, 0 }
  0x46   :  { %355 = vmatpush.msrb.mxu3 %v260_v43  ;;  %337 = vmatpush.msrb.mxu2 %v224_v44  ;;  %v381_v37 = vld [vmem:[#allocation5 + $0x460] sm:$0xff]  ;;  %v416_v40 = vld [vmem:[#allocation5 + $0x578] sm:$0xff]  ;;  %v379_v42 = vld [vmem:[#allocation5 + $0x450] sm:$0xff] }
  0x47   :  { %297 = vmatpush.msrb.mxu0 %v223_v45  ;;  %316 = vmatpush.msrb.mxu1 %v257_v46  ;;  %v380_v43 = vld [vmem:[#allocation5 + $0x458] sm:$0xff]  ;;  %v377_v44 = vld [vmem:[#allocation5 + $0x440] sm:$0xff]  ;;  %v378_v45 = vld [vmem:[#allocation5 + $0x448] sm:$0xff] }
  0x48   :  { %356 = vmatpush.msrb.mxu3 %v258_v47  ;;  %338 = vmatpush.msrb.mxu2 %v222_v50 }
  0x49   :  { %298 = vmatpush.msrb.mxu0 %v221_v48  ;;  %317 = vmatpush.msrb.mxu1 %v255_v49  ;;  %v129_v48 = vperm.slane %v126_v34, 1  ;;  %v544_v34 = vld [vmem:[#allocation5 + $0x6a8] sm:$0xff] }
  0x4a   :  { %357 = vmatpush.msrb.mxu3 %v256_v51  ;;  %339 = vmatpush.msrb.mxu2 %v220_v54 }
  0x4b   :  { %299 = vmatpush.msrb.mxu0 %v219_v52  ;;  %318 = vmatpush.msrb.mxu1 %v253_v53 }
  0x4c   :  { %358 = vmatpush.msrb.mxu3 %v254_v55  ;;  %340 = vmatpush.msrb.mxu2 %v218_v58  ;;  %v413_v58 = vld [vmem:[#allocation5 + $0x560] sm:$0xff] }
  0x4d   :  { %300 = vmatpush.msrb.mxu0 %v217_v56  ;;  %319 = vmatpush.msrb.mxu1 %v251_v57  ;;  %v375_v57 = vld [vmem:[#allocation5 + $0x430] sm:$0xff] }
  0x4e   :  { %359 = vmatpush.msrb.mxu3 %v252_v59  ;;  %341 = vmatpush.msrb.mxu2 %v216_v62  ;;  %v376_v59 = vld [vmem:[#allocation5 + $0x438] sm:$0xff]  ;;  %v411_v62 = vld [vmem:[#allocation5 + $0x550] sm:$0xff] }
  0x4f   :  { %301 = vmatpush.msrb.mxu0 %v215_v60  ;;  %320 = vmatpush.msrb.mxu1 %v249_v61  ;;  %v414_v60 = vld [vmem:[#allocation5 + $0x568] sm:$0xff]  ;;  %v373_v61 = vld [vmem:[#allocation5 + $0x420] sm:$0xff] }
  0x50   :  { %360 = vmatpush.msrb.mxu3 %v250_v63  ;;  %480 = vmatpush.msra.mxu2 %v400_v3  ;;  %v374_v63 = vld [vmem:[#allocation5 + $0x428] sm:$0xff]  ;;  %v372_v3 = vld [vmem:[#allocation5 + $0x418] sm:$0xff] }
  0x51   :  { %321 = vmatpush.msrb.mxu1 %v247_v0  ;;  %440 = vmatpush.msra.mxu0 %v399_v2  ;;  %v412_v0 = vld [vmem:[#allocation5 + $0x558] sm:$0xff]  ;;  %v409_v2 = vld [vmem:[#allocation5 + $0x540] sm:$0xff] }
  0x52   :  { %361 = vmatpush.msrb.mxu3 %v248_v1  ;;  %481 = vmatpush.msra.mxu2 %v398_v5  ;;  %v371_v1 = vld [vmem:[#allocation5 + $0x410] sm:$0xff]  ;;  %v369_v5 = vld [vmem:[#allocation5 + $0x400] sm:$0xff] }
  0x53   :  { %441 = vmatpush.msra.mxu0 %v397_v4  ;;  %460 = vmatpush.msra.mxu1 %v431_v8  ;;  %v410_v4 = vld [vmem:[#allocation5 + $0x548] sm:$0xff]  ;;  %v408_v8 = vld [vmem:[#allocation5 + $0x538] sm:$0xff] }
  0x54   :  { %500 = vmatpush.msra.mxu3 %v432_v9  ;;  %482 = vmatpush.msra.mxu2 %v396_v7  ;;  %v370_v7 = vld [vmem:[#allocation5 + $0x408] sm:$0xff]  ;;  %v405_v9 = vld [vmem:[#allocation5 + $0x520] sm:$0xff] }
  0x55   :  { %442 = vmatpush.msra.mxu0 %v395_v6  ;;  %461 = vmatpush.msra.mxu1 %v429_v10  ;;  %v407_v6 = vld [vmem:[#allocation5 + $0x530] sm:$0xff]  ;;  %v406_v10 = vld [vmem:[#allocation5 + $0x528] sm:$0xff] }
  0x56   :  { %501 = vmatpush.msra.mxu3 %v430_v13  ;;  %483 = vmatpush.msra.mxu2 %v394_v12  ;;  %v404_v12 = vld [vmem:[#allocation5 + $0x518] sm:$0xff]  ;;  %v401_v13 = vld [vmem:[#allocation5 + $0x500] sm:$0xff] }
  0x57   :  { %443 = vmatpush.msra.mxu0 %v393_v11  ;;  %462 = vmatpush.msra.mxu1 %v427_v14  ;;  %v403_v11 = vld [vmem:[#allocation5 + $0x510] sm:$0xff]  ;;  %v402_v14 = vld [vmem:[#allocation5 + $0x508] sm:$0xff] }
  0x58   :  { %502 = vmatpush.msra.mxu3 %v428_v15  ;;  %484 = vmatpush.msra.mxu2 %v392_v17  ;;  %v553_v15 = vld [vmem:[#allocation5 + $0x6f0] sm:$0xff]  ;;  %v551_v17 = vld [vmem:[#allocation5 + $0x6e0] sm:$0xff] }
  0x59   :  { %444 = vmatpush.msra.mxu0 %v391_v16  ;;  %463 = vmatpush.msra.mxu1 %v425_v18  ;;  %v554_v16 = vld [vmem:[#allocation5 + $0x6f8] sm:$0xff]  ;;  %v552_v18 = vld [vmem:[#allocation5 + $0x6e8] sm:$0xff] }
  0x5a   :  { %503 = vmatpush.msra.mxu3 %v426_v19  ;;  %485 = vmatpush.msra.mxu2 %v390_v21  ;;  %v549_v19 = vld [vmem:[#allocation5 + $0x6d0] sm:$0xff] }
  0x5b   :  { %445 = vmatpush.msra.mxu0 %v389_v20  ;;  %464 = vmatpush.msra.mxu1 %v423_v22  ;;  %v550_v20 = vld [vmem:[#allocation5 + $0x6d8] sm:$0xff]  ;;  %v585_v21 = vld [vmem:[#allocation5 + $0x7f0] sm:$0xff] }
  0x5c   :  { %504 = vmatpush.msra.mxu3 %v424_v23  ;;  %486 = vmatpush.msra.mxu2 %v388_v25  ;;  %v586_v22 = vld [vmem:[#allocation5 + $0x7f8] sm:$0xff]  ;;  %v583_v23 = vld [vmem:[#allocation5 + $0x7e0] sm:$0xff]  ;;  %v548_v25 = vld [vmem:[#allocation5 + $0x6c8] sm:$0xff] }
  0x5d   :  { %446 = vmatpush.msra.mxu0 %v387_v24  ;;  %465 = vmatpush.msra.mxu1 %v421_v26  ;;  %v547_v24 = vld [vmem:[#allocation5 + $0x6c0] sm:$0xff]  ;;  %v584_v26 = vld [vmem:[#allocation5 + $0x7e8] sm:$0xff] }
  0x5e   :  { %505 = vmatpush.msra.mxu3 %v422_v27  ;;  %487 = vmatpush.msra.mxu2 %v386_v29  ;;  %v581_v27 = vld [vmem:[#allocation5 + $0x7d0] sm:$0xff] }
  0x5f   :  { %447 = vmatpush.msra.mxu0 %v385_v28  ;;  %466 = vmatpush.msra.mxu1 %v419_v30  ;;  %v582_v28 = vld [vmem:[#allocation5 + $0x7d8] sm:$0xff]  ;;  %v545_v29 = vld [vmem:[#allocation5 + $0x6b0] sm:$0xff] }
  0x60   :  { %506 = vmatpush.msra.mxu3 %v420_v31  ;;  %488 = vmatpush.msra.mxu2 %v384_v33  ;;  %v546_v30 = vld [vmem:[#allocation5 + $0x6b8] sm:$0xff]  ;;  %v579_v31 = vld [vmem:[#allocation5 + $0x7c0] sm:$0xff] }
  0x61   :  { %448 = vmatpush.msra.mxu0 %v383_v32  ;;  %467 = vmatpush.msra.mxu1 %v417_v35  ;;  %v580_v32 = vld [vmem:[#allocation5 + $0x7c8] sm:$0xff]  ;;  %v543_v33 = vld [vmem:[#allocation5 + $0x6a0] sm:$0xff]  ;;  %v577_v35 = vld [vmem:[#allocation5 + $0x7b0] sm:$0xff] }
  0x62   :  { %507 = vmatpush.msra.mxu3 %v418_v36  ;;  %489 = vmatpush.msra.mxu2 %v382_v38  ;;  %v578_v36 = vld [vmem:[#allocation5 + $0x7b8] sm:$0xff] }
  0x63   :  { %449 = vmatpush.msra.mxu0 %v381_v37  ;;  %468 = vmatpush.msra.mxu1 %v415_v39  ;;  %v541_v37 = vld [vmem:[#allocation5 + $0x690] sm:$0xff]  ;;  %v542_v38 = vld [vmem:[#allocation5 + $0x698] sm:$0xff]  ;;  %v280_v39 = vld [vmem:[#allocation7 + $0x2] sm:$0x3] }
  0x64   :  { %508 = vmatpush.msra.mxu3 %v416_v40  ;;  %490 = vmatpush.msra.mxu2 %v380_v43  ;;  %v575_v40 = vld [vmem:[#allocation5 + $0x7a0] sm:$0xff]  ;;  %v540_v43 = vld [vmem:[#allocation5 + $0x688] sm:$0xff] }
  0x65   :  { %450 = vmatpush.msra.mxu0 %v379_v42  ;;  %469 = vmatpush.msra.mxu1 %v413_v58  ;;  %v539_v42 = vld [vmem:[#allocation5 + $0x680] sm:$0xff] }
  0x66   :  { %491 = vmatpush.msra.mxu2 %v378_v45  ;;  %509 = vmatpush.msra.mxu3 %v414_v60  ;;  %v574_v45 = vld [vmem:[#allocation5 + $0x798] sm:$0xff] }
  0x67   :  { %451 = vmatpush.msra.mxu0 %v377_v44  ;;  %470 = vmatpush.msra.mxu1 %v411_v62  ;;  %v573_v44 = vld [vmem:[#allocation5 + $0x790] sm:$0xff] }
  0x68   :  { %492 = vmatpush.msra.mxu2 %v376_v59  ;;  %510 = vmatpush.msra.mxu3 %v412_v0  ;;  %v533_v62 = vld [vmem:[#allocation5 + $0x650] sm:$0xff]  ;;  %v534_v0 = vld [vmem:[#allocation5 + $0x658] sm:$0xff] }
  0x69   :  { %452 = vmatpush.msra.mxu0 %v375_v57  ;;  %471 = vmatpush.msra.mxu1 %v409_v2  ;;  %v531_v2 = vld [vmem:[#allocation5 + $0x640] sm:$0xff] }
  0x6a   :  { %493 = vmatpush.msra.mxu2 %v374_v63  ;;  %511 = vmatpush.msra.mxu3 %v410_v4  ;;  %v571_v63 = vld [vmem:[#allocation5 + $0x780] sm:$0xff]  ;;  %v532_v4 = vld [vmem:[#allocation5 + $0x648] sm:$0xff] }
  0x6b   :  { %453 = vmatpush.msra.mxu0 %v373_v61  ;;  %472 = vmatpush.msra.mxu1 %v407_v6  ;;  %v529_v6 = vld [vmem:[#allocation5 + $0x630] sm:$0xff] }
  0x6c   :  { %494 = vmatpush.msra.mxu2 %v372_v3  ;;  %512 = vmatpush.msra.mxu3 %v408_v8  ;;  %v569_v3 = vld [vmem:[#allocation5 + $0x770] sm:$0xff]  ;;  %v530_v8 = vld [vmem:[#allocation5 + $0x638] sm:$0xff] }
  0x6d   :  { %454 = vmatpush.msra.mxu0 %v371_v1  ;;  %473 = vmatpush.msra.mxu1 %v405_v9  ;;  %v572_v1 = vld [vmem:[#allocation5 + $0x788] sm:$0xff] }
  0x6e   :  { %495 = vmatpush.msra.mxu2 %v370_v7  ;;  %513 = vmatpush.msra.mxu3 %v406_v10  ;;  %v567_v7 = vld [vmem:[#allocation5 + $0x760] sm:$0xff]  ;;  %v568_v9 = vld [vmem:[#allocation5 + $0x768] sm:$0xff] }
  0x6f   :  { %455 = vmatpush.msra.mxu0 %v369_v5  ;;  %474 = vmatpush.msra.mxu1 %v403_v11  ;;  %v570_v5 = vld [vmem:[#allocation5 + $0x778] sm:$0xff]  ;;  %v527_v10 = vld [vmem:[#allocation5 + $0x620] sm:$0xff]  ;;  %v565_v11 = vld [vmem:[#allocation5 + $0x750] sm:$0xff] }
  0x70   :  { %514 = vmatpush.msra.mxu3 %v404_v12  ;;  %v528_v12 = vld [vmem:[#allocation5 + $0x628] sm:$0xff] }
  0x71   :  { %475 = vmatpush.msra.mxu1 %v401_v13  ;;  %v566_v13 = vld [vmem:[#allocation5 + $0x758] sm:$0xff] }
  0x72   :  { %515 = vmatpush.msra.mxu3 %v402_v14  ;;  %v525_v14 = vld [vmem:[#allocation5 + $0x610] sm:$0xff] }
  0xad   :  { %v149_v46 = vpop.f32.mrf.mxu0 }
  0xae   :  { %v150_v47 = vadd.f32 %v149_v46, %v128_v41  ;;  %v576_v41 = vld [vmem:[#allocation5 + $0x7a8] sm:$0xff]  ;;  %v282_v46 = vperm.slane %v280_v39, 0 }
  0xaf   :  { %v169_v49 = vpop.f32.mrf.mxu1 }
  0xb0   :  { %v170_v50 = vadd.f32 %v169_v49, %v150_v47  ;;  %v537_v47 = vld [vmem:[#allocation5 + $0x670] sm:$0xff]  ;;  %v535_v49 = vld [vmem:[#allocation5 + $0x660] sm:$0xff] }
  0xb1   :  { %v189_v51 = vpop.f32.mrf.mxu2 }
  0xb2   :  { %v209_v52 = vpop.f32.mrf.mxu3  ;;  %v212_v53 = vmax.f32 %v170_v50, 0.0  ;;  %v190_v54 = vadd.f32 %v189_v51, %v129_v48  ;;  %v538_v48 = vld [vmem:[#allocation5 + $0x678] sm:$0xff]  ;;  %v536_v50 = vld [vmem:[#allocation5 + $0x668] sm:$0xff] }
  0xb4   :  { %v210_v55 = vadd.f32 %v209_v52, %v190_v54  ;;  %302 = vmatmul.f32.vlgmr.msrb.gmra.mxu0 %v212_v53  ;;  %342 = vmatmul.f32.vlgmr.msrb.gmra.mxu2 %v212_v53  ;;  %v283_v53 = vperm.slane %v280_v39, 1  ;;  %v738_v39 = vld [vmem:[#allocation5 + $0x9e8] sm:$0xff] }
  0xb5   :  { %594 = vmatpush.msrb.mxu0 %v553_v15  ;;  %634 = vmatpush.msrb.mxu2 %v554_v16  ;;  %v563_v15 = vld [vmem:[#allocation5 + $0x740] sm:$0xff]  ;;  %v526_v16 = vld [vmem:[#allocation5 + $0x618] sm:$0xff] }
  0xb6   :  { %v213_v56 = vmax.f32 %v210_v55, 0.0 }
  0xb7   :  { %595 = vmatpush.msrb.mxu0 %v551_v17  ;;  %635 = vmatpush.msrb.mxu2 %v552_v18  ;;  %v564_v17 = vld [vmem:[#allocation5 + $0x748] sm:$0xff]  ;;  %v523_v18 = vld [vmem:[#allocation5 + $0x600] sm:$0xff] }
  0xb8   :  { %322 = vmatmul.f32.vlgmr.msrb.gmra.mxu1 %v213_v56  ;;  %362 = vmatmul.f32.vlgmr.msrb.gmra.mxu3 %v213_v56 }
  0xb9   :  { %614 = vmatpush.msrb.mxu1 %v585_v21  ;;  %654 = vmatpush.msrb.mxu3 %v586_v22  ;;  %v562_v21 = vld [vmem:[#allocation5 + $0x738] sm:$0xff]  ;;  %v559_v22 = vld [vmem:[#allocation5 + $0x720] sm:$0xff] }
  0xba   :  { %596 = vmatpush.msrb.mxu0 %v549_v19  ;;  %636 = vmatpush.msrb.mxu2 %v550_v20  ;;  %v561_v19 = vld [vmem:[#allocation5 + $0x730] sm:$0xff]  ;;  %v524_v20 = vld [vmem:[#allocation5 + $0x608] sm:$0xff] }
  0xbb   :  { %615 = vmatpush.msrb.mxu1 %v583_v23  ;;  %655 = vmatpush.msrb.mxu3 %v584_v26  ;;  %v560_v23 = vld [vmem:[#allocation5 + $0x728] sm:$0xff]  ;;  %v555_v26 = vld [vmem:[#allocation5 + $0x700] sm:$0xff] }
  0xbc   :  { %597 = vmatpush.msrb.mxu0 %v547_v24  ;;  %637 = vmatpush.msrb.mxu2 %v548_v25  ;;  %v557_v24 = vld [vmem:[#allocation5 + $0x710] sm:$0xff]  ;;  %v558_v25 = vld [vmem:[#allocation5 + $0x718] sm:$0xff] }
  0xbd   :  { %616 = vmatpush.msrb.mxu1 %v581_v27  ;;  %656 = vmatpush.msrb.mxu3 %v582_v28  ;;  %v556_v27 = vld [vmem:[#allocation5 + $0x708] sm:$0xff]  ;;  %v707_v28 = vld [vmem:[#allocation5 + $0x8f0] sm:$0xff] }
  0xbe   :  { %598 = vmatpush.msrb.mxu0 %v545_v29  ;;  %638 = vmatpush.msrb.mxu2 %v546_v30  ;;  %v708_v29 = vld [vmem:[#allocation5 + $0x8f8] sm:$0xff]  ;;  %v705_v30 = vld [vmem:[#allocation5 + $0x8e0] sm:$0xff] }
  0xbf   :  { %617 = vmatpush.msrb.mxu1 %v579_v31  ;;  %657 = vmatpush.msrb.mxu3 %v580_v32  ;;  %v706_v31 = vld [vmem:[#allocation5 + $0x8e8] sm:$0xff]  ;;  %v703_v32 = vld [vmem:[#allocation5 + $0x8d0] sm:$0xff] }
  0xc0   :  { %599 = vmatpush.msrb.mxu0 %v543_v33  ;;  %639 = vmatpush.msrb.mxu2 %v544_v34  ;;  %v704_v33 = vld [vmem:[#allocation5 + $0x8d8] sm:$0xff]  ;;  %v739_v34 = vld [vmem:[#allocation5 + $0x9f0] sm:$0xff] }
  0xc1   :  { %618 = vmatpush.msrb.mxu1 %v577_v35  ;;  %658 = vmatpush.msrb.mxu3 %v578_v36  ;;  %v740_v35 = vld [vmem:[#allocation5 + $0x9f8] sm:$0xff]  ;;  %v737_v36 = vld [vmem:[#allocation5 + $0x9e0] sm:$0xff] }
  0xc2   :  { %600 = vmatpush.msrb.mxu0 %v541_v37  ;;  %640 = vmatpush.msrb.mxu2 %v542_v38  ;;  %v701_v37 = vld [vmem:[#allocation5 + $0x8c0] sm:$0xff]  ;;  %v702_v38 = vld [vmem:[#allocation5 + $0x8c8] sm:$0xff] }
  0xc3   :  { %619 = vmatpush.msrb.mxu1 %v575_v40  ;;  %659 = vmatpush.msrb.mxu3 %v576_v41  ;;  %v735_v40 = vld [vmem:[#allocation5 + $0x9d0] sm:$0xff]  ;;  %v736_v41 = vld [vmem:[#allocation5 + $0x9d8] sm:$0xff] }
  0xc4   :  { %601 = vmatpush.msrb.mxu0 %v539_v42  ;;  %641 = vmatpush.msrb.mxu2 %v540_v43  ;;  %v699_v42 = vld [vmem:[#allocation5 + $0x8b0] sm:$0xff]  ;;  %v700_v43 = vld [vmem:[#allocation5 + $0x8b8] sm:$0xff] }
  0xc5   :  { %620 = vmatpush.msrb.mxu1 %v573_v44  ;;  %660 = vmatpush.msrb.mxu3 %v574_v45  ;;  %v733_v44 = vld [vmem:[#allocation5 + $0x9c0] sm:$0xff]  ;;  %v734_v45 = vld [vmem:[#allocation5 + $0x9c8] sm:$0xff] }
  0xc6   :  { %602 = vmatpush.msrb.mxu0 %v537_v47  ;;  %642 = vmatpush.msrb.mxu2 %v538_v48  ;;  %v698_v47 = vld [vmem:[#allocation5 + $0x8a8] sm:$0xff]  ;;  %v731_v48 = vld [vmem:[#allocation5 + $0x9b0] sm:$0xff] }
  0xc7   :  { %621 = vmatpush.msrb.mxu1 %v571_v63  ;;  %661 = vmatpush.msrb.mxu3 %v572_v1  ;;  %v690_v63 = vld [vmem:[#allocation5 + $0x868] sm:$0xff] }
  0xc8   :  { %603 = vmatpush.msrb.mxu0 %v535_v49  ;;  %643 = vmatpush.msrb.mxu2 %v536_v50  ;;  %v732_v49 = vld [vmem:[#allocation5 + $0x9b8] sm:$0xff]  ;;  %v695_v50 = vld [vmem:[#allocation5 + $0x890] sm:$0xff] }
  0xc9   :  { %622 = vmatpush.msrb.mxu1 %v569_v3  ;;  %662 = vmatpush.msrb.mxu3 %v570_v5 }
  0xca   :  { %604 = vmatpush.msrb.mxu0 %v533_v62  ;;  %644 = vmatpush.msrb.mxu2 %v534_v0  ;;  %v689_v62 = vld [vmem:[#allocation5 + $0x860] sm:$0xff] }
  0xcb   :  { %623 = vmatpush.msrb.mxu1 %v567_v7  ;;  %663 = vmatpush.msrb.mxu3 %v568_v9 }
  0xcc   :  { %605 = vmatpush.msrb.mxu0 %v531_v2  ;;  %645 = vmatpush.msrb.mxu2 %v532_v4 }
  0xcd   :  { %624 = vmatpush.msrb.mxu1 %v565_v11  ;;  %664 = vmatpush.msrb.mxu3 %v566_v13  ;;  %v687_v11 = vld [vmem:[#allocation5 + $0x850] sm:$0xff]  ;;  %v688_v13 = vld [vmem:[#allocation5 + $0x858] sm:$0xff] }
  0xce   :  { %606 = vmatpush.msrb.mxu0 %v529_v6  ;;  %646 = vmatpush.msrb.mxu2 %v530_v8 }
  0xcf   :  { %625 = vmatpush.msrb.mxu1 %v563_v15  ;;  %665 = vmatpush.msrb.mxu3 %v564_v17  ;;  %v685_v15 = vld [vmem:[#allocation5 + $0x840] sm:$0xff]  ;;  %v686_v17 = vld [vmem:[#allocation5 + $0x848] sm:$0xff] }
  0xd0   :  { %607 = vmatpush.msrb.mxu0 %v527_v10  ;;  %647 = vmatpush.msrb.mxu2 %v528_v12  ;;  %v725_v12 = vld [vmem:[#allocation5 + $0x980] sm:$0xff] }
  0xd1   :  { %626 = vmatpush.msrb.mxu1 %v561_v19  ;;  %666 = vmatpush.msrb.mxu3 %v562_v21  ;;  %v683_v19 = vld [vmem:[#allocation5 + $0x830] sm:$0xff]  ;;  %v684_v21 = vld [vmem:[#allocation5 + $0x838] sm:$0xff] }
  0xd2   :  { %608 = vmatpush.msrb.mxu0 %v525_v14  ;;  %648 = vmatpush.msrb.mxu2 %v526_v16  ;;  %v726_v14 = vld [vmem:[#allocation5 + $0x988] sm:$0xff]  ;;  %v723_v16 = vld [vmem:[#allocation5 + $0x970] sm:$0xff] }
  0xd3   :  { %627 = vmatpush.msrb.mxu1 %v559_v22  ;;  %667 = vmatpush.msrb.mxu3 %v560_v23  ;;  %v722_v22 = vld [vmem:[#allocation5 + $0x968] sm:$0xff]  ;;  %v681_v23 = vld [vmem:[#allocation5 + $0x820] sm:$0xff] }
  0xd4   :  { %609 = vmatpush.msrb.mxu0 %v523_v18  ;;  %649 = vmatpush.msrb.mxu2 %v524_v20  ;;  %v724_v18 = vld [vmem:[#allocation5 + $0x978] sm:$0xff]  ;;  %v721_v20 = vld [vmem:[#allocation5 + $0x960] sm:$0xff] }
  0xd5   :  { %628 = vmatpush.msrb.mxu1 %v557_v24  ;;  %668 = vmatpush.msrb.mxu3 %v558_v25  ;;  %v719_v24 = vld [vmem:[#allocation5 + $0x950] sm:$0xff]  ;;  %v682_v25 = vld [vmem:[#allocation5 + $0x828] sm:$0xff] }
  0xd7   :  { %629 = vmatpush.msrb.mxu1 %v555_v26  ;;  %669 = vmatpush.msrb.mxu3 %v556_v27  ;;  %v720_v26 = vld [vmem:[#allocation5 + $0x958] sm:$0xff]  ;;  %v679_v27 = vld [vmem:[#allocation5 + $0x810] sm:$0xff] }
 0x131   :  { %v303_v51 = vpop.f32.mrf.mxu0 }
 0x132   :  { %v304_v52 = vadd.f32 %v303_v51, %v282_v46  ;;  %v697_v46 = vld [vmem:[#allocation5 + $0x8a0] sm:$0xff]  ;;  %v696_v51 = vld [vmem:[#allocation5 + $0x898] sm:$0xff] }
 0x135   :  { %v323_v54 = vpop.f32.mrf.mxu1 }
 0x136   :  { %v324_v55 = vadd.f32 %v323_v54, %v304_v52  ;;  %v729_v52 = vld [vmem:[#allocation5 + $0x9a0] sm:$0xff] }
 0x137   :  { %v343_v56 = vpop.f32.mrf.mxu2  ;;  %v693_v54 = vld [vmem:[#allocation5 + $0x880] sm:$0xff] }
 0x138   :  { %v366_v57 = vmax.f32 %v324_v55, 0.0  ;;  %v344_v58 = vadd.f32 %v343_v56, %v283_v53  ;;  %v730_v53 = vld [vmem:[#allocation5 + $0x9a8] sm:$0xff]  ;;  %v434_v56 = vld [vmem:[#allocation7 + $0x4] sm:$0x3] }
 0x139   :  { %v694_v55 = vld [vmem:[#allocation5 + $0x888] sm:$0xff]  ;;  %v437_v4 = vperm.slane %v434_v56, 1 }
 0x13a   :  { %456 = vmatmul.f32.vlgmr.msra.gmra.mxu0 %v366_v57  ;;  %496 = vmatmul.f32.vlgmr.msra.gmra.mxu2 %v366_v57  ;;  %v727_v57 = vld [vmem:[#allocation5 + $0x990] sm:$0xff] }
 0x13b   :  { %v363_v59 = vpop.f32.mrf.mxu3  ;;  %748 = vmatpush.msra.mxu0 %v707_v28  ;;  %788 = vmatpush.msra.mxu2 %v708_v29  ;;  %v717_v28 = vld [vmem:[#allocation5 + $0x940] sm:$0xff]  ;;  %v680_v29 = vld [vmem:[#allocation5 + $0x818] sm:$0xff] }
 0x13c   :  { %v364_v60 = vadd.f32 %v363_v59, %v344_v58  ;;  %v728_v58 = vld [vmem:[#allocation5 + $0x998] sm:$0xff]  ;;  %v691_v59 = vld [vmem:[#allocation5 + $0x870] sm:$0xff] }
 0x13d   :  { %749 = vmatpush.msra.mxu0 %v705_v30  ;;  %789 = vmatpush.msra.mxu2 %v706_v31  ;;  %v718_v30 = vld [vmem:[#allocation5 + $0x948] sm:$0xff]  ;;  %v677_v31 = vld [vmem:[#allocation5 + $0x800] sm:$0xff] }
 0x13e   :  { %v367_v61 = vmax.f32 %v364_v60, 0.0  ;;  %v692_v60 = vld [vmem:[#allocation5 + $0x878] sm:$0xff] }
 0x13f   :  { %750 = vmatpush.msra.mxu0 %v703_v32  ;;  %790 = vmatpush.msra.mxu2 %v704_v33  ;;  %v715_v32 = vld [vmem:[#allocation5 + $0x930] sm:$0xff]  ;;  %v678_v33 = vld [vmem:[#allocation5 + $0x808] sm:$0xff] }
 0x140   :  { %476 = vmatmul.f32.vlgmr.msra.gmra.mxu1 %v367_v61  ;;  %516 = vmatmul.f32.vlgmr.msra.gmra.mxu3 %v367_v61  ;;  %v436_v61 = vperm.slane %v434_v56, 0  ;;  %v854_v56 = vld [vmem:[#allocation5 + $0xab8] sm:$0xff] }
 0x141   :  { %768 = vmatpush.msra.mxu1 %v739_v34  ;;  %808 = vmatpush.msra.mxu3 %v740_v35  ;;  %v716_v34 = vld [vmem:[#allocation5 + $0x938] sm:$0xff]  ;;  %v713_v35 = vld [vmem:[#allocation5 + $0x920] sm:$0xff] }
 0x142   :  { %751 = vmatpush.msra.mxu0 %v701_v37  ;;  %791 = vmatpush.msra.mxu2 %v702_v38  ;;  %v711_v37 = vld [vmem:[#allocation5 + $0x910] sm:$0xff]  ;;  %v712_v38 = vld [vmem:[#allocation5 + $0x918] sm:$0xff] }
 0x143   :  { %769 = vmatpush.msra.mxu1 %v737_v36  ;;  %809 = vmatpush.msra.mxu3 %v738_v39  ;;  %v714_v36 = vld [vmem:[#allocation5 + $0x928] sm:$0xff]  ;;  %v709_v39 = vld [vmem:[#allocation5 + $0x900] sm:$0xff] }
 0x144   :  { %752 = vmatpush.msra.mxu0 %v699_v42  ;;  %792 = vmatpush.msra.mxu2 %v700_v43  ;;  %v862_v42 = vld [vmem:[#allocation5 + $0xaf8] sm:$0xff]  ;;  %v859_v43 = vld [vmem:[#allocation5 + $0xae0] sm:$0xff] }
 0x145   :  { %770 = vmatpush.msra.mxu1 %v735_v40  ;;  %810 = vmatpush.msra.mxu3 %v736_v41  ;;  %v710_v40 = vld [vmem:[#allocation5 + $0x908] sm:$0xff]  ;;  %v861_v41 = vld [vmem:[#allocation5 + $0xaf0] sm:$0xff] }
 0x146   :  { %753 = vmatpush.msra.mxu0 %v697_v46  ;;  %793 = vmatpush.msra.mxu2 %v698_v47  ;;  %v858_v46 = vld [vmem:[#allocation5 + $0xad8] sm:$0xff]  ;;  %v893_v47 = vld [vmem:[#allocation5 + $0xbf0] sm:$0xff] }
 0x147   :  { %771 = vmatpush.msra.mxu1 %v733_v44  ;;  %811 = vmatpush.msra.mxu3 %v734_v45  ;;  %v860_v44 = vld [vmem:[#allocation5 + $0xae8] sm:$0xff]  ;;  %v857_v45 = vld [vmem:[#allocation5 + $0xad0] sm:$0xff] }
 0x148   :  { %754 = vmatpush.msra.mxu0 %v695_v50  ;;  %794 = vmatpush.msra.mxu2 %v696_v51  ;;  %v855_v50 = vld [vmem:[#allocation5 + $0xac0] sm:$0xff]  ;;  %v856_v51 = vld [vmem:[#allocation5 + $0xac8] sm:$0xff] }
 0x149   :  { %772 = vmatpush.msra.mxu1 %v731_v48  ;;  %812 = vmatpush.msra.mxu3 %v732_v49  ;;  %v894_v48 = vld [vmem:[#allocation5 + $0xbf8] sm:$0xff]  ;;  %v891_v49 = vld [vmem:[#allocation5 + $0xbe0] sm:$0xff] }
 0x14a   :  { %755 = vmatpush.msra.mxu0 %v693_v54  ;;  %795 = vmatpush.msra.mxu2 %v694_v55  ;;  %v890_v54 = vld [vmem:[#allocation5 + $0xbd8] sm:$0xff]  ;;  %v853_v55 = vld [vmem:[#allocation5 + $0xab0] sm:$0xff] }
 0x14b   :  { %773 = vmatpush.msra.mxu1 %v729_v52  ;;  %813 = vmatpush.msra.mxu3 %v730_v53  ;;  %v892_v52 = vld [vmem:[#allocation5 + $0xbe8] sm:$0xff]  ;;  %v889_v53 = vld [vmem:[#allocation5 + $0xbd0] sm:$0xff] }
 0x14c   :  { %756 = vmatpush.msra.mxu0 %v691_v59  ;;  %796 = vmatpush.msra.mxu2 %v692_v60  ;;  %v851_v59 = vld [vmem:[#allocation5 + $0xaa0] sm:$0xff]  ;;  %v852_v60 = vld [vmem:[#allocation5 + $0xaa8] sm:$0xff] }
 0x14d   :  { %774 = vmatpush.msra.mxu1 %v727_v57  ;;  %814 = vmatpush.msra.mxu3 %v728_v58  ;;  %v887_v57 = vld [vmem:[#allocation5 + $0xbc0] sm:$0xff]  ;;  %v888_v58 = vld [vmem:[#allocation5 + $0xbc8] sm:$0xff] }
 0x14e   :  { %757 = vmatpush.msra.mxu0 %v689_v62  ;;  %797 = vmatpush.msra.mxu2 %v690_v63  ;;  %v886_v62 = vld [vmem:[#allocation5 + $0xbb8] sm:$0xff]  ;;  %v849_v63 = vld [vmem:[#allocation5 + $0xa90] sm:$0xff] }
 0x14f   :  { %775 = vmatpush.msra.mxu1 %v725_v12  ;;  %815 = vmatpush.msra.mxu3 %v726_v14  ;;  %v844_v12 = vld [vmem:[#allocation5 + $0xa68] sm:$0xff] }
 0x150   :  { %758 = vmatpush.msra.mxu0 %v687_v11  ;;  %798 = vmatpush.msra.mxu2 %v688_v13  ;;  %v843_v11 = vld [vmem:[#allocation5 + $0xa60] sm:$0xff] }
 0x151   :  { %776 = vmatpush.msra.mxu1 %v723_v16  ;;  %816 = vmatpush.msra.mxu3 %v724_v18 }
 0x152   :  { %759 = vmatpush.msra.mxu0 %v685_v15  ;;  %799 = vmatpush.msra.mxu2 %v686_v17 }
 0x153   :  { %777 = vmatpush.msra.mxu1 %v721_v20  ;;  %817 = vmatpush.msra.mxu3 %v722_v22 }
 0x154   :  { %760 = vmatpush.msra.mxu0 %v683_v19  ;;  %800 = vmatpush.msra.mxu2 %v684_v21 }
 0x155   :  { %778 = vmatpush.msra.mxu1 %v719_v24  ;;  %818 = vmatpush.msra.mxu3 %v720_v26  ;;  %v841_v24 = vld [vmem:[#allocation5 + $0xa50] sm:$0xff]  ;;  %v842_v26 = vld [vmem:[#allocation5 + $0xa58] sm:$0xff] }
 0x156   :  { %761 = vmatpush.msra.mxu0 %v681_v23  ;;  %801 = vmatpush.msra.mxu2 %v682_v25  ;;  %v879_v25 = vld [vmem:[#allocation5 + $0xb80] sm:$0xff] }
 0x157   :  { %779 = vmatpush.msra.mxu1 %v717_v28  ;;  %819 = vmatpush.msra.mxu3 %v718_v30  ;;  %v839_v28 = vld [vmem:[#allocation5 + $0xa40] sm:$0xff]  ;;  %v840_v30 = vld [vmem:[#allocation5 + $0xa48] sm:$0xff] }
 0x158   :  { %762 = vmatpush.msra.mxu0 %v679_v27  ;;  %802 = vmatpush.msra.mxu2 %v680_v29  ;;  %v880_v27 = vld [vmem:[#allocation5 + $0xb88] sm:$0xff]  ;;  %v877_v29 = vld [vmem:[#allocation5 + $0xb70] sm:$0xff] }
 0x159   :  { %780 = vmatpush.msra.mxu1 %v715_v32  ;;  %820 = vmatpush.msra.mxu3 %v716_v34  ;;  %v837_v32 = vld [vmem:[#allocation5 + $0xa30] sm:$0xff]  ;;  %v838_v34 = vld [vmem:[#allocation5 + $0xa38] sm:$0xff] }
 0x15a   :  { %763 = vmatpush.msra.mxu0 %v677_v31  ;;  %803 = vmatpush.msra.mxu2 %v678_v33  ;;  %v878_v31 = vld [vmem:[#allocation5 + $0xb78] sm:$0xff]  ;;  %v875_v33 = vld [vmem:[#allocation5 + $0xb60] sm:$0xff] }
 0x15b   :  { %781 = vmatpush.msra.mxu1 %v713_v35  ;;  %821 = vmatpush.msra.mxu3 %v714_v36  ;;  %v876_v35 = vld [vmem:[#allocation5 + $0xb68] sm:$0xff]  ;;  %v835_v36 = vld [vmem:[#allocation5 + $0xa20] sm:$0xff] }
 0x15d   :  { %782 = vmatpush.msra.mxu1 %v711_v37  ;;  %822 = vmatpush.msra.mxu3 %v712_v38  ;;  %v873_v37 = vld [vmem:[#allocation5 + $0xb50] sm:$0xff]  ;;  %v836_v38 = vld [vmem:[#allocation5 + $0xa28] sm:$0xff] }
 0x15f   :  { %783 = vmatpush.msra.mxu1 %v709_v39  ;;  %823 = vmatpush.msra.mxu3 %v710_v40  ;;  %v874_v39 = vld [vmem:[#allocation5 + $0xb58] sm:$0xff]  ;;  %v833_v40 = vld [vmem:[#allocation5 + $0xa10] sm:$0xff] }
 0x1b7   :  { %v457_v0 = vpop.f32.mrf.mxu0 }
 0x1b8   :  { %v458_v1 = vadd.f32 %v457_v0, %v436_v61  ;;  %v885_v61 = vld [vmem:[#allocation5 + $0xbb0] sm:$0xff]  ;;  %v850_v0 = vld [vmem:[#allocation5 + $0xa98] sm:$0xff] }
 0x1bd   :  { %v477_v2 = vpop.f32.mrf.mxu1  ;;  %v497_v5 = vpop.f32.mrf.mxu2 }
 0x1be   :  { %v478_v3 = vadd.f32 %v477_v2, %v458_v1  ;;  %v498_v7 = vadd.f32 %v497_v5, %v437_v4  ;;  %v883_v1 = vld [vmem:[#allocation5 + $0xba0] sm:$0xff]  ;;  %v884_v2 = vld [vmem:[#allocation5 + $0xba8] sm:$0xff] }
 0x1bf   :  { %v848_v4 = vld [vmem:[#allocation5 + $0xa88] sm:$0xff]  ;;  %v588_v5 = vld [vmem:[#allocation7 + $0x6] sm:$0x3] }
 0x1c0   :  { %v520_v6 = vmax.f32 %v478_v3, 0.0  ;;  %v847_v3 = vld [vmem:[#allocation5 + $0xa80] sm:$0xff]  ;;  %v591_v17 = vperm.slane %v588_v5, 1 }
 0x1c2   :  { %610 = vmatmul.f32.vlgmr.msrb.gmra.mxu0 %v520_v6  ;;  %650 = vmatmul.f32.vlgmr.msrb.gmra.mxu2 %v520_v6  ;;  %v881_v6 = vld [vmem:[#allocation5 + $0xb90] sm:$0xff] }
 0x1c3   :  { %v517_v8 = vpop.f32.mrf.mxu3  ;;  %902 = vmatpush.msrb.mxu0 %v861_v41  ;;  %942 = vmatpush.msrb.mxu2 %v862_v42  ;;  %v871_v41 = vld [vmem:[#allocation5 + $0xb40] sm:$0xff]  ;;  %v834_v42 = vld [vmem:[#allocation5 + $0xa18] sm:$0xff] }
 0x1c4   :  { %v518_v9 = vadd.f32 %v517_v8, %v498_v7  ;;  %v882_v7 = vld [vmem:[#allocation5 + $0xb98] sm:$0xff]  ;;  %v845_v8 = vld [vmem:[#allocation5 + $0xa70] sm:$0xff] }
 0x1c5   :  { %903 = vmatpush.msrb.mxu0 %v859_v43  ;;  %943 = vmatpush.msrb.mxu2 %v860_v44  ;;  %v872_v43 = vld [vmem:[#allocation5 + $0xb48] sm:$0xff]  ;;  %v831_v44 = vld [vmem:[#allocation5 + $0xa00] sm:$0xff] }
 0x1c6   :  { %v521_v10 = vmax.f32 %v518_v9, 0.0  ;;  %v846_v9 = vld [vmem:[#allocation5 + $0xa78] sm:$0xff] }
 0x1c7   :  { %904 = vmatpush.msrb.mxu0 %v857_v45  ;;  %944 = vmatpush.msrb.mxu2 %v858_v46  ;;  %v869_v45 = vld [vmem:[#allocation5 + $0xb30] sm:$0xff]  ;;  %v832_v46 = vld [vmem:[#allocation5 + $0xa08] sm:$0xff] }
 0x1c8   :  { %630 = vmatmul.f32.vlgmr.msrb.gmra.mxu1 %v521_v10  ;;  %670 = vmatmul.f32.vlgmr.msrb.gmra.mxu3 %v521_v10  ;;  %v590_v10 = vperm.slane %v588_v5, 0  ;;  %v1008_v5 = vld [vmem:[#allocation5 + $0xcb8] sm:$0xff] }
 0x1c9   :  { %922 = vmatpush.msrb.mxu1 %v893_v47  ;;  %962 = vmatpush.msrb.mxu3 %v894_v48  ;;  %v870_v47 = vld [vmem:[#allocation5 + $0xb38] sm:$0xff]  ;;  %v867_v48 = vld [vmem:[#allocation5 + $0xb20] sm:$0xff] }
 0x1ca   :  { %905 = vmatpush.msrb.mxu0 %v855_v50  ;;  %945 = vmatpush.msrb.mxu2 %v856_v51  ;;  %v865_v50 = vld [vmem:[#allocation5 + $0xb10] sm:$0xff]  ;;  %v866_v51 = vld [vmem:[#allocation5 + $0xb18] sm:$0xff] }
 0x1cb   :  { %923 = vmatpush.msrb.mxu1 %v891_v49  ;;  %963 = vmatpush.msrb.mxu3 %v892_v52  ;;  %v868_v49 = vld [vmem:[#allocation5 + $0xb28] sm:$0xff]  ;;  %v863_v52 = vld [vmem:[#allocation5 + $0xb00] sm:$0xff] }
 0x1cc   :  { %906 = vmatpush.msrb.mxu0 %v853_v55  ;;  %946 = vmatpush.msrb.mxu2 %v854_v56  ;;  %v1016_v55 = vld [vmem:[#allocation5 + $0xcf8] sm:$0xff]  ;;  %v1013_v56 = vld [vmem:[#allocation5 + $0xce0] sm:$0xff] }
 0x1cd   :  { %924 = vmatpush.msrb.mxu1 %v889_v53  ;;  %964 = vmatpush.msrb.mxu3 %v890_v54  ;;  %v864_v53 = vld [vmem:[#allocation5 + $0xb08] sm:$0xff]  ;;  %v1015_v54 = vld [vmem:[#allocation5 + $0xcf0] sm:$0xff] }
 0x1ce   :  { %907 = vmatpush.msrb.mxu0 %v851_v59  ;;  %947 = vmatpush.msrb.mxu2 %v852_v60  ;;  %v1012_v59 = vld [vmem:[#allocation5 + $0xcd8] sm:$0xff]  ;;  %v1047_v60 = vld [vmem:[#allocation5 + $0xdf0] sm:$0xff] }
 0x1cf   :  { %925 = vmatpush.msrb.mxu1 %v887_v57  ;;  %965 = vmatpush.msrb.mxu3 %v888_v58  ;;  %v1014_v57 = vld [vmem:[#allocation5 + $0xce8] sm:$0xff]  ;;  %v1011_v58 = vld [vmem:[#allocation5 + $0xcd0] sm:$0xff] }
 0x1d0   :  { %908 = vmatpush.msrb.mxu0 %v849_v63  ;;  %948 = vmatpush.msrb.mxu2 %v850_v0  ;;  %v1009_v63 = vld [vmem:[#allocation5 + $0xcc0] sm:$0xff]  ;;  %v1010_v0 = vld [vmem:[#allocation5 + $0xcc8] sm:$0xff] }
 0x1d1   :  { %926 = vmatpush.msrb.mxu1 %v885_v61  ;;  %966 = vmatpush.msrb.mxu3 %v886_v62  ;;  %v1048_v61 = vld [vmem:[#allocation5 + $0xdf8] sm:$0xff]  ;;  %v1045_v62 = vld [vmem:[#allocation5 + $0xde0] sm:$0xff] }
 0x1d2   :  { %909 = vmatpush.msrb.mxu0 %v847_v3  ;;  %949 = vmatpush.msrb.mxu2 %v848_v4  ;;  %v1044_v3 = vld [vmem:[#allocation5 + $0xdd8] sm:$0xff]  ;;  %v1007_v4 = vld [vmem:[#allocation5 + $0xcb0] sm:$0xff] }
 0x1d3   :  { %927 = vmatpush.msrb.mxu1 %v883_v1  ;;  %967 = vmatpush.msrb.mxu3 %v884_v2  ;;  %v1046_v1 = vld [vmem:[#allocation5 + $0xde8] sm:$0xff]  ;;  %v1043_v2 = vld [vmem:[#allocation5 + $0xdd0] sm:$0xff] }
 0x1d4   :  { %910 = vmatpush.msrb.mxu0 %v845_v8  ;;  %950 = vmatpush.msrb.mxu2 %v846_v9  ;;  %v1005_v8 = vld [vmem:[#allocation5 + $0xca0] sm:$0xff]  ;;  %v1006_v9 = vld [vmem:[#allocation5 + $0xca8] sm:$0xff] }
 0x1d5   :  { %928 = vmatpush.msrb.mxu1 %v881_v6  ;;  %968 = vmatpush.msrb.mxu3 %v882_v7  ;;  %v1041_v6 = vld [vmem:[#allocation5 + $0xdc0] sm:$0xff]  ;;  %v1042_v7 = vld [vmem:[#allocation5 + $0xdc8] sm:$0xff] }
 0x1d6   :  { %911 = vmatpush.msrb.mxu0 %v843_v11  ;;  %951 = vmatpush.msrb.mxu2 %v844_v12  ;;  %v1040_v11 = vld [vmem:[#allocation5 + $0xdb8] sm:$0xff]  ;;  %v1003_v12 = vld [vmem:[#allocation5 + $0xc90] sm:$0xff] }
 0x1d7   :  { %929 = vmatpush.msrb.mxu1 %v879_v25  ;;  %969 = vmatpush.msrb.mxu3 %v880_v27  ;;  %v998_v25 = vld [vmem:[#allocation5 + $0xc68] sm:$0xff] }
 0x1d8   :  { %912 = vmatpush.msrb.mxu0 %v841_v24  ;;  %952 = vmatpush.msrb.mxu2 %v842_v26  ;;  %v997_v24 = vld [vmem:[#allocation5 + $0xc60] sm:$0xff] }
 0x1d9   :  { %930 = vmatpush.msrb.mxu1 %v877_v29  ;;  %970 = vmatpush.msrb.mxu3 %v878_v31 }
 0x1da   :  { %913 = vmatpush.msrb.mxu0 %v839_v28  ;;  %953 = vmatpush.msrb.mxu2 %v840_v30 }
 0x1db   :  { %931 = vmatpush.msrb.mxu1 %v875_v33  ;;  %971 = vmatpush.msrb.mxu3 %v876_v35 }
 0x1dc   :  { %914 = vmatpush.msrb.mxu0 %v837_v32  ;;  %954 = vmatpush.msrb.mxu2 %v838_v34 }
 0x1dd   :  { %932 = vmatpush.msrb.mxu1 %v873_v37  ;;  %972 = vmatpush.msrb.mxu3 %v874_v39  ;;  %v995_v37 = vld [vmem:[#allocation5 + $0xc50] sm:$0xff]  ;;  %v996_v39 = vld [vmem:[#allocation5 + $0xc58] sm:$0xff] }
 0x1de   :  { %915 = vmatpush.msrb.mxu0 %v835_v36  ;;  %955 = vmatpush.msrb.mxu2 %v836_v38  ;;  %v1033_v38 = vld [vmem:[#allocation5 + $0xd80] sm:$0xff] }
 0x1df   :  { %933 = vmatpush.msrb.mxu1 %v871_v41  ;;  %973 = vmatpush.msrb.mxu3 %v872_v43  ;;  %v993_v41 = vld [vmem:[#allocation5 + $0xc40] sm:$0xff]  ;;  %v994_v43 = vld [vmem:[#allocation5 + $0xc48] sm:$0xff] }
 0x1e0   :  { %916 = vmatpush.msrb.mxu0 %v833_v40  ;;  %956 = vmatpush.msrb.mxu2 %v834_v42  ;;  %v1034_v40 = vld [vmem:[#allocation5 + $0xd88] sm:$0xff]  ;;  %v1031_v42 = vld [vmem:[#allocation5 + $0xd70] sm:$0xff] }
 0x1e1   :  { %934 = vmatpush.msrb.mxu1 %v869_v45  ;;  %974 = vmatpush.msrb.mxu3 %v870_v47  ;;  %v991_v45 = vld [vmem:[#allocation5 + $0xc30] sm:$0xff]  ;;  %v992_v47 = vld [vmem:[#allocation5 + $0xc38] sm:$0xff] }
 0x1e2   :  { %917 = vmatpush.msrb.mxu0 %v831_v44  ;;  %957 = vmatpush.msrb.mxu2 %v832_v46  ;;  %v1032_v44 = vld [vmem:[#allocation5 + $0xd78] sm:$0xff]  ;;  %v1029_v46 = vld [vmem:[#allocation5 + $0xd60] sm:$0xff] }
 0x1e3   :  { %935 = vmatpush.msrb.mxu1 %v867_v48  ;;  %975 = vmatpush.msrb.mxu3 %v868_v49  ;;  %v1030_v48 = vld [vmem:[#allocation5 + $0xd68] sm:$0xff]  ;;  %v989_v49 = vld [vmem:[#allocation5 + $0xc20] sm:$0xff] }
 0x1e5   :  { %936 = vmatpush.msrb.mxu1 %v865_v50  ;;  %976 = vmatpush.msrb.mxu3 %v866_v51  ;;  %v1027_v50 = vld [vmem:[#allocation5 + $0xd50] sm:$0xff]  ;;  %v990_v51 = vld [vmem:[#allocation5 + $0xc28] sm:$0xff] }
 0x1e7   :  { %937 = vmatpush.msrb.mxu1 %v863_v52  ;;  %977 = vmatpush.msrb.mxu3 %v864_v53  ;;  %v1028_v52 = vld [vmem:[#allocation5 + $0xd58] sm:$0xff]  ;;  %v987_v53 = vld [vmem:[#allocation5 + $0xc10] sm:$0xff] }
 0x23f   :  { %v611_v13 = vpop.f32.mrf.mxu0 }
 0x240   :  { %v612_v14 = vadd.f32 %v611_v13, %v590_v10  ;;  %v1039_v10 = vld [vmem:[#allocation5 + $0xdb0] sm:$0xff]  ;;  %v1004_v13 = vld [vmem:[#allocation5 + $0xc98] sm:$0xff] }
 0x245   :  { %v631_v15 = vpop.f32.mrf.mxu1  ;;  %v651_v18 = vpop.f32.mrf.mxu2 }
 0x246   :  { %v632_v16 = vadd.f32 %v631_v15, %v612_v14  ;;  %v652_v20 = vadd.f32 %v651_v18, %v591_v17  ;;  %v1037_v14 = vld [vmem:[#allocation5 + $0xda0] sm:$0xff]  ;;  %v1038_v15 = vld [vmem:[#allocation5 + $0xda8] sm:$0xff] }
 0x247   :  { %v1002_v17 = vld [vmem:[#allocation5 + $0xc88] sm:$0xff] }
 0x248   :  { %v674_v19 = vmax.f32 %v632_v16, 0.0  ;;  %v1001_v16 = vld [vmem:[#allocation5 + $0xc80] sm:$0xff]  ;;  %v742_v18 = vld [vmem:[#allocation7 + $0x8] sm:$0x3] }
 0x249   :  { %v745_v30 = vperm.slane %v742_v18, 1 }
 0x24a   :  { %764 = vmatmul.f32.vlgmr.msra.gmra.mxu0 %v674_v19  ;;  %804 = vmatmul.f32.vlgmr.msra.gmra.mxu2 %v674_v19  ;;  %v1035_v19 = vld [vmem:[#allocation5 + $0xd90] sm:$0xff] }
 0x24b   :  { %v671_v21 = vpop.f32.mrf.mxu3  ;;  %1056 = vmatpush.msra.mxu0 %v1015_v54  ;;  %1096 = vmatpush.msra.mxu2 %v1016_v55  ;;  %v1025_v54 = vld [vmem:[#allocation5 + $0xd40] sm:$0xff]  ;;  %v988_v55 = vld [vmem:[#allocation5 + $0xc18] sm:$0xff] }
 0x24c   :  { %v672_v22 = vadd.f32 %v671_v21, %v652_v20  ;;  %v1036_v20 = vld [vmem:[#allocation5 + $0xd98] sm:$0xff]  ;;  %v999_v21 = vld [vmem:[#allocation5 + $0xc70] sm:$0xff] }
 0x24d   :  { %1057 = vmatpush.msra.mxu0 %v1013_v56  ;;  %1097 = vmatpush.msra.mxu2 %v1014_v57  ;;  %v1026_v56 = vld [vmem:[#allocation5 + $0xd48] sm:$0xff]  ;;  %v985_v57 = vld [vmem:[#allocation5 + $0xc00] sm:$0xff] }
 0x24e   :  { %v675_v23 = vmax.f32 %v672_v22, 0.0  ;;  %v1000_v22 = vld [vmem:[#allocation5 + $0xc78] sm:$0xff] }
 0x24f   :  { %1058 = vmatpush.msra.mxu0 %v1011_v58  ;;  %1098 = vmatpush.msra.mxu2 %v1012_v59  ;;  %v1023_v58 = vld [vmem:[#allocation5 + $0xd30] sm:$0xff]  ;;  %v986_v59 = vld [vmem:[#allocation5 + $0xc08] sm:$0xff] }
 0x250   :  { %784 = vmatmul.f32.vlgmr.msra.gmra.mxu1 %v675_v23  ;;  %824 = vmatmul.f32.vlgmr.msra.gmra.mxu3 %v675_v23  ;;  %v744_v23 = vperm.slane %v742_v18, 0  ;;  %v1162_v18 = vld [vmem:[#allocation5 + $0xeb8] sm:$0xff] }
 0x251   :  { %1076 = vmatpush.msra.mxu1 %v1047_v60  ;;  %1116 = vmatpush.msra.mxu3 %v1048_v61  ;;  %v1024_v60 = vld [vmem:[#allocation5 + $0xd38] sm:$0xff]  ;;  %v1021_v61 = vld [vmem:[#allocation5 + $0xd20] sm:$0xff] }
 0x252   :  { %1059 = vmatpush.msra.mxu0 %v1009_v63  ;;  %1099 = vmatpush.msra.mxu2 %v1010_v0  ;;  %v1019_v63 = vld [vmem:[#allocation5 + $0xd10] sm:$0xff]  ;;  %v1020_v0 = vld [vmem:[#allocation5 + $0xd18] sm:$0xff] }
 0x253   :  { %1077 = vmatpush.msra.mxu1 %v1045_v62  ;;  %1117 = vmatpush.msra.mxu3 %v1046_v1  ;;  %v1022_v62 = vld [vmem:[#allocation5 + $0xd28] sm:$0xff]  ;;  %v1017_v1 = vld [vmem:[#allocation5 + $0xd00] sm:$0xff] }
 0x254   :  { %1060 = vmatpush.msra.mxu0 %v1007_v4  ;;  %1100 = vmatpush.msra.mxu2 %v1008_v5  ;;  %v1170_v4 = vld [vmem:[#allocation5 + $0xef8] sm:$0xff]  ;;  %v1167_v5 = vld [vmem:[#allocation5 + $0xee0] sm:$0xff] }
 0x255   :  { %1078 = vmatpush.msra.mxu1 %v1043_v2  ;;  %1118 = vmatpush.msra.mxu3 %v1044_v3  ;;  %v1018_v2 = vld [vmem:[#allocation5 + $0xd08] sm:$0xff]  ;;  %v1169_v3 = vld [vmem:[#allocation5 + $0xef0] sm:$0xff] }
 0x256   :  { %1061 = vmatpush.msra.mxu0 %v1005_v8  ;;  %1101 = vmatpush.msra.mxu2 %v1006_v9  ;;  %v1166_v8 = vld [vmem:[#allocation5 + $0xed8] sm:$0xff]  ;;  %v1201_v9 = vld [vmem:[#allocation5 + $0xff0] sm:$0xff] }
 0x257   :  { %1079 = vmatpush.msra.mxu1 %v1041_v6  ;;  %1119 = vmatpush.msra.mxu3 %v1042_v7  ;;  %v1168_v6 = vld [vmem:[#allocation5 + $0xee8] sm:$0xff]  ;;  %v1165_v7 = vld [vmem:[#allocation5 + $0xed0] sm:$0xff] }
 0x258   :  { %1062 = vmatpush.msra.mxu0 %v1003_v12  ;;  %1102 = vmatpush.msra.mxu2 %v1004_v13  ;;  %v1163_v12 = vld [vmem:[#allocation5 + $0xec0] sm:$0xff]  ;;  %v1164_v13 = vld [vmem:[#allocation5 + $0xec8] sm:$0xff] }
 0x259   :  { %1080 = vmatpush.msra.mxu1 %v1039_v10  ;;  %1120 = vmatpush.msra.mxu3 %v1040_v11  ;;  %v1202_v10 = vld [vmem:[#allocation5 + $0xff8] sm:$0xff]  ;;  %v1199_v11 = vld [vmem:[#allocation5 + $0xfe0] sm:$0xff] }
 0x25a   :  { %1063 = vmatpush.msra.mxu0 %v1001_v16  ;;  %1103 = vmatpush.msra.mxu2 %v1002_v17  ;;  %v1198_v16 = vld [vmem:[#allocation5 + $0xfd8] sm:$0xff]  ;;  %v1161_v17 = vld [vmem:[#allocation5 + $0xeb0] sm:$0xff] }
 0x25b   :  { %1081 = vmatpush.msra.mxu1 %v1037_v14  ;;  %1121 = vmatpush.msra.mxu3 %v1038_v15  ;;  %v1200_v14 = vld [vmem:[#allocation5 + $0xfe8] sm:$0xff]  ;;  %v1197_v15 = vld [vmem:[#allocation5 + $0xfd0] sm:$0xff] }
 0x25c   :  { %1064 = vmatpush.msra.mxu0 %v999_v21  ;;  %1104 = vmatpush.msra.mxu2 %v1000_v22  ;;  %v1159_v21 = vld [vmem:[#allocation5 + $0xea0] sm:$0xff]  ;;  %v1160_v22 = vld [vmem:[#allocation5 + $0xea8] sm:$0xff] }
 0x25d   :  { %1082 = vmatpush.msra.mxu1 %v1035_v19  ;;  %1122 = vmatpush.msra.mxu3 %v1036_v20  ;;  %v1195_v19 = vld [vmem:[#allocation5 + $0xfc0] sm:$0xff]  ;;  %v1196_v20 = vld [vmem:[#allocation5 + $0xfc8] sm:$0xff] }
 0x25e   :  { %1065 = vmatpush.msra.mxu0 %v997_v24  ;;  %1105 = vmatpush.msra.mxu2 %v998_v25  ;;  %v1194_v24 = vld [vmem:[#allocation5 + $0xfb8] sm:$0xff]  ;;  %v1157_v25 = vld [vmem:[#allocation5 + $0xe90] sm:$0xff] }
 0x25f   :  { %1083 = vmatpush.msra.mxu1 %v1033_v38  ;;  %1123 = vmatpush.msra.mxu3 %v1034_v40  ;;  %v1152_v38 = vld [vmem:[#allocation5 + $0xe68] sm:$0xff] }
 0x260   :  { %1066 = vmatpush.msra.mxu0 %v995_v37  ;;  %1106 = vmatpush.msra.mxu2 %v996_v39  ;;  %v1151_v37 = vld [vmem:[#allocation5 + $0xe60] sm:$0xff] }
 0x261   :  { %1084 = vmatpush.msra.mxu1 %v1031_v42  ;;  %1124 = vmatpush.msra.mxu3 %v1032_v44 }
 0x262   :  { %1067 = vmatpush.msra.mxu0 %v993_v41  ;;  %1107 = vmatpush.msra.mxu2 %v994_v43 }
 0x263   :  { %1085 = vmatpush.msra.mxu1 %v1029_v46  ;;  %1125 = vmatpush.msra.mxu3 %v1030_v48 }
 0x264   :  { %1068 = vmatpush.msra.mxu0 %v991_v45  ;;  %1108 = vmatpush.msra.mxu2 %v992_v47 }
 0x265   :  { %1086 = vmatpush.msra.mxu1 %v1027_v50  ;;  %1126 = vmatpush.msra.mxu3 %v1028_v52  ;;  %v1149_v50 = vld [vmem:[#allocation5 + $0xe50] sm:$0xff]  ;;  %v1150_v52 = vld [vmem:[#allocation5 + $0xe58] sm:$0xff] }
 0x266   :  { %1069 = vmatpush.msra.mxu0 %v989_v49  ;;  %1109 = vmatpush.msra.mxu2 %v990_v51  ;;  %v1187_v51 = vld [vmem:[#allocation5 + $0xf80] sm:$0xff] }
 0x267   :  { %1087 = vmatpush.msra.mxu1 %v1025_v54  ;;  %1127 = vmatpush.msra.mxu3 %v1026_v56  ;;  %v1147_v54 = vld [vmem:[#allocation5 + $0xe40] sm:$0xff]  ;;  %v1148_v56 = vld [vmem:[#allocation5 + $0xe48] sm:$0xff] }
 0x268   :  { %1070 = vmatpush.msra.mxu0 %v987_v53  ;;  %1110 = vmatpush.msra.mxu2 %v988_v55  ;;  %v1188_v53 = vld [vmem:[#allocation5 + $0xf88] sm:$0xff]  ;;  %v1185_v55 = vld [vmem:[#allocation5 + $0xf70] sm:$0xff] }
 0x269   :  { %1088 = vmatpush.msra.mxu1 %v1023_v58  ;;  %1128 = vmatpush.msra.mxu3 %v1024_v60  ;;  %v1145_v58 = vld [vmem:[#allocation5 + $0xe30] sm:$0xff]  ;;  %v1146_v60 = vld [vmem:[#allocation5 + $0xe38] sm:$0xff] }
 0x26a   :  { %1071 = vmatpush.msra.mxu0 %v985_v57  ;;  %1111 = vmatpush.msra.mxu2 %v986_v59  ;;  %v1186_v57 = vld [vmem:[#allocation5 + $0xf78] sm:$0xff]  ;;  %v1183_v59 = vld [vmem:[#allocation5 + $0xf60] sm:$0xff] }
 0x26b   :  { %1089 = vmatpush.msra.mxu1 %v1021_v61  ;;  %1129 = vmatpush.msra.mxu3 %v1022_v62  ;;  %v1184_v61 = vld [vmem:[#allocation5 + $0xf68] sm:$0xff]  ;;  %v1143_v62 = vld [vmem:[#allocation5 + $0xe20] sm:$0xff] }
 0x26d   :  { %1090 = vmatpush.msra.mxu1 %v1019_v63  ;;  %1130 = vmatpush.msra.mxu3 %v1020_v0  ;;  %v1181_v63 = vld [vmem:[#allocation5 + $0xf50] sm:$0xff]  ;;  %v1144_v0 = vld [vmem:[#allocation5 + $0xe28] sm:$0xff] }
 0x26f   :  { %1091 = vmatpush.msra.mxu1 %v1017_v1  ;;  %1131 = vmatpush.msra.mxu3 %v1018_v2  ;;  %v1182_v1 = vld [vmem:[#allocation5 + $0xf58] sm:$0xff]  ;;  %v1141_v2 = vld [vmem:[#allocation5 + $0xe10] sm:$0xff] }
 0x2c7   :  { %v765_v26 = vpop.f32.mrf.mxu0 }
 0x2c8   :  { %v766_v27 = vadd.f32 %v765_v26, %v744_v23  ;;  %v1193_v23 = vld [vmem:[#allocation5 + $0xfb0] sm:$0xff]  ;;  %v1158_v26 = vld [vmem:[#allocation5 + $0xe98] sm:$0xff] }
 0x2cd   :  { %v785_v28 = vpop.f32.mrf.mxu1  ;;  %v805_v31 = vpop.f32.mrf.mxu2 }
 0x2ce   :  { %v786_v29 = vadd.f32 %v785_v28, %v766_v27  ;;  %v806_v33 = vadd.f32 %v805_v31, %v745_v30  ;;  %v1191_v27 = vld [vmem:[#allocation5 + $0xfa0] sm:$0xff]  ;;  %v1192_v28 = vld [vmem:[#allocation5 + $0xfa8] sm:$0xff] }
 0x2cf   :  { %v1156_v30 = vld [vmem:[#allocation5 + $0xe88] sm:$0xff] }
 0x2d0   :  { %v828_v32 = vmax.f32 %v786_v29, 0.0  ;;  %v1155_v29 = vld [vmem:[#allocation5 + $0xe80] sm:$0xff]  ;;  %v896_v31 = vld [vmem:[#allocation7 + $0xa] sm:$0x3] }
 0x2d1   :  { %v899_v43 = vperm.slane %v896_v31, 1 }
 0x2d2   :  { %918 = vmatmul.f32.vlgmr.msrb.gmra.mxu0 %v828_v32  ;;  %958 = vmatmul.f32.vlgmr.msrb.gmra.mxu2 %v828_v32  ;;  %v1189_v32 = vld [vmem:[#allocation5 + $0xf90] sm:$0xff] }
 0x2d3   :  { %v825_v34 = vpop.f32.mrf.mxu3  ;;  %1210 = vmatpush.msrb.mxu0 %v1169_v3  ;;  %1250 = vmatpush.msrb.mxu2 %v1170_v4  ;;  %v1179_v3 = vld [vmem:[#allocation5 + $0xf40] sm:$0xff]  ;;  %v1142_v4 = vld [vmem:[#allocation5 + $0xe18] sm:$0xff] }
 0x2d4   :  { %v826_v35 = vadd.f32 %v825_v34, %v806_v33  ;;  %v1190_v33 = vld [vmem:[#allocation5 + $0xf98] sm:$0xff]  ;;  %v1153_v34 = vld [vmem:[#allocation5 + $0xe70] sm:$0xff] }
 0x2d5   :  { %1211 = vmatpush.msrb.mxu0 %v1167_v5  ;;  %1251 = vmatpush.msrb.mxu2 %v1168_v6  ;;  %v1180_v5 = vld [vmem:[#allocation5 + $0xf48] sm:$0xff]  ;;  %v1139_v6 = vld [vmem:[#allocation5 + $0xe00] sm:$0xff] }
 0x2d6   :  { %v829_v36 = vmax.f32 %v826_v35, 0.0  ;;  %v1154_v35 = vld [vmem:[#allocation5 + $0xe78] sm:$0xff] }
 0x2d7   :  { %1212 = vmatpush.msrb.mxu0 %v1165_v7  ;;  %1252 = vmatpush.msrb.mxu2 %v1166_v8  ;;  %v1177_v7 = vld [vmem:[#allocation5 + $0xf30] sm:$0xff]  ;;  %v1140_v8 = vld [vmem:[#allocation5 + $0xe08] sm:$0xff] }
 0x2d8   :  { %938 = vmatmul.f32.vlgmr.msrb.gmra.mxu1 %v829_v36  ;;  %978 = vmatmul.f32.vlgmr.msrb.gmra.mxu3 %v829_v36  ;;  %v898_v36 = vperm.slane %v896_v31, 0  ;;  %v1316_v31 = vld [vmem:[#allocation5 + $0x10b8] sm:$0xff] }
 0x2d9   :  { %1230 = vmatpush.msrb.mxu1 %v1201_v9  ;;  %1270 = vmatpush.msrb.mxu3 %v1202_v10  ;;  %v1178_v9 = vld [vmem:[#allocation5 + $0xf38] sm:$0xff]  ;;  %v1175_v10 = vld [vmem:[#allocation5 + $0xf20] sm:$0xff] }
 0x2da   :  { %1213 = vmatpush.msrb.mxu0 %v1163_v12  ;;  %1253 = vmatpush.msrb.mxu2 %v1164_v13  ;;  %v1173_v12 = vld [vmem:[#allocation5 + $0xf10] sm:$0xff]  ;;  %v1174_v13 = vld [vmem:[#allocation5 + $0xf18] sm:$0xff] }
 0x2db   :  { %1231 = vmatpush.msrb.mxu1 %v1199_v11  ;;  %1271 = vmatpush.msrb.mxu3 %v1200_v14  ;;  %v1176_v11 = vld [vmem:[#allocation5 + $0xf28] sm:$0xff]  ;;  %v1171_v14 = vld [vmem:[#allocation5 + $0xf00] sm:$0xff] }
 0x2dc   :  { %1214 = vmatpush.msrb.mxu0 %v1161_v17  ;;  %1254 = vmatpush.msrb.mxu2 %v1162_v18  ;;  %v1324_v17 = vld [vmem:[#allocation5 + $0x10f8] sm:$0xff]  ;;  %v1321_v18 = vld [vmem:[#allocation5 + $0x10e0] sm:$0xff] }
 0x2dd   :  { %1232 = vmatpush.msrb.mxu1 %v1197_v15  ;;  %1272 = vmatpush.msrb.mxu3 %v1198_v16  ;;  %v1172_v15 = vld [vmem:[#allocation5 + $0xf08] sm:$0xff]  ;;  %v1323_v16 = vld [vmem:[#allocation5 + $0x10f0] sm:$0xff] }
 0x2de   :  { %1215 = vmatpush.msrb.mxu0 %v1159_v21  ;;  %1255 = vmatpush.msrb.mxu2 %v1160_v22  ;;  %v1320_v21 = vld [vmem:[#allocation5 + $0x10d8] sm:$0xff]  ;;  %v1355_v22 = vld [vmem:[#allocation5 + $0x11f0] sm:$0xff] }
 0x2df   :  { %1233 = vmatpush.msrb.mxu1 %v1195_v19  ;;  %1273 = vmatpush.msrb.mxu3 %v1196_v20  ;;  %v1322_v19 = vld [vmem:[#allocation5 + $0x10e8] sm:$0xff]  ;;  %v1319_v20 = vld [vmem:[#allocation5 + $0x10d0] sm:$0xff] }
 0x2e0   :  { %1216 = vmatpush.msrb.mxu0 %v1157_v25  ;;  %1256 = vmatpush.msrb.mxu2 %v1158_v26  ;;  %v1317_v25 = vld [vmem:[#allocation5 + $0x10c0] sm:$0xff]  ;;  %v1318_v26 = vld [vmem:[#allocation5 + $0x10c8] sm:$0xff] }
 0x2e1   :  { %1234 = vmatpush.msrb.mxu1 %v1193_v23  ;;  %1274 = vmatpush.msrb.mxu3 %v1194_v24  ;;  %v1356_v23 = vld [vmem:[#allocation5 + $0x11f8] sm:$0xff]  ;;  %v1353_v24 = vld [vmem:[#allocation5 + $0x11e0] sm:$0xff] }
 0x2e2   :  { %1217 = vmatpush.msrb.mxu0 %v1155_v29  ;;  %1257 = vmatpush.msrb.mxu2 %v1156_v30  ;;  %v1352_v29 = vld [vmem:[#allocation5 + $0x11d8] sm:$0xff]  ;;  %v1315_v30 = vld [vmem:[#allocation5 + $0x10b0] sm:$0xff] }
 0x2e3   :  { %1235 = vmatpush.msrb.mxu1 %v1191_v27  ;;  %1275 = vmatpush.msrb.mxu3 %v1192_v28  ;;  %v1354_v27 = vld [vmem:[#allocation5 + $0x11e8] sm:$0xff]  ;;  %v1351_v28 = vld [vmem:[#allocation5 + $0x11d0] sm:$0xff] }
 0x2e4   :  { %1218 = vmatpush.msrb.mxu0 %v1153_v34  ;;  %1258 = vmatpush.msrb.mxu2 %v1154_v35  ;;  %v1313_v34 = vld [vmem:[#allocation5 + $0x10a0] sm:$0xff]  ;;  %v1314_v35 = vld [vmem:[#allocation5 + $0x10a8] sm:$0xff] }
 0x2e5   :  { %1236 = vmatpush.msrb.mxu1 %v1189_v32  ;;  %1276 = vmatpush.msrb.mxu3 %v1190_v33  ;;  %v1349_v32 = vld [vmem:[#allocation5 + $0x11c0] sm:$0xff]  ;;  %v1350_v33 = vld [vmem:[#allocation5 + $0x11c8] sm:$0xff] }
 0x2e6   :  { %1219 = vmatpush.msrb.mxu0 %v1151_v37  ;;  %1259 = vmatpush.msrb.mxu2 %v1152_v38  ;;  %v1348_v37 = vld [vmem:[#allocation5 + $0x11b8] sm:$0xff]  ;;  %v1311_v38 = vld [vmem:[#allocation5 + $0x1090] sm:$0xff] }
 0x2e7   :  { %1237 = vmatpush.msrb.mxu1 %v1187_v51  ;;  %1277 = vmatpush.msrb.mxu3 %v1188_v53  ;;  %v1306_v51 = vld [vmem:[#allocation5 + $0x1068] sm:$0xff] }
 0x2e8   :  { %1220 = vmatpush.msrb.mxu0 %v1149_v50  ;;  %1260 = vmatpush.msrb.mxu2 %v1150_v52  ;;  %v1305_v50 = vld [vmem:[#allocation5 + $0x1060] sm:$0xff] }
 0x2e9   :  { %1238 = vmatpush.msrb.mxu1 %v1185_v55  ;;  %1278 = vmatpush.msrb.mxu3 %v1186_v57 }
 0x2ea   :  { %1221 = vmatpush.msrb.mxu0 %v1147_v54  ;;  %1261 = vmatpush.msrb.mxu2 %v1148_v56 }
 0x2eb   :  { %1239 = vmatpush.msrb.mxu1 %v1183_v59  ;;  %1279 = vmatpush.msrb.mxu3 %v1184_v61 }
 0x2ec   :  { %1222 = vmatpush.msrb.mxu0 %v1145_v58  ;;  %1262 = vmatpush.msrb.mxu2 %v1146_v60 }
 0x2ed   :  { %1240 = vmatpush.msrb.mxu1 %v1181_v63  ;;  %1280 = vmatpush.msrb.mxu3 %v1182_v1  ;;  %v1303_v63 = vld [vmem:[#allocation5 + $0x1050] sm:$0xff]  ;;  %v1304_v1 = vld [vmem:[#allocation5 + $0x1058] sm:$0xff] }
 0x2ee   :  { %1223 = vmatpush.msrb.mxu0 %v1143_v62  ;;  %1263 = vmatpush.msrb.mxu2 %v1144_v0  ;;  %v1341_v0 = vld [vmem:[#allocation5 + $0x1180] sm:$0xff] }
 0x2ef   :  { %1241 = vmatpush.msrb.mxu1 %v1179_v3  ;;  %1281 = vmatpush.msrb.mxu3 %v1180_v5  ;;  %v1301_v3 = vld [vmem:[#allocation5 + $0x1040] sm:$0xff]  ;;  %v1302_v5 = vld [vmem:[#allocation5 + $0x1048] sm:$0xff] }
 0x2f0   :  { %1224 = vmatpush.msrb.mxu0 %v1141_v2  ;;  %1264 = vmatpush.msrb.mxu2 %v1142_v4  ;;  %v1342_v2 = vld [vmem:[#allocation5 + $0x1188] sm:$0xff]  ;;  %v1339_v4 = vld [vmem:[#allocation5 + $0x1170] sm:$0xff] }
 0x2f1   :  { %1242 = vmatpush.msrb.mxu1 %v1177_v7  ;;  %1282 = vmatpush.msrb.mxu3 %v1178_v9  ;;  %v1299_v7 = vld [vmem:[#allocation5 + $0x1030] sm:$0xff]  ;;  %v1300_v9 = vld [vmem:[#allocation5 + $0x1038] sm:$0xff] }
 0x2f2   :  { %1225 = vmatpush.msrb.mxu0 %v1139_v6  ;;  %1265 = vmatpush.msrb.mxu2 %v1140_v8  ;;  %v1340_v6 = vld [vmem:[#allocation5 + $0x1178] sm:$0xff]  ;;  %v1337_v8 = vld [vmem:[#allocation5 + $0x1160] sm:$0xff] }
 0x2f3   :  { %1243 = vmatpush.msrb.mxu1 %v1175_v10  ;;  %1283 = vmatpush.msrb.mxu3 %v1176_v11  ;;  %v1338_v10 = vld [vmem:[#allocation5 + $0x1168] sm:$0xff]  ;;  %v1297_v11 = vld [vmem:[#allocation5 + $0x1020] sm:$0xff] }
 0x2f5   :  { %1244 = vmatpush.msrb.mxu1 %v1173_v12  ;;  %1284 = vmatpush.msrb.mxu3 %v1174_v13  ;;  %v1335_v12 = vld [vmem:[#allocation5 + $0x1150] sm:$0xff]  ;;  %v1298_v13 = vld [vmem:[#allocation5 + $0x1028] sm:$0xff] }
 0x2f7   :  { %1245 = vmatpush.msrb.mxu1 %v1171_v14  ;;  %1285 = vmatpush.msrb.mxu3 %v1172_v15  ;;  %v1336_v14 = vld [vmem:[#allocation5 + $0x1158] sm:$0xff]  ;;  %v1295_v15 = vld [vmem:[#allocation5 + $0x1010] sm:$0xff] }
 0x34f   :  { %v919_v39 = vpop.f32.mrf.mxu0 }
 0x350   :  { %v920_v40 = vadd.f32 %v919_v39, %v898_v36  ;;  %v1347_v36 = vld [vmem:[#allocation5 + $0x11b0] sm:$0xff]  ;;  %v1312_v39 = vld [vmem:[#allocation5 + $0x1098] sm:$0xff] }
 0x355   :  { %v939_v41 = vpop.f32.mrf.mxu1  ;;  %v959_v44 = vpop.f32.mrf.mxu2 }
 0x356   :  { %v940_v42 = vadd.f32 %v939_v41, %v920_v40  ;;  %v960_v46 = vadd.f32 %v959_v44, %v899_v43  ;;  %v1345_v40 = vld [vmem:[#allocation5 + $0x11a0] sm:$0xff]  ;;  %v1346_v41 = vld [vmem:[#allocation5 + $0x11a8] sm:$0xff] }
 0x357   :  { %v1310_v43 = vld [vmem:[#allocation5 + $0x1088] sm:$0xff] }
 0x358   :  { %v982_v45 = vmax.f32 %v940_v42, 0.0  ;;  %v1309_v42 = vld [vmem:[#allocation5 + $0x1080] sm:$0xff]  ;;  %v1050_v44 = vld [vmem:[#allocation7 + $0xc] sm:$0x3] }
 0x359   :  { %v1053_v56 = vperm.slane %v1050_v44, 1 }
 0x35a   :  { %1072 = vmatmul.f32.vlgmr.msra.gmra.mxu0 %v982_v45  ;;  %1112 = vmatmul.f32.vlgmr.msra.gmra.mxu2 %v982_v45  ;;  %v1343_v45 = vld [vmem:[#allocation5 + $0x1190] sm:$0xff] }
 0x35b   :  { %v979_v47 = vpop.f32.mrf.mxu3  ;;  %1364 = vmatpush.msra.mxu0 %v1323_v16  ;;  %1404 = vmatpush.msra.mxu2 %v1324_v17  ;;  %v1333_v16 = vld [vmem:[#allocation5 + $0x1140] sm:$0xff]  ;;  %v1296_v17 = vld [vmem:[#allocation5 + $0x1018] sm:$0xff] }
 0x35c   :  { %v980_v48 = vadd.f32 %v979_v47, %v960_v46  ;;  %v1344_v46 = vld [vmem:[#allocation5 + $0x1198] sm:$0xff]  ;;  %v1307_v47 = vld [vmem:[#allocation5 + $0x1070] sm:$0xff] }
 0x35d   :  { %1365 = vmatpush.msra.mxu0 %v1321_v18  ;;  %1405 = vmatpush.msra.mxu2 %v1322_v19  ;;  %v1334_v18 = vld [vmem:[#allocation5 + $0x1148] sm:$0xff]  ;;  %v1293_v19 = vld [vmem:[#allocation5 + $0x1000] sm:$0xff] }
 0x35e   :  { %v983_v49 = vmax.f32 %v980_v48, 0.0  ;;  %v1308_v48 = vld [vmem:[#allocation5 + $0x1078] sm:$0xff] }
 0x35f   :  { %1366 = vmatpush.msra.mxu0 %v1319_v20  ;;  %1406 = vmatpush.msra.mxu2 %v1320_v21  ;;  %v1331_v20 = vld [vmem:[#allocation5 + $0x1130] sm:$0xff]  ;;  %v1294_v21 = vld [vmem:[#allocation5 + $0x1008] sm:$0xff] }
 0x360   :  { %1092 = vmatmul.f32.vlgmr.msra.gmra.mxu1 %v983_v49  ;;  %1132 = vmatmul.f32.vlgmr.msra.gmra.mxu3 %v983_v49  ;;  %v1052_v49 = vperm.slane %v1050_v44, 0  ;;  %v1470_v44 = vld [vmem:[#allocation5 + $0x12b8] sm:$0xff] }
 0x361   :  { %1384 = vmatpush.msra.mxu1 %v1355_v22  ;;  %1424 = vmatpush.msra.mxu3 %v1356_v23  ;;  %v1332_v22 = vld [vmem:[#allocation5 + $0x1138] sm:$0xff]  ;;  %v1329_v23 = vld [vmem:[#allocation5 + $0x1120] sm:$0xff] }
 0x362   :  { %1367 = vmatpush.msra.mxu0 %v1317_v25  ;;  %1407 = vmatpush.msra.mxu2 %v1318_v26  ;;  %v1327_v25 = vld [vmem:[#allocation5 + $0x1110] sm:$0xff]  ;;  %v1328_v26 = vld [vmem:[#allocation5 + $0x1118] sm:$0xff] }
 0x363   :  { %1385 = vmatpush.msra.mxu1 %v1353_v24  ;;  %1425 = vmatpush.msra.mxu3 %v1354_v27  ;;  %v1330_v24 = vld [vmem:[#allocation5 + $0x1128] sm:$0xff]  ;;  %v1325_v27 = vld [vmem:[#allocation5 + $0x1100] sm:$0xff] }
 0x364   :  { %1368 = vmatpush.msra.mxu0 %v1315_v30  ;;  %1408 = vmatpush.msra.mxu2 %v1316_v31  ;;  %v1478_v30 = vld [vmem:[#allocation5 + $0x12f8] sm:$0xff]  ;;  %v1475_v31 = vld [vmem:[#allocation5 + $0x12e0] sm:$0xff] }
 0x365   :  { %1386 = vmatpush.msra.mxu1 %v1351_v28  ;;  %1426 = vmatpush.msra.mxu3 %v1352_v29  ;;  %v1326_v28 = vld [vmem:[#allocation5 + $0x1108] sm:$0xff]  ;;  %v1477_v29 = vld [vmem:[#allocation5 + $0x12f0] sm:$0xff] }
 0x366   :  { %1369 = vmatpush.msra.mxu0 %v1313_v34  ;;  %1409 = vmatpush.msra.mxu2 %v1314_v35  ;;  %v1474_v34 = vld [vmem:[#allocation5 + $0x12d8] sm:$0xff]  ;;  %v1509_v35 = vld [vmem:[#allocation5 + $0x13f0] sm:$0xff] }
 0x367   :  { %1387 = vmatpush.msra.mxu1 %v1349_v32  ;;  %1427 = vmatpush.msra.mxu3 %v1350_v33  ;;  %v1476_v32 = vld [vmem:[#allocation5 + $0x12e8] sm:$0xff]  ;;  %v1473_v33 = vld [vmem:[#allocation5 + $0x12d0] sm:$0xff] }
 0x368   :  { %1370 = vmatpush.msra.mxu0 %v1311_v38  ;;  %1410 = vmatpush.msra.mxu2 %v1312_v39  ;;  %v1471_v38 = vld [vmem:[#allocation5 + $0x12c0] sm:$0xff]  ;;  %v1472_v39 = vld [vmem:[#allocation5 + $0x12c8] sm:$0xff] }
 0x369   :  { %1388 = vmatpush.msra.mxu1 %v1347_v36  ;;  %1428 = vmatpush.msra.mxu3 %v1348_v37  ;;  %v1510_v36 = vld [vmem:[#allocation5 + $0x13f8] sm:$0xff]  ;;  %v1507_v37 = vld [vmem:[#allocation5 + $0x13e0] sm:$0xff] }
 0x36a   :  { %1371 = vmatpush.msra.mxu0 %v1309_v42  ;;  %1411 = vmatpush.msra.mxu2 %v1310_v43  ;;  %v1506_v42 = vld [vmem:[#allocation5 + $0x13d8] sm:$0xff]  ;;  %v1469_v43 = vld [vmem:[#allocation5 + $0x12b0] sm:$0xff] }
 0x36b   :  { %1389 = vmatpush.msra.mxu1 %v1345_v40  ;;  %1429 = vmatpush.msra.mxu3 %v1346_v41  ;;  %v1508_v40 = vld [vmem:[#allocation5 + $0x13e8] sm:$0xff]  ;;  %v1505_v41 = vld [vmem:[#allocation5 + $0x13d0] sm:$0xff] }
 0x36c   :  { %1372 = vmatpush.msra.mxu0 %v1307_v47  ;;  %1412 = vmatpush.msra.mxu2 %v1308_v48  ;;  %v1467_v47 = vld [vmem:[#allocation5 + $0x12a0] sm:$0xff]  ;;  %v1468_v48 = vld [vmem:[#allocation5 + $0x12a8] sm:$0xff] }
 0x36d   :  { %1390 = vmatpush.msra.mxu1 %v1343_v45  ;;  %1430 = vmatpush.msra.mxu3 %v1344_v46  ;;  %v1503_v45 = vld [vmem:[#allocation5 + $0x13c0] sm:$0xff]  ;;  %v1504_v46 = vld [vmem:[#allocation5 + $0x13c8] sm:$0xff] }
 0x36e   :  { %1373 = vmatpush.msra.mxu0 %v1305_v50  ;;  %1413 = vmatpush.msra.mxu2 %v1306_v51  ;;  %v1502_v50 = vld [vmem:[#allocation5 + $0x13b8] sm:$0xff]  ;;  %v1465_v51 = vld [vmem:[#allocation5 + $0x1290] sm:$0xff] }
 0x36f   :  { %1391 = vmatpush.msra.mxu1 %v1341_v0  ;;  %1431 = vmatpush.msra.mxu3 %v1342_v2  ;;  %v1460_v0 = vld [vmem:[#allocation5 + $0x1268] sm:$0xff] }
 0x370   :  { %1374 = vmatpush.msra.mxu0 %v1303_v63  ;;  %1414 = vmatpush.msra.mxu2 %v1304_v1  ;;  %v1459_v63 = vld [vmem:[#allocation5 + $0x1260] sm:$0xff] }
 0x371   :  { %1392 = vmatpush.msra.mxu1 %v1339_v4  ;;  %1432 = vmatpush.msra.mxu3 %v1340_v6 }
 0x372   :  { %1375 = vmatpush.msra.mxu0 %v1301_v3  ;;  %1415 = vmatpush.msra.mxu2 %v1302_v5 }
 0x373   :  { %1393 = vmatpush.msra.mxu1 %v1337_v8  ;;  %1433 = vmatpush.msra.mxu3 %v1338_v10 }
 0x374   :  { %1376 = vmatpush.msra.mxu0 %v1299_v7  ;;  %1416 = vmatpush.msra.mxu2 %v1300_v9 }
 0x375   :  { %1394 = vmatpush.msra.mxu1 %v1335_v12  ;;  %1434 = vmatpush.msra.mxu3 %v1336_v14  ;;  %v1457_v12 = vld [vmem:[#allocation5 + $0x1250] sm:$0xff]  ;;  %v1458_v14 = vld [vmem:[#allocation5 + $0x1258] sm:$0xff] }
 0x376   :  { %1377 = vmatpush.msra.mxu0 %v1297_v11  ;;  %1417 = vmatpush.msra.mxu2 %v1298_v13  ;;  %v1495_v13 = vld [vmem:[#allocation5 + $0x1380] sm:$0xff] }
 0x377   :  { %1395 = vmatpush.msra.mxu1 %v1333_v16  ;;  %1435 = vmatpush.msra.mxu3 %v1334_v18  ;;  %v1455_v16 = vld [vmem:[#allocation5 + $0x1240] sm:$0xff]  ;;  %v1456_v18 = vld [vmem:[#allocation5 + $0x1248] sm:$0xff] }
 0x378   :  { %1378 = vmatpush.msra.mxu0 %v1295_v15  ;;  %1418 = vmatpush.msra.mxu2 %v1296_v17  ;;  %v1496_v15 = vld [vmem:[#allocation5 + $0x1388] sm:$0xff]  ;;  %v1493_v17 = vld [vmem:[#allocation5 + $0x1370] sm:$0xff] }
 0x379   :  { %1396 = vmatpush.msra.mxu1 %v1331_v20  ;;  %1436 = vmatpush.msra.mxu3 %v1332_v22  ;;  %v1453_v20 = vld [vmem:[#allocation5 + $0x1230] sm:$0xff]  ;;  %v1454_v22 = vld [vmem:[#allocation5 + $0x1238] sm:$0xff] }
 0x37a   :  { %1379 = vmatpush.msra.mxu0 %v1293_v19  ;;  %1419 = vmatpush.msra.mxu2 %v1294_v21  ;;  %v1494_v19 = vld [vmem:[#allocation5 + $0x1378] sm:$0xff]  ;;  %v1491_v21 = vld [vmem:[#allocation5 + $0x1360] sm:$0xff] }
 0x37b   :  { %1397 = vmatpush.msra.mxu1 %v1329_v23  ;;  %1437 = vmatpush.msra.mxu3 %v1330_v24  ;;  %v1492_v23 = vld [vmem:[#allocation5 + $0x1368] sm:$0xff]  ;;  %v1451_v24 = vld [vmem:[#allocation5 + $0x1220] sm:$0xff] }
 0x37d   :  { %1398 = vmatpush.msra.mxu1 %v1327_v25  ;;  %1438 = vmatpush.msra.mxu3 %v1328_v26  ;;  %v1489_v25 = vld [vmem:[#allocation5 + $0x1350] sm:$0xff]  ;;  %v1452_v26 = vld [vmem:[#allocation5 + $0x1228] sm:$0xff] }
 0x37f   :  { %1399 = vmatpush.msra.mxu1 %v1325_v27  ;;  %1439 = vmatpush.msra.mxu3 %v1326_v28  ;;  %v1490_v27 = vld [vmem:[#allocation5 + $0x1358] sm:$0xff]  ;;  %v1449_v28 = vld [vmem:[#allocation5 + $0x1210] sm:$0xff] }
 0x3d7   :  { %v1073_v52 = vpop.f32.mrf.mxu0 }
 0x3d8   :  { %v1074_v53 = vadd.f32 %v1073_v52, %v1052_v49  ;;  %v1501_v49 = vld [vmem:[#allocation5 + $0x13b0] sm:$0xff]  ;;  %v1466_v52 = vld [vmem:[#allocation5 + $0x1298] sm:$0xff] }
 0x3dd   :  { %v1093_v54 = vpop.f32.mrf.mxu1  ;;  %v1113_v57 = vpop.f32.mrf.mxu2 }
 0x3de   :  { %v1094_v55 = vadd.f32 %v1093_v54, %v1074_v53  ;;  %v1114_v59 = vadd.f32 %v1113_v57, %v1053_v56  ;;  %v1499_v53 = vld [vmem:[#allocation5 + $0x13a0] sm:$0xff]  ;;  %v1500_v54 = vld [vmem:[#allocation5 + $0x13a8] sm:$0xff] }
 0x3df   :  { %v1464_v56 = vld [vmem:[#allocation5 + $0x1288] sm:$0xff] }
 0x3e0   :  { %v1136_v58 = vmax.f32 %v1094_v55, 0.0  ;;  %v1463_v55 = vld [vmem:[#allocation5 + $0x1280] sm:$0xff]  ;;  %v1204_v57 = vld [vmem:[#allocation7 + $0xe] sm:$0x3] }
 0x3e1   :  { %v1207_v5 = vperm.slane %v1204_v57, 1 }
 0x3e2   :  { %1226 = vmatmul.f32.vlgmr.msrb.gmra.mxu0 %v1136_v58  ;;  %1266 = vmatmul.f32.vlgmr.msrb.gmra.mxu2 %v1136_v58  ;;  %v1497_v58 = vld [vmem:[#allocation5 + $0x1390] sm:$0xff] }
 0x3e3   :  { %v1133_v60 = vpop.f32.mrf.mxu3  ;;  %1518 = vmatpush.msrb.mxu0 %v1477_v29  ;;  %1558 = vmatpush.msrb.mxu2 %v1478_v30  ;;  %v1487_v29 = vld [vmem:[#allocation5 + $0x1340] sm:$0xff]  ;;  %v1450_v30 = vld [vmem:[#allocation5 + $0x1218] sm:$0xff] }
 0x3e4   :  { %v1134_v61 = vadd.f32 %v1133_v60, %v1114_v59  ;;  %v1498_v59 = vld [vmem:[#allocation5 + $0x1398] sm:$0xff]  ;;  %v1461_v60 = vld [vmem:[#allocation5 + $0x1270] sm:$0xff] }
 0x3e5   :  { %1519 = vmatpush.msrb.mxu0 %v1475_v31  ;;  %1559 = vmatpush.msrb.mxu2 %v1476_v32  ;;  %v1488_v31 = vld [vmem:[#allocation5 + $0x1348] sm:$0xff]  ;;  %v1447_v32 = vld [vmem:[#allocation5 + $0x1200] sm:$0xff] }
 0x3e6   :  { %v1137_v62 = vmax.f32 %v1134_v61, 0.0  ;;  %v1462_v61 = vld [vmem:[#allocation5 + $0x1278] sm:$0xff] }
 0x3e7   :  { %1520 = vmatpush.msrb.mxu0 %v1473_v33  ;;  %1560 = vmatpush.msrb.mxu2 %v1474_v34  ;;  %v1485_v33 = vld [vmem:[#allocation5 + $0x1330] sm:$0xff]  ;;  %v1448_v34 = vld [vmem:[#allocation5 + $0x1208] sm:$0xff] }
 0x3e8   :  { %1246 = vmatmul.f32.vlgmr.msrb.gmra.mxu1 %v1137_v62  ;;  %1286 = vmatmul.f32.vlgmr.msrb.gmra.mxu3 %v1137_v62  ;;  %v1206_v62 = vperm.slane %v1204_v57, 0  ;;  %v1624_v57 = vld [vmem:[#allocation5 + $0x14b8] sm:$0xff] }
 0x3e9   :  { %1538 = vmatpush.msrb.mxu1 %v1509_v35  ;;  %1578 = vmatpush.msrb.mxu3 %v1510_v36  ;;  %v1486_v35 = vld [vmem:[#allocation5 + $0x1338] sm:$0xff]  ;;  %v1483_v36 = vld [vmem:[#allocation5 + $0x1320] sm:$0xff] }
 0x3ea   :  { %1521 = vmatpush.msrb.mxu0 %v1471_v38  ;;  %1561 = vmatpush.msrb.mxu2 %v1472_v39  ;;  %v1481_v38 = vld [vmem:[#allocation5 + $0x1310] sm:$0xff]  ;;  %v1482_v39 = vld [vmem:[#allocation5 + $0x1318] sm:$0xff] }
 0x3eb   :  { %1539 = vmatpush.msrb.mxu1 %v1507_v37  ;;  %1579 = vmatpush.msrb.mxu3 %v1508_v40  ;;  %v1484_v37 = vld [vmem:[#allocation5 + $0x1328] sm:$0xff]  ;;  %v1479_v40 = vld [vmem:[#allocation5 + $0x1300] sm:$0xff] }
 0x3ec   :  { %1522 = vmatpush.msrb.mxu0 %v1469_v43  ;;  %1562 = vmatpush.msrb.mxu2 %v1470_v44  ;;  %v1632_v43 = vld [vmem:[#allocation5 + $0x14f8] sm:$0xff]  ;;  %v1629_v44 = vld [vmem:[#allocation5 + $0x14e0] sm:$0xff] }
 0x3ed   :  { %1540 = vmatpush.msrb.mxu1 %v1505_v41  ;;  %1580 = vmatpush.msrb.mxu3 %v1506_v42  ;;  %v1480_v41 = vld [vmem:[#allocation5 + $0x1308] sm:$0xff]  ;;  %v1631_v42 = vld [vmem:[#allocation5 + $0x14f0] sm:$0xff] }
 0x3ee   :  { %1523 = vmatpush.msrb.mxu0 %v1467_v47  ;;  %1563 = vmatpush.msrb.mxu2 %v1468_v48  ;;  %v1628_v47 = vld [vmem:[#allocation5 + $0x14d8] sm:$0xff]  ;;  %v1663_v48 = vld [vmem:[#allocation5 + $0x15f0] sm:$0xff] }
 0x3ef   :  { %1541 = vmatpush.msrb.mxu1 %v1503_v45  ;;  %1581 = vmatpush.msrb.mxu3 %v1504_v46  ;;  %v1630_v45 = vld [vmem:[#allocation5 + $0x14e8] sm:$0xff]  ;;  %v1627_v46 = vld [vmem:[#allocation5 + $0x14d0] sm:$0xff] }
 0x3f0   :  { %1524 = vmatpush.msrb.mxu0 %v1465_v51  ;;  %1564 = vmatpush.msrb.mxu2 %v1466_v52  ;;  %v1625_v51 = vld [vmem:[#allocation5 + $0x14c0] sm:$0xff]  ;;  %v1626_v52 = vld [vmem:[#allocation5 + $0x14c8] sm:$0xff] }
 0x3f1   :  { %1542 = vmatpush.msrb.mxu1 %v1501_v49  ;;  %1582 = vmatpush.msrb.mxu3 %v1502_v50  ;;  %v1664_v49 = vld [vmem:[#allocation5 + $0x15f8] sm:$0xff]  ;;  %v1661_v50 = vld [vmem:[#allocation5 + $0x15e0] sm:$0xff] }
 0x3f2   :  { %1525 = vmatpush.msrb.mxu0 %v1463_v55  ;;  %1565 = vmatpush.msrb.mxu2 %v1464_v56  ;;  %v1660_v55 = vld [vmem:[#allocation5 + $0x15d8] sm:$0xff]  ;;  %v1623_v56 = vld [vmem:[#allocation5 + $0x14b0] sm:$0xff] }
 0x3f3   :  { %1543 = vmatpush.msrb.mxu1 %v1499_v53  ;;  %1583 = vmatpush.msrb.mxu3 %v1500_v54  ;;  %v1662_v53 = vld [vmem:[#allocation5 + $0x15e8] sm:$0xff]  ;;  %v1659_v54 = vld [vmem:[#allocation5 + $0x15d0] sm:$0xff] }
 0x3f4   :  { %1526 = vmatpush.msrb.mxu0 %v1461_v60  ;;  %1566 = vmatpush.msrb.mxu2 %v1462_v61  ;;  %v1621_v60 = vld [vmem:[#allocation5 + $0x14a0] sm:$0xff]  ;;  %v1622_v61 = vld [vmem:[#allocation5 + $0x14a8] sm:$0xff] }
 0x3f5   :  { %1544 = vmatpush.msrb.mxu1 %v1497_v58  ;;  %1584 = vmatpush.msrb.mxu3 %v1498_v59  ;;  %v1657_v58 = vld [vmem:[#allocation5 + $0x15c0] sm:$0xff]  ;;  %v1658_v59 = vld [vmem:[#allocation5 + $0x15c8] sm:$0xff] }
 0x3f6   :  { %1527 = vmatpush.msrb.mxu0 %v1459_v63  ;;  %1567 = vmatpush.msrb.mxu2 %v1460_v0  ;;  %v1656_v63 = vld [vmem:[#allocation5 + $0x15b8] sm:$0xff]  ;;  %v1619_v0 = vld [vmem:[#allocation5 + $0x1490] sm:$0xff] }
 0x3f7   :  { %1545 = vmatpush.msrb.mxu1 %v1495_v13  ;;  %1585 = vmatpush.msrb.mxu3 %v1496_v15  ;;  %v1614_v13 = vld [vmem:[#allocation5 + $0x1468] sm:$0xff] }
 0x3f8   :  { %1528 = vmatpush.msrb.mxu0 %v1457_v12  ;;  %1568 = vmatpush.msrb.mxu2 %v1458_v14  ;;  %v1613_v12 = vld [vmem:[#allocation5 + $0x1460] sm:$0xff] }
 0x3f9   :  { %1546 = vmatpush.msrb.mxu1 %v1493_v17  ;;  %1586 = vmatpush.msrb.mxu3 %v1494_v19 }
 0x3fa   :  { %1529 = vmatpush.msrb.mxu0 %v1455_v16  ;;  %1569 = vmatpush.msrb.mxu2 %v1456_v18 }
 0x3fb   :  { %1547 = vmatpush.msrb.mxu1 %v1491_v21  ;;  %1587 = vmatpush.msrb.mxu3 %v1492_v23 }
 0x3fc   :  { %1530 = vmatpush.msrb.mxu0 %v1453_v20  ;;  %1570 = vmatpush.msrb.mxu2 %v1454_v22 }
 0x3fd   :  { %1548 = vmatpush.msrb.mxu1 %v1489_v25  ;;  %1588 = vmatpush.msrb.mxu3 %v1490_v27  ;;  %v1611_v25 = vld [vmem:[#allocation5 + $0x1450] sm:$0xff]  ;;  %v1612_v27 = vld [vmem:[#allocation5 + $0x1458] sm:$0xff] }
 0x3fe   :  { %1531 = vmatpush.msrb.mxu0 %v1451_v24  ;;  %1571 = vmatpush.msrb.mxu2 %v1452_v26  ;;  %v1649_v26 = vld [vmem:[#allocation5 + $0x1580] sm:$0xff] }
 0x3ff   :  { %1549 = vmatpush.msrb.mxu1 %v1487_v29  ;;  %1589 = vmatpush.msrb.mxu3 %v1488_v31  ;;  %v1609_v29 = vld [vmem:[#allocation5 + $0x1440] sm:$0xff]  ;;  %v1610_v31 = vld [vmem:[#allocation5 + $0x1448] sm:$0xff] }
 0x400   :  { %1532 = vmatpush.msrb.mxu0 %v1449_v28  ;;  %1572 = vmatpush.msrb.mxu2 %v1450_v30  ;;  %v1650_v28 = vld [vmem:[#allocation5 + $0x1588] sm:$0xff]  ;;  %v1647_v30 = vld [vmem:[#allocation5 + $0x1570] sm:$0xff] }
 0x401   :  { %1550 = vmatpush.msrb.mxu1 %v1485_v33  ;;  %1590 = vmatpush.msrb.mxu3 %v1486_v35  ;;  %v1607_v33 = vld [vmem:[#allocation5 + $0x1430] sm:$0xff]  ;;  %v1608_v35 = vld [vmem:[#allocation5 + $0x1438] sm:$0xff] }
 0x402   :  { %1533 = vmatpush.msrb.mxu0 %v1447_v32  ;;  %1573 = vmatpush.msrb.mxu2 %v1448_v34  ;;  %v1648_v32 = vld [vmem:[#allocation5 + $0x1578] sm:$0xff]  ;;  %v1645_v34 = vld [vmem:[#allocation5 + $0x1560] sm:$0xff] }
 0x403   :  { %1551 = vmatpush.msrb.mxu1 %v1483_v36  ;;  %1591 = vmatpush.msrb.mxu3 %v1484_v37  ;;  %v1646_v36 = vld [vmem:[#allocation5 + $0x1568] sm:$0xff]  ;;  %v1605_v37 = vld [vmem:[#allocation5 + $0x1420] sm:$0xff] }
 0x405   :  { %1552 = vmatpush.msrb.mxu1 %v1481_v38  ;;  %1592 = vmatpush.msrb.mxu3 %v1482_v39  ;;  %v1643_v38 = vld [vmem:[#allocation5 + $0x1550] sm:$0xff]  ;;  %v1606_v39 = vld [vmem:[#allocation5 + $0x1428] sm:$0xff] }
 0x407   :  { %1553 = vmatpush.msrb.mxu1 %v1479_v40  ;;  %1593 = vmatpush.msrb.mxu3 %v1480_v41  ;;  %v1644_v40 = vld [vmem:[#allocation5 + $0x1558] sm:$0xff]  ;;  %v1603_v41 = vld [vmem:[#allocation5 + $0x1410] sm:$0xff] }
 0x45f   :  { %v1227_v1 = vpop.f32.mrf.mxu0 }
 0x460   :  { %v1228_v2 = vadd.f32 %v1227_v1, %v1206_v62  ;;  %v1655_v62 = vld [vmem:[#allocation5 + $0x15b0] sm:$0xff]  ;;  %v1620_v1 = vld [vmem:[#allocation5 + $0x1498] sm:$0xff] }
 0x465   :  { %v1247_v3 = vpop.f32.mrf.mxu1  ;;  %v1267_v6 = vpop.f32.mrf.mxu2 }
 0x466   :  { %v1248_v4 = vadd.f32 %v1247_v3, %v1228_v2  ;;  %v1268_v8 = vadd.f32 %v1267_v6, %v1207_v5  ;;  %v1653_v2 = vld [vmem:[#allocation5 + $0x15a0] sm:$0xff]  ;;  %v1654_v3 = vld [vmem:[#allocation5 + $0x15a8] sm:$0xff]  ;;  %v1358_v6 = vld [vmem:[#allocation7 + $0x10] sm:$0x3] }
 0x467   :  { %v1618_v5 = vld [vmem:[#allocation5 + $0x1488] sm:$0xff]  ;;  %v1361_v18 = vperm.slane %v1358_v6, 1 }
 0x468   :  { %v1290_v7 = vmax.f32 %v1248_v4, 0.0  ;;  %v1617_v4 = vld [vmem:[#allocation5 + $0x1480] sm:$0xff] }
 0x46a   :  { %1380 = vmatmul.f32.vlgmr.msra.gmra.mxu0 %v1290_v7  ;;  %1420 = vmatmul.f32.vlgmr.msra.gmra.mxu2 %v1290_v7  ;;  %v1651_v7 = vld [vmem:[#allocation5 + $0x1590] sm:$0xff] }
 0x46b   :  { %v1287_v9 = vpop.f32.mrf.mxu3  ;;  %1672 = vmatpush.msra.mxu0 %v1631_v42  ;;  %1712 = vmatpush.msra.mxu2 %v1632_v43  ;;  %v1641_v42 = vld [vmem:[#allocation5 + $0x1540] sm:$0xff]  ;;  %v1604_v43 = vld [vmem:[#allocation5 + $0x1418] sm:$0xff] }
 0x46c   :  { %v1288_v10 = vadd.f32 %v1287_v9, %v1268_v8  ;;  %v1652_v8 = vld [vmem:[#allocation5 + $0x1598] sm:$0xff]  ;;  %v1615_v9 = vld [vmem:[#allocation5 + $0x1470] sm:$0xff] }
 0x46d   :  { %1673 = vmatpush.msra.mxu0 %v1629_v44  ;;  %1713 = vmatpush.msra.mxu2 %v1630_v45  ;;  %v1642_v44 = vld [vmem:[#allocation5 + $0x1548] sm:$0xff]  ;;  %v1601_v45 = vld [vmem:[#allocation5 + $0x1400] sm:$0xff] }
 0x46e   :  { %v1291_v11 = vmax.f32 %v1288_v10, 0.0  ;;  %v1616_v10 = vld [vmem:[#allocation5 + $0x1478] sm:$0xff] }
 0x46f   :  { %1674 = vmatpush.msra.mxu0 %v1627_v46  ;;  %1714 = vmatpush.msra.mxu2 %v1628_v47  ;;  %v1639_v46 = vld [vmem:[#allocation5 + $0x1530] sm:$0xff]  ;;  %v1602_v47 = vld [vmem:[#allocation5 + $0x1408] sm:$0xff] }
 0x470   :  { %1400 = vmatmul.f32.vlgmr.msra.gmra.mxu1 %v1291_v11  ;;  %1440 = vmatmul.f32.vlgmr.msra.gmra.mxu3 %v1291_v11  ;;  %v1360_v11 = vperm.slane %v1358_v6, 0  ;;  %v1778_v6 = vld [vmem:[#allocation5 + $0x16b8] sm:$0xff] }
 0x471   :  { %1692 = vmatpush.msra.mxu1 %v1663_v48  ;;  %1732 = vmatpush.msra.mxu3 %v1664_v49  ;;  %v1640_v48 = vld [vmem:[#allocation5 + $0x1538] sm:$0xff]  ;;  %v1637_v49 = vld [vmem:[#allocation5 + $0x1520] sm:$0xff] }
 0x472   :  { %1675 = vmatpush.msra.mxu0 %v1625_v51  ;;  %1715 = vmatpush.msra.mxu2 %v1626_v52  ;;  %v1635_v51 = vld [vmem:[#allocation5 + $0x1510] sm:$0xff]  ;;  %v1636_v52 = vld [vmem:[#allocation5 + $0x1518] sm:$0xff] }
 0x473   :  { %1693 = vmatpush.msra.mxu1 %v1661_v50  ;;  %1733 = vmatpush.msra.mxu3 %v1662_v53  ;;  %v1638_v50 = vld [vmem:[#allocation5 + $0x1528] sm:$0xff]  ;;  %v1633_v53 = vld [vmem:[#allocation5 + $0x1500] sm:$0xff] }
 0x474   :  { %1676 = vmatpush.msra.mxu0 %v1623_v56  ;;  %1716 = vmatpush.msra.mxu2 %v1624_v57  ;;  %v1786_v56 = vld [vmem:[#allocation5 + $0x16f8] sm:$0xff]  ;;  %v1783_v57 = vld [vmem:[#allocation5 + $0x16e0] sm:$0xff] }
 0x475   :  { %1694 = vmatpush.msra.mxu1 %v1659_v54  ;;  %1734 = vmatpush.msra.mxu3 %v1660_v55  ;;  %v1634_v54 = vld [vmem:[#allocation5 + $0x1508] sm:$0xff]  ;;  %v1785_v55 = vld [vmem:[#allocation5 + $0x16f0] sm:$0xff] }
 0x476   :  { %1677 = vmatpush.msra.mxu0 %v1621_v60  ;;  %1717 = vmatpush.msra.mxu2 %v1622_v61  ;;  %v1782_v60 = vld [vmem:[#allocation5 + $0x16d8] sm:$0xff]  ;;  %v1817_v61 = vld [vmem:[#allocation5 + $0x17f0] sm:$0xff] }
 0x477   :  { %1695 = vmatpush.msra.mxu1 %v1657_v58  ;;  %1735 = vmatpush.msra.mxu3 %v1658_v59  ;;  %v1784_v58 = vld [vmem:[#allocation5 + $0x16e8] sm:$0xff]  ;;  %v1781_v59 = vld [vmem:[#allocation5 + $0x16d0] sm:$0xff] }
 0x478   :  { %1678 = vmatpush.msra.mxu0 %v1619_v0  ;;  %1718 = vmatpush.msra.mxu2 %v1620_v1  ;;  %v1779_v0 = vld [vmem:[#allocation5 + $0x16c0] sm:$0xff]  ;;  %v1780_v1 = vld [vmem:[#allocation5 + $0x16c8] sm:$0xff] }
 0x479   :  { %1696 = vmatpush.msra.mxu1 %v1655_v62  ;;  %1736 = vmatpush.msra.mxu3 %v1656_v63  ;;  %v1818_v62 = vld [vmem:[#allocation5 + $0x17f8] sm:$0xff]  ;;  %v1815_v63 = vld [vmem:[#allocation5 + $0x17e0] sm:$0xff] }
 0x47a   :  { %1679 = vmatpush.msra.mxu0 %v1617_v4  ;;  %1719 = vmatpush.msra.mxu2 %v1618_v5  ;;  %v1814_v4 = vld [vmem:[#allocation5 + $0x17d8] sm:$0xff]  ;;  %v1777_v5 = vld [vmem:[#allocation5 + $0x16b0] sm:$0xff] }
 0x47b   :  { %1697 = vmatpush.msra.mxu1 %v1653_v2  ;;  %1737 = vmatpush.msra.mxu3 %v1654_v3  ;;  %v1816_v2 = vld [vmem:[#allocation5 + $0x17e8] sm:$0xff]  ;;  %v1813_v3 = vld [vmem:[#allocation5 + $0x17d0] sm:$0xff] }
 0x47c   :  { %1680 = vmatpush.msra.mxu0 %v1615_v9  ;;  %1720 = vmatpush.msra.mxu2 %v1616_v10  ;;  %v1775_v9 = vld [vmem:[#allocation5 + $0x16a0] sm:$0xff]  ;;  %v1776_v10 = vld [vmem:[#allocation5 + $0x16a8] sm:$0xff] }
 0x47d   :  { %1698 = vmatpush.msra.mxu1 %v1651_v7  ;;  %1738 = vmatpush.msra.mxu3 %v1652_v8  ;;  %v1811_v7 = vld [vmem:[#allocation5 + $0x17c0] sm:$0xff]  ;;  %v1812_v8 = vld [vmem:[#allocation5 + $0x17c8] sm:$0xff] }
 0x47e   :  { %1681 = vmatpush.msra.mxu0 %v1613_v12  ;;  %1721 = vmatpush.msra.mxu2 %v1614_v13  ;;  %v1810_v12 = vld [vmem:[#allocation5 + $0x17b8] sm:$0xff]  ;;  %v1773_v13 = vld [vmem:[#allocation5 + $0x1690] sm:$0xff] }
 0x47f   :  { %1699 = vmatpush.msra.mxu1 %v1649_v26  ;;  %1739 = vmatpush.msra.mxu3 %v1650_v28  ;;  %v1768_v26 = vld [vmem:[#allocation5 + $0x1668] sm:$0xff] }
 0x480   :  { %1682 = vmatpush.msra.mxu0 %v1611_v25  ;;  %1722 = vmatpush.msra.mxu2 %v1612_v27  ;;  %v1767_v25 = vld [vmem:[#allocation5 + $0x1660] sm:$0xff] }
 0x481   :  { %1700 = vmatpush.msra.mxu1 %v1647_v30  ;;  %1740 = vmatpush.msra.mxu3 %v1648_v32 }
 0x482   :  { %1683 = vmatpush.msra.mxu0 %v1609_v29  ;;  %1723 = vmatpush.msra.mxu2 %v1610_v31 }
 0x483   :  { %1701 = vmatpush.msra.mxu1 %v1645_v34  ;;  %1741 = vmatpush.msra.mxu3 %v1646_v36 }
 0x484   :  { %1684 = vmatpush.msra.mxu0 %v1607_v33  ;;  %1724 = vmatpush.msra.mxu2 %v1608_v35 }
 0x485   :  { %1702 = vmatpush.msra.mxu1 %v1643_v38  ;;  %1742 = vmatpush.msra.mxu3 %v1644_v40  ;;  %v1765_v38 = vld [vmem:[#allocation5 + $0x1650] sm:$0xff]  ;;  %v1766_v40 = vld [vmem:[#allocation5 + $0x1658] sm:$0xff] }
 0x486   :  { %1685 = vmatpush.msra.mxu0 %v1605_v37  ;;  %1725 = vmatpush.msra.mxu2 %v1606_v39  ;;  %v1803_v39 = vld [vmem:[#allocation5 + $0x1780] sm:$0xff] }
 0x487   :  { %1703 = vmatpush.msra.mxu1 %v1641_v42  ;;  %1743 = vmatpush.msra.mxu3 %v1642_v44  ;;  %v1763_v42 = vld [vmem:[#allocation5 + $0x1640] sm:$0xff]  ;;  %v1764_v44 = vld [vmem:[#allocation5 + $0x1648] sm:$0xff] }
 0x488   :  { %1686 = vmatpush.msra.mxu0 %v1603_v41  ;;  %1726 = vmatpush.msra.mxu2 %v1604_v43  ;;  %v1804_v41 = vld [vmem:[#allocation5 + $0x1788] sm:$0xff]  ;;  %v1801_v43 = vld [vmem:[#allocation5 + $0x1770] sm:$0xff] }
 0x489   :  { %1704 = vmatpush.msra.mxu1 %v1639_v46  ;;  %1744 = vmatpush.msra.mxu3 %v1640_v48  ;;  %v1761_v46 = vld [vmem:[#allocation5 + $0x1630] sm:$0xff]  ;;  %v1762_v48 = vld [vmem:[#allocation5 + $0x1638] sm:$0xff] }
 0x48a   :  { %1687 = vmatpush.msra.mxu0 %v1601_v45  ;;  %1727 = vmatpush.msra.mxu2 %v1602_v47  ;;  %v1802_v45 = vld [vmem:[#allocation5 + $0x1778] sm:$0xff]  ;;  %v1799_v47 = vld [vmem:[#allocation5 + $0x1760] sm:$0xff] }
 0x48b   :  { %1705 = vmatpush.msra.mxu1 %v1637_v49  ;;  %1745 = vmatpush.msra.mxu3 %v1638_v50  ;;  %v1800_v49 = vld [vmem:[#allocation5 + $0x1768] sm:$0xff]  ;;  %v1759_v50 = vld [vmem:[#allocation5 + $0x1620] sm:$0xff] }
 0x48d   :  { %1706 = vmatpush.msra.mxu1 %v1635_v51  ;;  %1746 = vmatpush.msra.mxu3 %v1636_v52  ;;  %v1797_v51 = vld [vmem:[#allocation5 + $0x1750] sm:$0xff]  ;;  %v1760_v52 = vld [vmem:[#allocation5 + $0x1628] sm:$0xff] }
 0x48f   :  { %1707 = vmatpush.msra.mxu1 %v1633_v53  ;;  %1747 = vmatpush.msra.mxu3 %v1634_v54  ;;  %v1798_v53 = vld [vmem:[#allocation5 + $0x1758] sm:$0xff]  ;;  %v1757_v54 = vld [vmem:[#allocation5 + $0x1610] sm:$0xff] }
 0x4e7   :  { %v1381_v14 = vpop.f32.mrf.mxu0 }
 0x4e8   :  { %v1382_v15 = vadd.f32 %v1381_v14, %v1360_v11  ;;  %v1809_v11 = vld [vmem:[#allocation5 + $0x17b0] sm:$0xff]  ;;  %v1774_v14 = vld [vmem:[#allocation5 + $0x1698] sm:$0xff] }
 0x4ed   :  { %v1401_v16 = vpop.f32.mrf.mxu1  ;;  %v1421_v19 = vpop.f32.mrf.mxu2 }
 0x4ee   :  { %v1402_v17 = vadd.f32 %v1401_v16, %v1382_v15  ;;  %v1422_v21 = vadd.f32 %v1421_v19, %v1361_v18  ;;  %v1807_v15 = vld [vmem:[#allocation5 + $0x17a0] sm:$0xff]  ;;  %v1808_v16 = vld [vmem:[#allocation5 + $0x17a8] sm:$0xff]  ;;  %v1512_v19 = vld [vmem:[#allocation7 + $0x12] sm:$0x3] }
 0x4ef   :  { %v1772_v18 = vld [vmem:[#allocation5 + $0x1688] sm:$0xff]  ;;  %v1515_v31 = vperm.slane %v1512_v19, 1 }
 0x4f0   :  { %v1444_v20 = vmax.f32 %v1402_v17, 0.0  ;;  %v1771_v17 = vld [vmem:[#allocation5 + $0x1680] sm:$0xff] }
 0x4f2   :  { %1534 = vmatmul.f32.vlgmr.msrb.gmra.mxu0 %v1444_v20  ;;  %1574 = vmatmul.f32.vlgmr.msrb.gmra.mxu2 %v1444_v20  ;;  %v1805_v20 = vld [vmem:[#allocation5 + $0x1790] sm:$0xff] }
 0x4f3   :  { %v1441_v22 = vpop.f32.mrf.mxu3  ;;  %1826 = vmatpush.msrb.mxu0 %v1785_v55  ;;  %1866 = vmatpush.msrb.mxu2 %v1786_v56  ;;  %v1795_v55 = vld [vmem:[#allocation5 + $0x1740] sm:$0xff]  ;;  %v1758_v56 = vld [vmem:[#allocation5 + $0x1618] sm:$0xff] }
 0x4f4   :  { %v1442_v23 = vadd.f32 %v1441_v22, %v1422_v21  ;;  %v1806_v21 = vld [vmem:[#allocation5 + $0x1798] sm:$0xff]  ;;  %v1769_v22 = vld [vmem:[#allocation5 + $0x1670] sm:$0xff] }
 0x4f5   :  { %1827 = vmatpush.msrb.mxu0 %v1783_v57  ;;  %1867 = vmatpush.msrb.mxu2 %v1784_v58  ;;  %v1796_v57 = vld [vmem:[#allocation5 + $0x1748] sm:$0xff]  ;;  %v1755_v58 = vld [vmem:[#allocation5 + $0x1600] sm:$0xff] }
 0x4f6   :  { %v1445_v24 = vmax.f32 %v1442_v23, 0.0  ;;  %v1770_v23 = vld [vmem:[#allocation5 + $0x1678] sm:$0xff] }
 0x4f7   :  { %1828 = vmatpush.msrb.mxu0 %v1781_v59  ;;  %1868 = vmatpush.msrb.mxu2 %v1782_v60  ;;  %v1793_v59 = vld [vmem:[#allocation5 + $0x1730] sm:$0xff]  ;;  %v1756_v60 = vld [vmem:[#allocation5 + $0x1608] sm:$0xff] }
 0x4f8   :  { %1554 = vmatmul.f32.vlgmr.msrb.gmra.mxu1 %v1445_v24  ;;  %1594 = vmatmul.f32.vlgmr.msrb.gmra.mxu3 %v1445_v24  ;;  %v1514_v24 = vperm.slane %v1512_v19, 0  ;;  %v1932_v19 = vld [vmem:[#allocation5 + $0x18b8] sm:$0xff] }
 0x4f9   :  { %1846 = vmatpush.msrb.mxu1 %v1817_v61  ;;  %1886 = vmatpush.msrb.mxu3 %v1818_v62  ;;  %v1794_v61 = vld [vmem:[#allocation5 + $0x1738] sm:$0xff]  ;;  %v1791_v62 = vld [vmem:[#allocation5 + $0x1720] sm:$0xff] }
 0x4fa   :  { %1829 = vmatpush.msrb.mxu0 %v1779_v0  ;;  %1869 = vmatpush.msrb.mxu2 %v1780_v1  ;;  %v1789_v0 = vld [vmem:[#allocation5 + $0x1710] sm:$0xff]  ;;  %v1790_v1 = vld [vmem:[#allocation5 + $0x1718] sm:$0xff] }
 0x4fb   :  { %1847 = vmatpush.msrb.mxu1 %v1815_v63  ;;  %1887 = vmatpush.msrb.mxu3 %v1816_v2  ;;  %v1792_v63 = vld [vmem:[#allocation5 + $0x1728] sm:$0xff]  ;;  %v1787_v2 = vld [vmem:[#allocation5 + $0x1700] sm:$0xff] }
 0x4fc   :  { %1830 = vmatpush.msrb.mxu0 %v1777_v5  ;;  %1870 = vmatpush.msrb.mxu2 %v1778_v6  ;;  %v1940_v5 = vld [vmem:[#allocation5 + $0x18f8] sm:$0xff]  ;;  %v1937_v6 = vld [vmem:[#allocation5 + $0x18e0] sm:$0xff] }
 0x4fd   :  { %1848 = vmatpush.msrb.mxu1 %v1813_v3  ;;  %1888 = vmatpush.msrb.mxu3 %v1814_v4  ;;  %v1788_v3 = vld [vmem:[#allocation5 + $0x1708] sm:$0xff]  ;;  %v1939_v4 = vld [vmem:[#allocation5 + $0x18f0] sm:$0xff] }
 0x4fe   :  { %1831 = vmatpush.msrb.mxu0 %v1775_v9  ;;  %1871 = vmatpush.msrb.mxu2 %v1776_v10  ;;  %v1936_v9 = vld [vmem:[#allocation5 + $0x18d8] sm:$0xff]  ;;  %v1971_v10 = vld [vmem:[#allocation5 + $0x19f0] sm:$0xff] }
 0x4ff   :  { %1849 = vmatpush.msrb.mxu1 %v1811_v7  ;;  %1889 = vmatpush.msrb.mxu3 %v1812_v8  ;;  %v1938_v7 = vld [vmem:[#allocation5 + $0x18e8] sm:$0xff]  ;;  %v1935_v8 = vld [vmem:[#allocation5 + $0x18d0] sm:$0xff] }
 0x500   :  { %1832 = vmatpush.msrb.mxu0 %v1773_v13  ;;  %1872 = vmatpush.msrb.mxu2 %v1774_v14  ;;  %v1933_v13 = vld [vmem:[#allocation5 + $0x18c0] sm:$0xff]  ;;  %v1934_v14 = vld [vmem:[#allocation5 + $0x18c8] sm:$0xff] }
 0x501   :  { %1850 = vmatpush.msrb.mxu1 %v1809_v11  ;;  %1890 = vmatpush.msrb.mxu3 %v1810_v12  ;;  %v1972_v11 = vld [vmem:[#allocation5 + $0x19f8] sm:$0xff]  ;;  %v1969_v12 = vld [vmem:[#allocation5 + $0x19e0] sm:$0xff] }
 0x502   :  { %1833 = vmatpush.msrb.mxu0 %v1771_v17  ;;  %1873 = vmatpush.msrb.mxu2 %v1772_v18  ;;  %v1968_v17 = vld [vmem:[#allocation5 + $0x19d8] sm:$0xff]  ;;  %v1931_v18 = vld [vmem:[#allocation5 + $0x18b0] sm:$0xff] }
 0x503   :  { %1851 = vmatpush.msrb.mxu1 %v1807_v15  ;;  %1891 = vmatpush.msrb.mxu3 %v1808_v16  ;;  %v1970_v15 = vld [vmem:[#allocation5 + $0x19e8] sm:$0xff]  ;;  %v1967_v16 = vld [vmem:[#allocation5 + $0x19d0] sm:$0xff] }
 0x504   :  { %1834 = vmatpush.msrb.mxu0 %v1769_v22  ;;  %1874 = vmatpush.msrb.mxu2 %v1770_v23  ;;  %v1929_v22 = vld [vmem:[#allocation5 + $0x18a0] sm:$0xff]  ;;  %v1930_v23 = vld [vmem:[#allocation5 + $0x18a8] sm:$0xff] }
 0x505   :  { %1852 = vmatpush.msrb.mxu1 %v1805_v20  ;;  %1892 = vmatpush.msrb.mxu3 %v1806_v21  ;;  %v1965_v20 = vld [vmem:[#allocation5 + $0x19c0] sm:$0xff]  ;;  %v1966_v21 = vld [vmem:[#allocation5 + $0x19c8] sm:$0xff] }
 0x506   :  { %1835 = vmatpush.msrb.mxu0 %v1767_v25  ;;  %1875 = vmatpush.msrb.mxu2 %v1768_v26  ;;  %v1964_v25 = vld [vmem:[#allocation5 + $0x19b8] sm:$0xff]  ;;  %v1927_v26 = vld [vmem:[#allocation5 + $0x1890] sm:$0xff] }
 0x507   :  { %1853 = vmatpush.msrb.mxu1 %v1803_v39  ;;  %1893 = vmatpush.msrb.mxu3 %v1804_v41  ;;  %v1922_v39 = vld [vmem:[#allocation5 + $0x1868] sm:$0xff] }
 0x508   :  { %1836 = vmatpush.msrb.mxu0 %v1765_v38  ;;  %1876 = vmatpush.msrb.mxu2 %v1766_v40  ;;  %v1921_v38 = vld [vmem:[#allocation5 + $0x1860] sm:$0xff] }
 0x509   :  { %1854 = vmatpush.msrb.mxu1 %v1801_v43  ;;  %1894 = vmatpush.msrb.mxu3 %v1802_v45 }
 0x50a   :  { %1837 = vmatpush.msrb.mxu0 %v1763_v42  ;;  %1877 = vmatpush.msrb.mxu2 %v1764_v44 }
 0x50b   :  { %1855 = vmatpush.msrb.mxu1 %v1799_v47  ;;  %1895 = vmatpush.msrb.mxu3 %v1800_v49 }
 0x50c   :  { %1838 = vmatpush.msrb.mxu0 %v1761_v46  ;;  %1878 = vmatpush.msrb.mxu2 %v1762_v48 }
 0x50d   :  { %1856 = vmatpush.msrb.mxu1 %v1797_v51  ;;  %1896 = vmatpush.msrb.mxu3 %v1798_v53  ;;  %v1919_v51 = vld [vmem:[#allocation5 + $0x1850] sm:$0xff]  ;;  %v1920_v53 = vld [vmem:[#allocation5 + $0x1858] sm:$0xff] }
 0x50e   :  { %1839 = vmatpush.msrb.mxu0 %v1759_v50  ;;  %1879 = vmatpush.msrb.mxu2 %v1760_v52  ;;  %v1957_v52 = vld [vmem:[#allocation5 + $0x1980] sm:$0xff] }
 0x50f   :  { %1857 = vmatpush.msrb.mxu1 %v1795_v55  ;;  %1897 = vmatpush.msrb.mxu3 %v1796_v57  ;;  %v1917_v55 = vld [vmem:[#allocation5 + $0x1840] sm:$0xff]  ;;  %v1918_v57 = vld [vmem:[#allocation5 + $0x1848] sm:$0xff] }
 0x510   :  { %1840 = vmatpush.msrb.mxu0 %v1757_v54  ;;  %1880 = vmatpush.msrb.mxu2 %v1758_v56  ;;  %v1958_v54 = vld [vmem:[#allocation5 + $0x1988] sm:$0xff]  ;;  %v1955_v56 = vld [vmem:[#allocation5 + $0x1970] sm:$0xff] }
 0x511   :  { %1858 = vmatpush.msrb.mxu1 %v1793_v59  ;;  %1898 = vmatpush.msrb.mxu3 %v1794_v61  ;;  %v1915_v59 = vld [vmem:[#allocation5 + $0x1830] sm:$0xff]  ;;  %v1916_v61 = vld [vmem:[#allocation5 + $0x1838] sm:$0xff] }
 0x512   :  { %1841 = vmatpush.msrb.mxu0 %v1755_v58  ;;  %1881 = vmatpush.msrb.mxu2 %v1756_v60  ;;  %v1956_v58 = vld [vmem:[#allocation5 + $0x1978] sm:$0xff]  ;;  %v1953_v60 = vld [vmem:[#allocation5 + $0x1960] sm:$0xff] }
 0x513   :  { %1859 = vmatpush.msrb.mxu1 %v1791_v62  ;;  %1899 = vmatpush.msrb.mxu3 %v1792_v63  ;;  %v1954_v62 = vld [vmem:[#allocation5 + $0x1968] sm:$0xff]  ;;  %v1913_v63 = vld [vmem:[#allocation5 + $0x1820] sm:$0xff] }
 0x515   :  { %1860 = vmatpush.msrb.mxu1 %v1789_v0  ;;  %1900 = vmatpush.msrb.mxu3 %v1790_v1  ;;  %v1951_v0 = vld [vmem:[#allocation5 + $0x1950] sm:$0xff]  ;;  %v1914_v1 = vld [vmem:[#allocation5 + $0x1828] sm:$0xff] }
 0x517   :  { %1861 = vmatpush.msrb.mxu1 %v1787_v2  ;;  %1901 = vmatpush.msrb.mxu3 %v1788_v3  ;;  %v1952_v2 = vld [vmem:[#allocation5 + $0x1958] sm:$0xff]  ;;  %v1911_v3 = vld [vmem:[#allocation5 + $0x1810] sm:$0xff] }
 0x56f   :  { %v1535_v27 = vpop.f32.mrf.mxu0 }
 0x570   :  { %v1536_v28 = vadd.f32 %v1535_v27, %v1514_v24  ;;  %v1963_v24 = vld [vmem:[#allocation5 + $0x19b0] sm:$0xff]  ;;  %v1928_v27 = vld [vmem:[#allocation5 + $0x1898] sm:$0xff] }
 0x575   :  { %v1555_v29 = vpop.f32.mrf.mxu1  ;;  %v1575_v32 = vpop.f32.mrf.mxu2 }
 0x576   :  { %v1556_v30 = vadd.f32 %v1555_v29, %v1536_v28  ;;  %v1576_v34 = vadd.f32 %v1575_v32, %v1515_v31  ;;  %v1961_v28 = vld [vmem:[#allocation5 + $0x19a0] sm:$0xff]  ;;  %v1962_v29 = vld [vmem:[#allocation5 + $0x19a8] sm:$0xff]  ;;  %v1666_v32 = vld [vmem:[#allocation7 + $0x14] sm:$0x3] }
 0x577   :  { %v1926_v31 = vld [vmem:[#allocation5 + $0x1888] sm:$0xff]  ;;  %v1669_v44 = vperm.slane %v1666_v32, 1 }
 0x578   :  { %v1598_v33 = vmax.f32 %v1556_v30, 0.0  ;;  %v1925_v30 = vld [vmem:[#allocation5 + $0x1880] sm:$0xff] }
 0x57a   :  { %1688 = vmatmul.f32.vlgmr.msra.gmra.mxu0 %v1598_v33  ;;  %1728 = vmatmul.f32.vlgmr.msra.gmra.mxu2 %v1598_v33  ;;  %v1959_v33 = vld [vmem:[#allocation5 + $0x1990] sm:$0xff] }
 0x57b   :  { %v1595_v35 = vpop.f32.mrf.mxu3  ;;  %1980 = vmatpush.msra.mxu0 %v1939_v4  ;;  %2020 = vmatpush.msra.mxu2 %v1940_v5  ;;  %v1949_v4 = vld [vmem:[#allocation5 + $0x1940] sm:$0xff]  ;;  %v1912_v5 = vld [vmem:[#allocation5 + $0x1818] sm:$0xff] }
 0x57c   :  { %v1596_v36 = vadd.f32 %v1595_v35, %v1576_v34  ;;  %v1960_v34 = vld [vmem:[#allocation5 + $0x1998] sm:$0xff]  ;;  %v1923_v35 = vld [vmem:[#allocation5 + $0x1870] sm:$0xff] }
 0x57d   :  { %1981 = vmatpush.msra.mxu0 %v1937_v6  ;;  %2021 = vmatpush.msra.mxu2 %v1938_v7  ;;  %v1950_v6 = vld [vmem:[#allocation5 + $0x1948] sm:$0xff]  ;;  %v1909_v7 = vld [vmem:[#allocation5 + $0x1800] sm:$0xff] }
 0x57e   :  { %v1599_v37 = vmax.f32 %v1596_v36, 0.0  ;;  %v1924_v36 = vld [vmem:[#allocation5 + $0x1878] sm:$0xff] }
 0x57f   :  { %1982 = vmatpush.msra.mxu0 %v1935_v8  ;;  %2022 = vmatpush.msra.mxu2 %v1936_v9  ;;  %v1947_v8 = vld [vmem:[#allocation5 + $0x1930] sm:$0xff]  ;;  %v1910_v9 = vld [vmem:[#allocation5 + $0x1808] sm:$0xff] }
 0x580   :  { %1708 = vmatmul.f32.vlgmr.msra.gmra.mxu1 %v1599_v37  ;;  %1748 = vmatmul.f32.vlgmr.msra.gmra.mxu3 %v1599_v37  ;;  %v1668_v37 = vperm.slane %v1666_v32, 0  ;;  %v2086_v32 = vld [vmem:[#allocation5 + $0x1ab8] sm:$0xff] }
 0x581   :  { %2000 = vmatpush.msra.mxu1 %v1971_v10  ;;  %2040 = vmatpush.msra.mxu3 %v1972_v11  ;;  %v1948_v10 = vld [vmem:[#allocation5 + $0x1938] sm:$0xff]  ;;  %v1945_v11 = vld [vmem:[#allocation5 + $0x1920] sm:$0xff] }
 0x582   :  { %1983 = vmatpush.msra.mxu0 %v1933_v13  ;;  %2023 = vmatpush.msra.mxu2 %v1934_v14  ;;  %v1943_v13 = vld [vmem:[#allocation5 + $0x1910] sm:$0xff]  ;;  %v1944_v14 = vld [vmem:[#allocation5 + $0x1918] sm:$0xff] }
 0x583   :  { %2001 = vmatpush.msra.mxu1 %v1969_v12  ;;  %2041 = vmatpush.msra.mxu3 %v1970_v15  ;;  %v1946_v12 = vld [vmem:[#allocation5 + $0x1928] sm:$0xff]  ;;  %v1941_v15 = vld [vmem:[#allocation5 + $0x1900] sm:$0xff] }
 0x584   :  { %1984 = vmatpush.msra.mxu0 %v1931_v18  ;;  %2024 = vmatpush.msra.mxu2 %v1932_v19  ;;  %v2094_v18 = vld [vmem:[#allocation5 + $0x1af8] sm:$0xff]  ;;  %v2091_v19 = vld [vmem:[#allocation5 + $0x1ae0] sm:$0xff] }
 0x585   :  { %2002 = vmatpush.msra.mxu1 %v1967_v16  ;;  %2042 = vmatpush.msra.mxu3 %v1968_v17  ;;  %v1942_v16 = vld [vmem:[#allocation5 + $0x1908] sm:$0xff]  ;;  %v2093_v17 = vld [vmem:[#allocation5 + $0x1af0] sm:$0xff] }
 0x586   :  { %1985 = vmatpush.msra.mxu0 %v1929_v22  ;;  %2025 = vmatpush.msra.mxu2 %v1930_v23  ;;  %v2090_v22 = vld [vmem:[#allocation5 + $0x1ad8] sm:$0xff]  ;;  %v2125_v23 = vld [vmem:[#allocation5 + $0x1bf0] sm:$0xff] }
 0x587   :  { %2003 = vmatpush.msra.mxu1 %v1965_v20  ;;  %2043 = vmatpush.msra.mxu3 %v1966_v21  ;;  %v2092_v20 = vld [vmem:[#allocation5 + $0x1ae8] sm:$0xff]  ;;  %v2089_v21 = vld [vmem:[#allocation5 + $0x1ad0] sm:$0xff] }
 0x588   :  { %1986 = vmatpush.msra.mxu0 %v1927_v26  ;;  %2026 = vmatpush.msra.mxu2 %v1928_v27  ;;  %v2087_v26 = vld [vmem:[#allocation5 + $0x1ac0] sm:$0xff]  ;;  %v2088_v27 = vld [vmem:[#allocation5 + $0x1ac8] sm:$0xff] }
 0x589   :  { %2004 = vmatpush.msra.mxu1 %v1963_v24  ;;  %2044 = vmatpush.msra.mxu3 %v1964_v25  ;;  %v2126_v24 = vld [vmem:[#allocation5 + $0x1bf8] sm:$0xff]  ;;  %v2123_v25 = vld [vmem:[#allocation5 + $0x1be0] sm:$0xff] }
 0x58a   :  { %1987 = vmatpush.msra.mxu0 %v1925_v30  ;;  %2027 = vmatpush.msra.mxu2 %v1926_v31  ;;  %v2122_v30 = vld [vmem:[#allocation5 + $0x1bd8] sm:$0xff]  ;;  %v2085_v31 = vld [vmem:[#allocation5 + $0x1ab0] sm:$0xff] }
 0x58b   :  { %2005 = vmatpush.msra.mxu1 %v1961_v28  ;;  %2045 = vmatpush.msra.mxu3 %v1962_v29  ;;  %v2124_v28 = vld [vmem:[#allocation5 + $0x1be8] sm:$0xff]  ;;  %v2121_v29 = vld [vmem:[#allocation5 + $0x1bd0] sm:$0xff] }
 0x58c   :  { %1988 = vmatpush.msra.mxu0 %v1923_v35  ;;  %2028 = vmatpush.msra.mxu2 %v1924_v36  ;;  %v2083_v35 = vld [vmem:[#allocation5 + $0x1aa0] sm:$0xff]  ;;  %v2084_v36 = vld [vmem:[#allocation5 + $0x1aa8] sm:$0xff] }
 0x58d   :  { %2006 = vmatpush.msra.mxu1 %v1959_v33  ;;  %2046 = vmatpush.msra.mxu3 %v1960_v34  ;;  %v2119_v33 = vld [vmem:[#allocation5 + $0x1bc0] sm:$0xff]  ;;  %v2120_v34 = vld [vmem:[#allocation5 + $0x1bc8] sm:$0xff] }
 0x58e   :  { %1989 = vmatpush.msra.mxu0 %v1921_v38  ;;  %2029 = vmatpush.msra.mxu2 %v1922_v39  ;;  %v2118_v38 = vld [vmem:[#allocation5 + $0x1bb8] sm:$0xff]  ;;  %v2081_v39 = vld [vmem:[#allocation5 + $0x1a90] sm:$0xff] }
 0x58f   :  { %2007 = vmatpush.msra.mxu1 %v1957_v52  ;;  %2047 = vmatpush.msra.mxu3 %v1958_v54  ;;  %v2076_v52 = vld [vmem:[#allocation5 + $0x1a68] sm:$0xff] }
 0x590   :  { %1990 = vmatpush.msra.mxu0 %v1919_v51  ;;  %2030 = vmatpush.msra.mxu2 %v1920_v53  ;;  %v2075_v51 = vld [vmem:[#allocation5 + $0x1a60] sm:$0xff] }
 0x591   :  { %2008 = vmatpush.msra.mxu1 %v1955_v56  ;;  %2048 = vmatpush.msra.mxu3 %v1956_v58 }
 0x592   :  { %1991 = vmatpush.msra.mxu0 %v1917_v55  ;;  %2031 = vmatpush.msra.mxu2 %v1918_v57 }
 0x593   :  { %2009 = vmatpush.msra.mxu1 %v1953_v60  ;;  %2049 = vmatpush.msra.mxu3 %v1954_v62 }
 0x594   :  { %1992 = vmatpush.msra.mxu0 %v1915_v59  ;;  %2032 = vmatpush.msra.mxu2 %v1916_v61 }
 0x595   :  { %2010 = vmatpush.msra.mxu1 %v1951_v0  ;;  %2050 = vmatpush.msra.mxu3 %v1952_v2  ;;  %v2073_v0 = vld [vmem:[#allocation5 + $0x1a50] sm:$0xff]  ;;  %v2074_v2 = vld [vmem:[#allocation5 + $0x1a58] sm:$0xff] }
 0x596   :  { %1993 = vmatpush.msra.mxu0 %v1913_v63  ;;  %2033 = vmatpush.msra.mxu2 %v1914_v1  ;;  %v2111_v1 = vld [vmem:[#allocation5 + $0x1b80] sm:$0xff] }
 0x597   :  { %2011 = vmatpush.msra.mxu1 %v1949_v4  ;;  %2051 = vmatpush.msra.mxu3 %v1950_v6  ;;  %v2071_v4 = vld [vmem:[#allocation5 + $0x1a40] sm:$0xff]  ;;  %v2072_v6 = vld [vmem:[#allocation5 + $0x1a48] sm:$0xff] }
 0x598   :  { %1994 = vmatpush.msra.mxu0 %v1911_v3  ;;  %2034 = vmatpush.msra.mxu2 %v1912_v5  ;;  %v2112_v3 = vld [vmem:[#allocation5 + $0x1b88] sm:$0xff]  ;;  %v2109_v5 = vld [vmem:[#allocation5 + $0x1b70] sm:$0xff] }
 0x599   :  { %2012 = vmatpush.msra.mxu1 %v1947_v8  ;;  %2052 = vmatpush.msra.mxu3 %v1948_v10  ;;  %v2069_v8 = vld [vmem:[#allocation5 + $0x1a30] sm:$0xff]  ;;  %v2070_v10 = vld [vmem:[#allocation5 + $0x1a38] sm:$0xff] }
 0x59a   :  { %1995 = vmatpush.msra.mxu0 %v1909_v7  ;;  %2035 = vmatpush.msra.mxu2 %v1910_v9  ;;  %v2110_v7 = vld [vmem:[#allocation5 + $0x1b78] sm:$0xff]  ;;  %v2107_v9 = vld [vmem:[#allocation5 + $0x1b60] sm:$0xff] }
 0x59b   :  { %2013 = vmatpush.msra.mxu1 %v1945_v11  ;;  %2053 = vmatpush.msra.mxu3 %v1946_v12  ;;  %v2108_v11 = vld [vmem:[#allocation5 + $0x1b68] sm:$0xff]  ;;  %v2067_v12 = vld [vmem:[#allocation5 + $0x1a20] sm:$0xff] }
 0x59d   :  { %2014 = vmatpush.msra.mxu1 %v1943_v13  ;;  %2054 = vmatpush.msra.mxu3 %v1944_v14  ;;  %v2105_v13 = vld [vmem:[#allocation5 + $0x1b50] sm:$0xff]  ;;  %v2068_v14 = vld [vmem:[#allocation5 + $0x1a28] sm:$0xff] }
 0x59f   :  { %2015 = vmatpush.msra.mxu1 %v1941_v15  ;;  %2055 = vmatpush.msra.mxu3 %v1942_v16  ;;  %v2106_v15 = vld [vmem:[#allocation5 + $0x1b58] sm:$0xff]  ;;  %v2065_v16 = vld [vmem:[#allocation5 + $0x1a10] sm:$0xff] }
 0x5f7   :  { %v1689_v40 = vpop.f32.mrf.mxu0 }
 0x5f8   :  { %v1690_v41 = vadd.f32 %v1689_v40, %v1668_v37  ;;  %v2117_v37 = vld [vmem:[#allocation5 + $0x1bb0] sm:$0xff]  ;;  %v2082_v40 = vld [vmem:[#allocation5 + $0x1a98] sm:$0xff] }
 0x5fd   :  { %v1709_v42 = vpop.f32.mrf.mxu1  ;;  %v1729_v45 = vpop.f32.mrf.mxu2 }
 0x5fe   :  { %v1710_v43 = vadd.f32 %v1709_v42, %v1690_v41  ;;  %v1730_v47 = vadd.f32 %v1729_v45, %v1669_v44  ;;  %v2115_v41 = vld [vmem:[#allocation5 + $0x1ba0] sm:$0xff]  ;;  %v2116_v42 = vld [vmem:[#allocation5 + $0x1ba8] sm:$0xff]  ;;  %v1820_v45 = vld [vmem:[#allocation7 + $0x16] sm:$0x3] }
 0x5ff   :  { %v2080_v44 = vld [vmem:[#allocation5 + $0x1a88] sm:$0xff]  ;;  %v1823_v57 = vperm.slane %v1820_v45, 1 }
 0x600   :  { %v1752_v46 = vmax.f32 %v1710_v43, 0.0  ;;  %v2079_v43 = vld [vmem:[#allocation5 + $0x1a80] sm:$0xff] }
 0x602   :  { %1842 = vmatmul.f32.vlgmr.msrb.gmra.mxu0 %v1752_v46  ;;  %1882 = vmatmul.f32.vlgmr.msrb.gmra.mxu2 %v1752_v46  ;;  %v2113_v46 = vld [vmem:[#allocation5 + $0x1b90] sm:$0xff] }
 0x603   :  { %v1749_v48 = vpop.f32.mrf.mxu3  ;;  %2134 = vmatpush.msrb.mxu0 %v2093_v17  ;;  %2174 = vmatpush.msrb.mxu2 %v2094_v18  ;;  %v2103_v17 = vld [vmem:[#allocation5 + $0x1b40] sm:$0xff]  ;;  %v2066_v18 = vld [vmem:[#allocation5 + $0x1a18] sm:$0xff] }
 0x604   :  { %v1750_v49 = vadd.f32 %v1749_v48, %v1730_v47  ;;  %v2114_v47 = vld [vmem:[#allocation5 + $0x1b98] sm:$0xff]  ;;  %v2077_v48 = vld [vmem:[#allocation5 + $0x1a70] sm:$0xff] }
 0x605   :  { %2135 = vmatpush.msrb.mxu0 %v2091_v19  ;;  %2175 = vmatpush.msrb.mxu2 %v2092_v20  ;;  %v2104_v19 = vld [vmem:[#allocation5 + $0x1b48] sm:$0xff]  ;;  %v2063_v20 = vld [vmem:[#allocation5 + $0x1a00] sm:$0xff] }
 0x606   :  { %v1753_v50 = vmax.f32 %v1750_v49, 0.0  ;;  %v2078_v49 = vld [vmem:[#allocation5 + $0x1a78] sm:$0xff] }
 0x607   :  { %2136 = vmatpush.msrb.mxu0 %v2089_v21  ;;  %2176 = vmatpush.msrb.mxu2 %v2090_v22  ;;  %v2101_v21 = vld [vmem:[#allocation5 + $0x1b30] sm:$0xff]  ;;  %v2064_v22 = vld [vmem:[#allocation5 + $0x1a08] sm:$0xff] }
 0x608   :  { %1862 = vmatmul.f32.vlgmr.msrb.gmra.mxu1 %v1753_v50  ;;  %1902 = vmatmul.f32.vlgmr.msrb.gmra.mxu3 %v1753_v50  ;;  %v1822_v50 = vperm.slane %v1820_v45, 0  ;;  %v2240_v45 = vld [vmem:[#allocation5 + $0x1cb8] sm:$0xff] }
 0x609   :  { %2154 = vmatpush.msrb.mxu1 %v2125_v23  ;;  %2194 = vmatpush.msrb.mxu3 %v2126_v24  ;;  %v2102_v23 = vld [vmem:[#allocation5 + $0x1b38] sm:$0xff]  ;;  %v2099_v24 = vld [vmem:[#allocation5 + $0x1b20] sm:$0xff] }
 0x60a   :  { %2137 = vmatpush.msrb.mxu0 %v2087_v26  ;;  %2177 = vmatpush.msrb.mxu2 %v2088_v27  ;;  %v2097_v26 = vld [vmem:[#allocation5 + $0x1b10] sm:$0xff]  ;;  %v2098_v27 = vld [vmem:[#allocation5 + $0x1b18] sm:$0xff] }
 0x60b   :  { %2155 = vmatpush.msrb.mxu1 %v2123_v25  ;;  %2195 = vmatpush.msrb.mxu3 %v2124_v28  ;;  %v2100_v25 = vld [vmem:[#allocation5 + $0x1b28] sm:$0xff]  ;;  %v2095_v28 = vld [vmem:[#allocation5 + $0x1b00] sm:$0xff] }
 0x60c   :  { %2138 = vmatpush.msrb.mxu0 %v2085_v31  ;;  %2178 = vmatpush.msrb.mxu2 %v2086_v32  ;;  %v2248_v31 = vld [vmem:[#allocation5 + $0x1cf8] sm:$0xff]  ;;  %v2245_v32 = vld [vmem:[#allocation5 + $0x1ce0] sm:$0xff] }
 0x60d   :  { %2156 = vmatpush.msrb.mxu1 %v2121_v29  ;;  %2196 = vmatpush.msrb.mxu3 %v2122_v30  ;;  %v2096_v29 = vld [vmem:[#allocation5 + $0x1b08] sm:$0xff]  ;;  %v2247_v30 = vld [vmem:[#allocation5 + $0x1cf0] sm:$0xff] }
 0x60e   :  { %2139 = vmatpush.msrb.mxu0 %v2083_v35  ;;  %2179 = vmatpush.msrb.mxu2 %v2084_v36  ;;  %v2244_v35 = vld [vmem:[#allocation5 + $0x1cd8] sm:$0xff]  ;;  %v2279_v36 = vld [vmem:[#allocation5 + $0x1df0] sm:$0xff] }
 0x60f   :  { %2157 = vmatpush.msrb.mxu1 %v2119_v33  ;;  %2197 = vmatpush.msrb.mxu3 %v2120_v34  ;;  %v2246_v33 = vld [vmem:[#allocation5 + $0x1ce8] sm:$0xff]  ;;  %v2243_v34 = vld [vmem:[#allocation5 + $0x1cd0] sm:$0xff] }
 0x610   :  { %2140 = vmatpush.msrb.mxu0 %v2081_v39  ;;  %2180 = vmatpush.msrb.mxu2 %v2082_v40  ;;  %v2241_v39 = vld [vmem:[#allocation5 + $0x1cc0] sm:$0xff]  ;;  %v2242_v40 = vld [vmem:[#allocation5 + $0x1cc8] sm:$0xff] }
 0x611   :  { %2158 = vmatpush.msrb.mxu1 %v2117_v37  ;;  %2198 = vmatpush.msrb.mxu3 %v2118_v38  ;;  %v2280_v37 = vld [vmem:[#allocation5 + $0x1df8] sm:$0xff]  ;;  %v2277_v38 = vld [vmem:[#allocation5 + $0x1de0] sm:$0xff] }
 0x612   :  { %2141 = vmatpush.msrb.mxu0 %v2079_v43  ;;  %2181 = vmatpush.msrb.mxu2 %v2080_v44  ;;  %v2276_v43 = vld [vmem:[#allocation5 + $0x1dd8] sm:$0xff]  ;;  %v2239_v44 = vld [vmem:[#allocation5 + $0x1cb0] sm:$0xff] }
 0x613   :  { %2159 = vmatpush.msrb.mxu1 %v2115_v41  ;;  %2199 = vmatpush.msrb.mxu3 %v2116_v42  ;;  %v2278_v41 = vld [vmem:[#allocation5 + $0x1de8] sm:$0xff]  ;;  %v2275_v42 = vld [vmem:[#allocation5 + $0x1dd0] sm:$0xff] }
 0x614   :  { %2142 = vmatpush.msrb.mxu0 %v2077_v48  ;;  %2182 = vmatpush.msrb.mxu2 %v2078_v49  ;;  %v2237_v48 = vld [vmem:[#allocation5 + $0x1ca0] sm:$0xff]  ;;  %v2238_v49 = vld [vmem:[#allocation5 + $0x1ca8] sm:$0xff] }
 0x615   :  { %2160 = vmatpush.msrb.mxu1 %v2113_v46  ;;  %2200 = vmatpush.msrb.mxu3 %v2114_v47  ;;  %v2273_v46 = vld [vmem:[#allocation5 + $0x1dc0] sm:$0xff]  ;;  %v2274_v47 = vld [vmem:[#allocation5 + $0x1dc8] sm:$0xff] }
 0x616   :  { %2143 = vmatpush.msrb.mxu0 %v2075_v51  ;;  %2183 = vmatpush.msrb.mxu2 %v2076_v52  ;;  %v2272_v51 = vld [vmem:[#allocation5 + $0x1db8] sm:$0xff]  ;;  %v2235_v52 = vld [vmem:[#allocation5 + $0x1c90] sm:$0xff] }
 0x617   :  { %2161 = vmatpush.msrb.mxu1 %v2111_v1  ;;  %2201 = vmatpush.msrb.mxu3 %v2112_v3  ;;  %v2230_v1 = vld [vmem:[#allocation5 + $0x1c68] sm:$0xff] }
 0x618   :  { %2144 = vmatpush.msrb.mxu0 %v2073_v0  ;;  %2184 = vmatpush.msrb.mxu2 %v2074_v2  ;;  %v2229_v0 = vld [vmem:[#allocation5 + $0x1c60] sm:$0xff] }
 0x619   :  { %2162 = vmatpush.msrb.mxu1 %v2109_v5  ;;  %2202 = vmatpush.msrb.mxu3 %v2110_v7 }
 0x61a   :  { %2145 = vmatpush.msrb.mxu0 %v2071_v4  ;;  %2185 = vmatpush.msrb.mxu2 %v2072_v6 }
 0x61b   :  { %2163 = vmatpush.msrb.mxu1 %v2107_v9  ;;  %2203 = vmatpush.msrb.mxu3 %v2108_v11 }
 0x61c   :  { %2146 = vmatpush.msrb.mxu0 %v2069_v8  ;;  %2186 = vmatpush.msrb.mxu2 %v2070_v10 }
 0x61d   :  { %2164 = vmatpush.msrb.mxu1 %v2105_v13  ;;  %2204 = vmatpush.msrb.mxu3 %v2106_v15  ;;  %v2227_v13 = vld [vmem:[#allocation5 + $0x1c50] sm:$0xff]  ;;  %v2228_v15 = vld [vmem:[#allocation5 + $0x1c58] sm:$0xff] }
 0x61e   :  { %2147 = vmatpush.msrb.mxu0 %v2067_v12  ;;  %2187 = vmatpush.msrb.mxu2 %v2068_v14  ;;  %v2265_v14 = vld [vmem:[#allocation5 + $0x1d80] sm:$0xff] }
 0x61f   :  { %2165 = vmatpush.msrb.mxu1 %v2103_v17  ;;  %2205 = vmatpush.msrb.mxu3 %v2104_v19  ;;  %v2225_v17 = vld [vmem:[#allocation5 + $0x1c40] sm:$0xff]  ;;  %v2226_v19 = vld [vmem:[#allocation5 + $0x1c48] sm:$0xff] }
 0x620   :  { %2148 = vmatpush.msrb.mxu0 %v2065_v16  ;;  %2188 = vmatpush.msrb.mxu2 %v2066_v18  ;;  %v2266_v16 = vld [vmem:[#allocation5 + $0x1d88] sm:$0xff]  ;;  %v2263_v18 = vld [vmem:[#allocation5 + $0x1d70] sm:$0xff] }
 0x621   :  { %2166 = vmatpush.msrb.mxu1 %v2101_v21  ;;  %2206 = vmatpush.msrb.mxu3 %v2102_v23  ;;  %v2223_v21 = vld [vmem:[#allocation5 + $0x1c30] sm:$0xff]  ;;  %v2224_v23 = vld [vmem:[#allocation5 + $0x1c38] sm:$0xff] }
 0x622   :  { %2149 = vmatpush.msrb.mxu0 %v2063_v20  ;;  %2189 = vmatpush.msrb.mxu2 %v2064_v22  ;;  %v2264_v20 = vld [vmem:[#allocation5 + $0x1d78] sm:$0xff]  ;;  %v2261_v22 = vld [vmem:[#allocation5 + $0x1d60] sm:$0xff] }
 0x623   :  { %2167 = vmatpush.msrb.mxu1 %v2099_v24  ;;  %2207 = vmatpush.msrb.mxu3 %v2100_v25  ;;  %v2262_v24 = vld [vmem:[#allocation5 + $0x1d68] sm:$0xff]  ;;  %v2221_v25 = vld [vmem:[#allocation5 + $0x1c20] sm:$0xff] }
 0x625   :  { %2168 = vmatpush.msrb.mxu1 %v2097_v26  ;;  %2208 = vmatpush.msrb.mxu3 %v2098_v27  ;;  %v2259_v26 = vld [vmem:[#allocation5 + $0x1d50] sm:$0xff]  ;;  %v2222_v27 = vld [vmem:[#allocation5 + $0x1c28] sm:$0xff] }
 0x627   :  { %2169 = vmatpush.msrb.mxu1 %v2095_v28  ;;  %2209 = vmatpush.msrb.mxu3 %v2096_v29  ;;  %v2260_v28 = vld [vmem:[#allocation5 + $0x1d58] sm:$0xff]  ;;  %v2219_v29 = vld [vmem:[#allocation5 + $0x1c10] sm:$0xff] }
 0x67f   :  { %v1843_v53 = vpop.f32.mrf.mxu0 }
 0x680   :  { %v1844_v54 = vadd.f32 %v1843_v53, %v1822_v50  ;;  %v2271_v50 = vld [vmem:[#allocation5 + $0x1db0] sm:$0xff]  ;;  %v2236_v53 = vld [vmem:[#allocation5 + $0x1c98] sm:$0xff] }
 0x685   :  { %v1863_v55 = vpop.f32.mrf.mxu1  ;;  %v1883_v58 = vpop.f32.mrf.mxu2 }
 0x686   :  { %v1864_v56 = vadd.f32 %v1863_v55, %v1844_v54  ;;  %v1884_v60 = vadd.f32 %v1883_v58, %v1823_v57  ;;  %v2269_v54 = vld [vmem:[#allocation5 + $0x1da0] sm:$0xff]  ;;  %v2270_v55 = vld [vmem:[#allocation5 + $0x1da8] sm:$0xff]  ;;  %v1974_v58 = vld [vmem:[#allocation7 + $0x18] sm:$0x3] }
 0x687   :  { %v2234_v57 = vld [vmem:[#allocation5 + $0x1c88] sm:$0xff]  ;;  %v1977_v6 = vperm.slane %v1974_v58, 1 }
 0x688   :  { %v1906_v59 = vmax.f32 %v1864_v56, 0.0  ;;  %v2233_v56 = vld [vmem:[#allocation5 + $0x1c80] sm:$0xff] }
 0x68a   :  { %1996 = vmatmul.f32.vlgmr.msra.gmra.mxu0 %v1906_v59  ;;  %2036 = vmatmul.f32.vlgmr.msra.gmra.mxu2 %v1906_v59  ;;  %v2267_v59 = vld [vmem:[#allocation5 + $0x1d90] sm:$0xff] }
 0x68b   :  { %v1903_v61 = vpop.f32.mrf.mxu3  ;;  %2288 = vmatpush.msra.mxu0 %v2247_v30  ;;  %2328 = vmatpush.msra.mxu2 %v2248_v31  ;;  %v2257_v30 = vld [vmem:[#allocation5 + $0x1d40] sm:$0xff]  ;;  %v2220_v31 = vld [vmem:[#allocation5 + $0x1c18] sm:$0xff] }
 0x68c   :  { %v1904_v62 = vadd.f32 %v1903_v61, %v1884_v60  ;;  %v2268_v60 = vld [vmem:[#allocation5 + $0x1d98] sm:$0xff]  ;;  %v2231_v61 = vld [vmem:[#allocation5 + $0x1c70] sm:$0xff] }
 0x68d   :  { %2289 = vmatpush.msra.mxu0 %v2245_v32  ;;  %2329 = vmatpush.msra.mxu2 %v2246_v33  ;;  %v2258_v32 = vld [vmem:[#allocation5 + $0x1d48] sm:$0xff]  ;;  %v2217_v33 = vld [vmem:[#allocation5 + $0x1c00] sm:$0xff] }
 0x68e   :  { %v1907_v63 = vmax.f32 %v1904_v62, 0.0  ;;  %v2232_v62 = vld [vmem:[#allocation5 + $0x1c78] sm:$0xff] }
 0x68f   :  { %2290 = vmatpush.msra.mxu0 %v2243_v34  ;;  %2330 = vmatpush.msra.mxu2 %v2244_v35  ;;  %v2255_v34 = vld [vmem:[#allocation5 + $0x1d30] sm:$0xff]  ;;  %v2218_v35 = vld [vmem:[#allocation5 + $0x1c08] sm:$0xff] }
 0x690   :  { %2016 = vmatmul.f32.vlgmr.msra.gmra.mxu1 %v1907_v63  ;;  %2056 = vmatmul.f32.vlgmr.msra.gmra.mxu3 %v1907_v63  ;;  %v1976_v63 = vperm.slane %v1974_v58, 0  ;;  %v2394_v58 = vld [vmem:[#allocation5 + $0x1eb8] sm:$0xff] }
 0x691   :  { %2308 = vmatpush.msra.mxu1 %v2279_v36  ;;  %2348 = vmatpush.msra.mxu3 %v2280_v37  ;;  %v2256_v36 = vld [vmem:[#allocation5 + $0x1d38] sm:$0xff]  ;;  %v2253_v37 = vld [vmem:[#allocation5 + $0x1d20] sm:$0xff] }
 0x692   :  { %2291 = vmatpush.msra.mxu0 %v2241_v39  ;;  %2331 = vmatpush.msra.mxu2 %v2242_v40  ;;  %v2251_v39 = vld [vmem:[#allocation5 + $0x1d10] sm:$0xff]  ;;  %v2252_v40 = vld [vmem:[#allocation5 + $0x1d18] sm:$0xff] }
 0x693   :  { %2309 = vmatpush.msra.mxu1 %v2277_v38  ;;  %2349 = vmatpush.msra.mxu3 %v2278_v41  ;;  %v2254_v38 = vld [vmem:[#allocation5 + $0x1d28] sm:$0xff]  ;;  %v2249_v41 = vld [vmem:[#allocation5 + $0x1d00] sm:$0xff] }
 0x694   :  { %2292 = vmatpush.msra.mxu0 %v2239_v44  ;;  %2332 = vmatpush.msra.mxu2 %v2240_v45  ;;  %v2402_v44 = vld [vmem:[#allocation5 + $0x1ef8] sm:$0xff]  ;;  %v2399_v45 = vld [vmem:[#allocation5 + $0x1ee0] sm:$0xff] }
 0x695   :  { %2310 = vmatpush.msra.mxu1 %v2275_v42  ;;  %2350 = vmatpush.msra.mxu3 %v2276_v43  ;;  %v2250_v42 = vld [vmem:[#allocation5 + $0x1d08] sm:$0xff]  ;;  %v2401_v43 = vld [vmem:[#allocation5 + $0x1ef0] sm:$0xff] }
 0x696   :  { %2293 = vmatpush.msra.mxu0 %v2237_v48  ;;  %2333 = vmatpush.msra.mxu2 %v2238_v49  ;;  %v2398_v48 = vld [vmem:[#allocation5 + $0x1ed8] sm:$0xff]  ;;  %v2433_v49 = vld [vmem:[#allocation5 + $0x1ff0] sm:$0xff] }
 0x697   :  { %2311 = vmatpush.msra.mxu1 %v2273_v46  ;;  %2351 = vmatpush.msra.mxu3 %v2274_v47  ;;  %v2400_v46 = vld [vmem:[#allocation5 + $0x1ee8] sm:$0xff]  ;;  %v2397_v47 = vld [vmem:[#allocation5 + $0x1ed0] sm:$0xff] }
 0x698   :  { %2294 = vmatpush.msra.mxu0 %v2235_v52  ;;  %2334 = vmatpush.msra.mxu2 %v2236_v53  ;;  %v2395_v52 = vld [vmem:[#allocation5 + $0x1ec0] sm:$0xff]  ;;  %v2396_v53 = vld [vmem:[#allocation5 + $0x1ec8] sm:$0xff] }
 0x699   :  { %2312 = vmatpush.msra.mxu1 %v2271_v50  ;;  %2352 = vmatpush.msra.mxu3 %v2272_v51  ;;  %v2434_v50 = vld [vmem:[#allocation5 + $0x1ff8] sm:$0xff]  ;;  %v2431_v51 = vld [vmem:[#allocation5 + $0x1fe0] sm:$0xff] }
 0x69a   :  { %2295 = vmatpush.msra.mxu0 %v2233_v56  ;;  %2335 = vmatpush.msra.mxu2 %v2234_v57  ;;  %v2430_v56 = vld [vmem:[#allocation5 + $0x1fd8] sm:$0xff]  ;;  %v2393_v57 = vld [vmem:[#allocation5 + $0x1eb0] sm:$0xff] }
 0x69b   :  { %2313 = vmatpush.msra.mxu1 %v2269_v54  ;;  %2353 = vmatpush.msra.mxu3 %v2270_v55  ;;  %v2432_v54 = vld [vmem:[#allocation5 + $0x1fe8] sm:$0xff]  ;;  %v2429_v55 = vld [vmem:[#allocation5 + $0x1fd0] sm:$0xff] }
 0x69c   :  { %2296 = vmatpush.msra.mxu0 %v2231_v61  ;;  %2336 = vmatpush.msra.mxu2 %v2232_v62  ;;  %v2391_v61 = vld [vmem:[#allocation5 + $0x1ea0] sm:$0xff]  ;;  %v2392_v62 = vld [vmem:[#allocation5 + $0x1ea8] sm:$0xff] }
 0x69d   :  { %2314 = vmatpush.msra.mxu1 %v2267_v59  ;;  %2354 = vmatpush.msra.mxu3 %v2268_v60  ;;  %v2427_v59 = vld [vmem:[#allocation5 + $0x1fc0] sm:$0xff]  ;;  %v2428_v60 = vld [vmem:[#allocation5 + $0x1fc8] sm:$0xff] }
 0x69e   :  { %2297 = vmatpush.msra.mxu0 %v2229_v0  ;;  %2337 = vmatpush.msra.mxu2 %v2230_v1  ;;  %v2426_v0 = vld [vmem:[#allocation5 + $0x1fb8] sm:$0xff]  ;;  %v2389_v1 = vld [vmem:[#allocation5 + $0x1e90] sm:$0xff] }
 0x69f   :  { %2315 = vmatpush.msra.mxu1 %v2265_v14  ;;  %2355 = vmatpush.msra.mxu3 %v2266_v16  ;;  %v2384_v14 = vld [vmem:[#allocation5 + $0x1e68] sm:$0xff] }
 0x6a0   :  { %2298 = vmatpush.msra.mxu0 %v2227_v13  ;;  %2338 = vmatpush.msra.mxu2 %v2228_v15  ;;  %v2383_v13 = vld [vmem:[#allocation5 + $0x1e60] sm:$0xff] }
 0x6a1   :  { %2316 = vmatpush.msra.mxu1 %v2263_v18  ;;  %2356 = vmatpush.msra.mxu3 %v2264_v20 }
 0x6a2   :  { %2299 = vmatpush.msra.mxu0 %v2225_v17  ;;  %2339 = vmatpush.msra.mxu2 %v2226_v19 }
 0x6a3   :  { %2317 = vmatpush.msra.mxu1 %v2261_v22  ;;  %2357 = vmatpush.msra.mxu3 %v2262_v24 }
 0x6a4   :  { %2300 = vmatpush.msra.mxu0 %v2223_v21  ;;  %2340 = vmatpush.msra.mxu2 %v2224_v23 }
 0x6a5   :  { %2318 = vmatpush.msra.mxu1 %v2259_v26  ;;  %2358 = vmatpush.msra.mxu3 %v2260_v28  ;;  %v2381_v26 = vld [vmem:[#allocation5 + $0x1e50] sm:$0xff]  ;;  %v2382_v28 = vld [vmem:[#allocation5 + $0x1e58] sm:$0xff] }
 0x6a6   :  { %2301 = vmatpush.msra.mxu0 %v2221_v25  ;;  %2341 = vmatpush.msra.mxu2 %v2222_v27  ;;  %v2419_v27 = vld [vmem:[#allocation5 + $0x1f80] sm:$0xff] }
 0x6a7   :  { %2319 = vmatpush.msra.mxu1 %v2257_v30  ;;  %2359 = vmatpush.msra.mxu3 %v2258_v32  ;;  %v2379_v30 = vld [vmem:[#allocation5 + $0x1e40] sm:$0xff]  ;;  %v2380_v32 = vld [vmem:[#allocation5 + $0x1e48] sm:$0xff] }
 0x6a8   :  { %2302 = vmatpush.msra.mxu0 %v2219_v29  ;;  %2342 = vmatpush.msra.mxu2 %v2220_v31  ;;  %v2420_v29 = vld [vmem:[#allocation5 + $0x1f88] sm:$0xff]  ;;  %v2417_v31 = vld [vmem:[#allocation5 + $0x1f70] sm:$0xff] }
 0x6a9   :  { %2320 = vmatpush.msra.mxu1 %v2255_v34  ;;  %2360 = vmatpush.msra.mxu3 %v2256_v36  ;;  %v2377_v34 = vld [vmem:[#allocation5 + $0x1e30] sm:$0xff]  ;;  %v2378_v36 = vld [vmem:[#allocation5 + $0x1e38] sm:$0xff] }
 0x6aa   :  { %2303 = vmatpush.msra.mxu0 %v2217_v33  ;;  %2343 = vmatpush.msra.mxu2 %v2218_v35  ;;  %v2418_v33 = vld [vmem:[#allocation5 + $0x1f78] sm:$0xff]  ;;  %v2415_v35 = vld [vmem:[#allocation5 + $0x1f60] sm:$0xff] }
 0x6ab   :  { %2321 = vmatpush.msra.mxu1 %v2253_v37  ;;  %2361 = vmatpush.msra.mxu3 %v2254_v38  ;;  %v2416_v37 = vld [vmem:[#allocation5 + $0x1f68] sm:$0xff]  ;;  %v2375_v38 = vld [vmem:[#allocation5 + $0x1e20] sm:$0xff] }
 0x6ad   :  { %2322 = vmatpush.msra.mxu1 %v2251_v39  ;;  %2362 = vmatpush.msra.mxu3 %v2252_v40  ;;  %v2413_v39 = vld [vmem:[#allocation5 + $0x1f50] sm:$0xff]  ;;  %v2376_v40 = vld [vmem:[#allocation5 + $0x1e28] sm:$0xff] }
 0x6af   :  { %2323 = vmatpush.msra.mxu1 %v2249_v41  ;;  %2363 = vmatpush.msra.mxu3 %v2250_v42  ;;  %v2414_v41 = vld [vmem:[#allocation5 + $0x1f58] sm:$0xff]  ;;  %v2373_v42 = vld [vmem:[#allocation5 + $0x1e10] sm:$0xff] }
 0x707   :  { %v1997_v2 = vpop.f32.mrf.mxu0 }
 0x708   :  { %v1998_v3 = vadd.f32 %v1997_v2, %v1976_v63  ;;  %v2425_v63 = vld [vmem:[#allocation5 + $0x1fb0] sm:$0xff]  ;;  %v2390_v2 = vld [vmem:[#allocation5 + $0x1e98] sm:$0xff] }
 0x70d   :  { %v2017_v4 = vpop.f32.mrf.mxu1  ;;  %v2037_v7 = vpop.f32.mrf.mxu2 }
 0x70e   :  { %v2018_v5 = vadd.f32 %v2017_v4, %v1998_v3  ;;  %v2038_v9 = vadd.f32 %v2037_v7, %v1977_v6  ;;  %v2423_v3 = vld [vmem:[#allocation5 + $0x1fa0] sm:$0xff]  ;;  %v2424_v4 = vld [vmem:[#allocation5 + $0x1fa8] sm:$0xff]  ;;  %v2128_v7 = vld [vmem:[#allocation7 + $0x1a] sm:$0x3] }
 0x70f   :  { %v2388_v6 = vld [vmem:[#allocation5 + $0x1e88] sm:$0xff]  ;;  %v2131_v19 = vperm.slane %v2128_v7, 1 }
 0x710   :  { %v2060_v8 = vmax.f32 %v2018_v5, 0.0  ;;  %v2387_v5 = vld [vmem:[#allocation5 + $0x1e80] sm:$0xff] }
 0x712   :  { %2150 = vmatmul.f32.vlgmr.msrb.gmra.mxu0 %v2060_v8  ;;  %2190 = vmatmul.f32.vlgmr.msrb.gmra.mxu2 %v2060_v8  ;;  %v2421_v8 = vld [vmem:[#allocation5 + $0x1f90] sm:$0xff] }
 0x713   :  { %v2057_v10 = vpop.f32.mrf.mxu3  ;;  %2442 = vmatpush.msrb.mxu0 %v2401_v43  ;;  %2482 = vmatpush.msrb.mxu2 %v2402_v44  ;;  %v2411_v43 = vld [vmem:[#allocation5 + $0x1f40] sm:$0xff]  ;;  %v2374_v44 = vld [vmem:[#allocation5 + $0x1e18] sm:$0xff] }
 0x714   :  { %v2058_v11 = vadd.f32 %v2057_v10, %v2038_v9  ;;  %v2422_v9 = vld [vmem:[#allocation5 + $0x1f98] sm:$0xff]  ;;  %v2385_v10 = vld [vmem:[#allocation5 + $0x1e70] sm:$0xff] }
 0x715   :  { %2443 = vmatpush.msrb.mxu0 %v2399_v45  ;;  %2483 = vmatpush.msrb.mxu2 %v2400_v46  ;;  %v2412_v45 = vld [vmem:[#allocation5 + $0x1f48] sm:$0xff]  ;;  %v2371_v46 = vld [vmem:[#allocation5 + $0x1e00] sm:$0xff] }
 0x716   :  { %v2061_v12 = vmax.f32 %v2058_v11, 0.0  ;;  %v2386_v11 = vld [vmem:[#allocation5 + $0x1e78] sm:$0xff] }
 0x717   :  { %2444 = vmatpush.msrb.mxu0 %v2397_v47  ;;  %2484 = vmatpush.msrb.mxu2 %v2398_v48  ;;  %v2409_v47 = vld [vmem:[#allocation5 + $0x1f30] sm:$0xff]  ;;  %v2372_v48 = vld [vmem:[#allocation5 + $0x1e08] sm:$0xff] }
 0x718   :  { %2170 = vmatmul.f32.vlgmr.msrb.gmra.mxu1 %v2061_v12  ;;  %2210 = vmatmul.f32.vlgmr.msrb.gmra.mxu3 %v2061_v12  ;;  %v2130_v12 = vperm.slane %v2128_v7, 0  ;;  %v2548_v7 = vld [vmem:[#allocation5 + $0x20b8] sm:$0xff] }
 0x719   :  { %2462 = vmatpush.msrb.mxu1 %v2433_v49  ;;  %2502 = vmatpush.msrb.mxu3 %v2434_v50  ;;  %v2410_v49 = vld [vmem:[#allocation5 + $0x1f38] sm:$0xff]  ;;  %v2407_v50 = vld [vmem:[#allocation5 + $0x1f20] sm:$0xff] }
 0x71a   :  { %2445 = vmatpush.msrb.mxu0 %v2395_v52  ;;  %2485 = vmatpush.msrb.mxu2 %v2396_v53  ;;  %v2405_v52 = vld [vmem:[#allocation5 + $0x1f10] sm:$0xff]  ;;  %v2406_v53 = vld [vmem:[#allocation5 + $0x1f18] sm:$0xff] }
 0x71b   :  { %2463 = vmatpush.msrb.mxu1 %v2431_v51  ;;  %2503 = vmatpush.msrb.mxu3 %v2432_v54  ;;  %v2408_v51 = vld [vmem:[#allocation5 + $0x1f28] sm:$0xff]  ;;  %v2403_v54 = vld [vmem:[#allocation5 + $0x1f00] sm:$0xff] }
 0x71c   :  { %2446 = vmatpush.msrb.mxu0 %v2393_v57  ;;  %2486 = vmatpush.msrb.mxu2 %v2394_v58  ;;  %v2556_v57 = vld [vmem:[#allocation5 + $0x20f8] sm:$0xff]  ;;  %v2553_v58 = vld [vmem:[#allocation5 + $0x20e0] sm:$0xff] }
 0x71d   :  { %2464 = vmatpush.msrb.mxu1 %v2429_v55  ;;  %2504 = vmatpush.msrb.mxu3 %v2430_v56  ;;  %v2404_v55 = vld [vmem:[#allocation5 + $0x1f08] sm:$0xff]  ;;  %v2555_v56 = vld [vmem:[#allocation5 + $0x20f0] sm:$0xff] }
 0x71e   :  { %2447 = vmatpush.msrb.mxu0 %v2391_v61  ;;  %2487 = vmatpush.msrb.mxu2 %v2392_v62  ;;  %v2552_v61 = vld [vmem:[#allocation5 + $0x20d8] sm:$0xff]  ;;  %v2587_v62 = vld [vmem:[#allocation5 + $0x21f0] sm:$0xff] }
 0x71f   :  { %2465 = vmatpush.msrb.mxu1 %v2427_v59  ;;  %2505 = vmatpush.msrb.mxu3 %v2428_v60  ;;  %v2554_v59 = vld [vmem:[#allocation5 + $0x20e8] sm:$0xff]  ;;  %v2551_v60 = vld [vmem:[#allocation5 + $0x20d0] sm:$0xff] }
 0x720   :  { %2448 = vmatpush.msrb.mxu0 %v2389_v1  ;;  %2488 = vmatpush.msrb.mxu2 %v2390_v2  ;;  %v2549_v1 = vld [vmem:[#allocation5 + $0x20c0] sm:$0xff]  ;;  %v2550_v2 = vld [vmem:[#allocation5 + $0x20c8] sm:$0xff] }
 0x721   :  { %2466 = vmatpush.msrb.mxu1 %v2425_v63  ;;  %2506 = vmatpush.msrb.mxu3 %v2426_v0  ;;  %v2588_v63 = vld [vmem:[#allocation5 + $0x21f8] sm:$0xff]  ;;  %v2585_v0 = vld [vmem:[#allocation5 + $0x21e0] sm:$0xff] }
 0x722   :  { %2449 = vmatpush.msrb.mxu0 %v2387_v5  ;;  %2489 = vmatpush.msrb.mxu2 %v2388_v6  ;;  %v2584_v5 = vld [vmem:[#allocation5 + $0x21d8] sm:$0xff]  ;;  %v2547_v6 = vld [vmem:[#allocation5 + $0x20b0] sm:$0xff] }
 0x723   :  { %2467 = vmatpush.msrb.mxu1 %v2423_v3  ;;  %2507 = vmatpush.msrb.mxu3 %v2424_v4  ;;  %v2586_v3 = vld [vmem:[#allocation5 + $0x21e8] sm:$0xff]  ;;  %v2583_v4 = vld [vmem:[#allocation5 + $0x21d0] sm:$0xff] }
 0x724   :  { %2450 = vmatpush.msrb.mxu0 %v2385_v10  ;;  %2490 = vmatpush.msrb.mxu2 %v2386_v11  ;;  %v2545_v10 = vld [vmem:[#allocation5 + $0x20a0] sm:$0xff]  ;;  %v2546_v11 = vld [vmem:[#allocation5 + $0x20a8] sm:$0xff] }
 0x725   :  { %2468 = vmatpush.msrb.mxu1 %v2421_v8  ;;  %2508 = vmatpush.msrb.mxu3 %v2422_v9  ;;  %v2581_v8 = vld [vmem:[#allocation5 + $0x21c0] sm:$0xff]  ;;  %v2582_v9 = vld [vmem:[#allocation5 + $0x21c8] sm:$0xff] }
 0x726   :  { %2451 = vmatpush.msrb.mxu0 %v2383_v13  ;;  %2491 = vmatpush.msrb.mxu2 %v2384_v14  ;;  %v2580_v13 = vld [vmem:[#allocation5 + $0x21b8] sm:$0xff]  ;;  %v2543_v14 = vld [vmem:[#allocation5 + $0x2090] sm:$0xff] }
 0x727   :  { %2469 = vmatpush.msrb.mxu1 %v2419_v27  ;;  %2509 = vmatpush.msrb.mxu3 %v2420_v29  ;;  %v2538_v27 = vld [vmem:[#allocation5 + $0x2068] sm:$0xff] }
 0x728   :  { %2452 = vmatpush.msrb.mxu0 %v2381_v26  ;;  %2492 = vmatpush.msrb.mxu2 %v2382_v28  ;;  %v2537_v26 = vld [vmem:[#allocation5 + $0x2060] sm:$0xff] }
 0x729   :  { %2470 = vmatpush.msrb.mxu1 %v2417_v31  ;;  %2510 = vmatpush.msrb.mxu3 %v2418_v33 }
 0x72a   :  { %2453 = vmatpush.msrb.mxu0 %v2379_v30  ;;  %2493 = vmatpush.msrb.mxu2 %v2380_v32 }
 0x72b   :  { %2471 = vmatpush.msrb.mxu1 %v2415_v35  ;;  %2511 = vmatpush.msrb.mxu3 %v2416_v37 }
 0x72c   :  { %2454 = vmatpush.msrb.mxu0 %v2377_v34  ;;  %2494 = vmatpush.msrb.mxu2 %v2378_v36 }
 0x72d   :  { %2472 = vmatpush.msrb.mxu1 %v2413_v39  ;;  %2512 = vmatpush.msrb.mxu3 %v2414_v41  ;;  %v2535_v39 = vld [vmem:[#allocation5 + $0x2050] sm:$0xff]  ;;  %v2536_v41 = vld [vmem:[#allocation5 + $0x2058] sm:$0xff] }
 0x72e   :  { %2455 = vmatpush.msrb.mxu0 %v2375_v38  ;;  %2495 = vmatpush.msrb.mxu2 %v2376_v40  ;;  %v2573_v40 = vld [vmem:[#allocation5 + $0x2180] sm:$0xff] }
 0x72f   :  { %2473 = vmatpush.msrb.mxu1 %v2411_v43  ;;  %2513 = vmatpush.msrb.mxu3 %v2412_v45  ;;  %v2533_v43 = vld [vmem:[#allocation5 + $0x2040] sm:$0xff]  ;;  %v2534_v45 = vld [vmem:[#allocation5 + $0x2048] sm:$0xff] }
 0x730   :  { %2456 = vmatpush.msrb.mxu0 %v2373_v42  ;;  %2496 = vmatpush.msrb.mxu2 %v2374_v44  ;;  %v2574_v42 = vld [vmem:[#allocation5 + $0x2188] sm:$0xff]  ;;  %v2571_v44 = vld [vmem:[#allocation5 + $0x2170] sm:$0xff] }
 0x731   :  { %2474 = vmatpush.msrb.mxu1 %v2409_v47  ;;  %2514 = vmatpush.msrb.mxu3 %v2410_v49  ;;  %v2531_v47 = vld [vmem:[#allocation5 + $0x2030] sm:$0xff]  ;;  %v2532_v49 = vld [vmem:[#allocation5 + $0x2038] sm:$0xff] }
 0x732   :  { %2457 = vmatpush.msrb.mxu0 %v2371_v46  ;;  %2497 = vmatpush.msrb.mxu2 %v2372_v48  ;;  %v2572_v46 = vld [vmem:[#allocation5 + $0x2178] sm:$0xff]  ;;  %v2569_v48 = vld [vmem:[#allocation5 + $0x2160] sm:$0xff] }
 0x733   :  { %2475 = vmatpush.msrb.mxu1 %v2407_v50  ;;  %2515 = vmatpush.msrb.mxu3 %v2408_v51  ;;  %v2570_v50 = vld [vmem:[#allocation5 + $0x2168] sm:$0xff]  ;;  %v2529_v51 = vld [vmem:[#allocation5 + $0x2020] sm:$0xff] }
 0x735   :  { %2476 = vmatpush.msrb.mxu1 %v2405_v52  ;;  %2516 = vmatpush.msrb.mxu3 %v2406_v53  ;;  %v2567_v52 = vld [vmem:[#allocation5 + $0x2150] sm:$0xff]  ;;  %v2530_v53 = vld [vmem:[#allocation5 + $0x2028] sm:$0xff] }
 0x737   :  { %2477 = vmatpush.msrb.mxu1 %v2403_v54  ;;  %2517 = vmatpush.msrb.mxu3 %v2404_v55  ;;  %v2568_v54 = vld [vmem:[#allocation5 + $0x2158] sm:$0xff]  ;;  %v2527_v55 = vld [vmem:[#allocation5 + $0x2010] sm:$0xff] }
 0x78f   :  { %v2151_v15 = vpop.f32.mrf.mxu0 }
 0x790   :  { %v2152_v16 = vadd.f32 %v2151_v15, %v2130_v12  ;;  %v2579_v12 = vld [vmem:[#allocation5 + $0x21b0] sm:$0xff]  ;;  %v2544_v15 = vld [vmem:[#allocation5 + $0x2098] sm:$0xff] }
 0x795   :  { %v2171_v17 = vpop.f32.mrf.mxu1  ;;  %v2191_v20 = vpop.f32.mrf.mxu2 }
 0x796   :  { %v2172_v18 = vadd.f32 %v2171_v17, %v2152_v16  ;;  %v2192_v22 = vadd.f32 %v2191_v20, %v2131_v19  ;;  %v2577_v16 = vld [vmem:[#allocation5 + $0x21a0] sm:$0xff]  ;;  %v2578_v17 = vld [vmem:[#allocation5 + $0x21a8] sm:$0xff]  ;;  %v2282_v20 = vld [vmem:[#allocation7 + $0x1c] sm:$0x3] }
 0x797   :  { %v2542_v19 = vld [vmem:[#allocation5 + $0x2088] sm:$0xff]  ;;  %v2285_v32 = vperm.slane %v2282_v20, 1 }
 0x798   :  { %v2214_v21 = vmax.f32 %v2172_v18, 0.0  ;;  %v2541_v18 = vld [vmem:[#allocation5 + $0x2080] sm:$0xff] }
 0x79a   :  { %2304 = vmatmul.f32.vlgmr.msra.gmra.mxu0 %v2214_v21  ;;  %2344 = vmatmul.f32.vlgmr.msra.gmra.mxu2 %v2214_v21  ;;  %v2575_v21 = vld [vmem:[#allocation5 + $0x2190] sm:$0xff] }
 0x79b   :  { %v2211_v23 = vpop.f32.mrf.mxu3  ;;  %2596 = vmatpush.msra.mxu0 %v2555_v56  ;;  %2636 = vmatpush.msra.mxu2 %v2556_v57  ;;  %v2565_v56 = vld [vmem:[#allocation5 + $0x2140] sm:$0xff]  ;;  %v2528_v57 = vld [vmem:[#allocation5 + $0x2018] sm:$0xff] }
 0x79c   :  { %v2212_v24 = vadd.f32 %v2211_v23, %v2192_v22  ;;  %v2576_v22 = vld [vmem:[#allocation5 + $0x2198] sm:$0xff]  ;;  %v2539_v23 = vld [vmem:[#allocation5 + $0x2070] sm:$0xff] }
 0x79d   :  { %2597 = vmatpush.msra.mxu0 %v2553_v58  ;;  %2637 = vmatpush.msra.mxu2 %v2554_v59  ;;  %v2566_v58 = vld [vmem:[#allocation5 + $0x2148] sm:$0xff]  ;;  %v2525_v59 = vld [vmem:[#allocation5 + $0x2000] sm:$0xff] }
 0x79e   :  { %v2215_v25 = vmax.f32 %v2212_v24, 0.0  ;;  %v2540_v24 = vld [vmem:[#allocation5 + $0x2078] sm:$0xff] }
 0x79f   :  { %2598 = vmatpush.msra.mxu0 %v2551_v60  ;;  %2638 = vmatpush.msra.mxu2 %v2552_v61  ;;  %v2563_v60 = vld [vmem:[#allocation5 + $0x2130] sm:$0xff]  ;;  %v2526_v61 = vld [vmem:[#allocation5 + $0x2008] sm:$0xff] }
 0x7a0   :  { %2324 = vmatmul.f32.vlgmr.msra.gmra.mxu1 %v2215_v25  ;;  %2364 = vmatmul.f32.vlgmr.msra.gmra.mxu3 %v2215_v25  ;;  %v2284_v25 = vperm.slane %v2282_v20, 0  ;;  %v2702_v20 = vld [vmem:[#allocation5 + $0x22b8] sm:$0xff] }
 0x7a1   :  { %2616 = vmatpush.msra.mxu1 %v2587_v62  ;;  %2656 = vmatpush.msra.mxu3 %v2588_v63  ;;  %v2564_v62 = vld [vmem:[#allocation5 + $0x2138] sm:$0xff]  ;;  %v2561_v63 = vld [vmem:[#allocation5 + $0x2120] sm:$0xff] }
 0x7a2   :  { %2599 = vmatpush.msra.mxu0 %v2549_v1  ;;  %2639 = vmatpush.msra.mxu2 %v2550_v2  ;;  %v2559_v1 = vld [vmem:[#allocation5 + $0x2110] sm:$0xff]  ;;  %v2560_v2 = vld [vmem:[#allocation5 + $0x2118] sm:$0xff] }
 0x7a3   :  { %2617 = vmatpush.msra.mxu1 %v2585_v0  ;;  %2657 = vmatpush.msra.mxu3 %v2586_v3  ;;  %v2562_v0 = vld [vmem:[#allocation5 + $0x2128] sm:$0xff]  ;;  %v2557_v3 = vld [vmem:[#allocation5 + $0x2100] sm:$0xff] }
 0x7a4   :  { %2600 = vmatpush.msra.mxu0 %v2547_v6  ;;  %2640 = vmatpush.msra.mxu2 %v2548_v7  ;;  %v2710_v6 = vld [vmem:[#allocation5 + $0x22f8] sm:$0xff]  ;;  %v2707_v7 = vld [vmem:[#allocation5 + $0x22e0] sm:$0xff] }
 0x7a5   :  { %2618 = vmatpush.msra.mxu1 %v2583_v4  ;;  %2658 = vmatpush.msra.mxu3 %v2584_v5  ;;  %v2558_v4 = vld [vmem:[#allocation5 + $0x2108] sm:$0xff]  ;;  %v2709_v5 = vld [vmem:[#allocation5 + $0x22f0] sm:$0xff] }
 0x7a6   :  { %2601 = vmatpush.msra.mxu0 %v2545_v10  ;;  %2641 = vmatpush.msra.mxu2 %v2546_v11  ;;  %v2706_v10 = vld [vmem:[#allocation5 + $0x22d8] sm:$0xff]  ;;  %v2741_v11 = vld [vmem:[#allocation5 + $0x23f0] sm:$0xff] }
 0x7a7   :  { %2619 = vmatpush.msra.mxu1 %v2581_v8  ;;  %2659 = vmatpush.msra.mxu3 %v2582_v9  ;;  %v2708_v8 = vld [vmem:[#allocation5 + $0x22e8] sm:$0xff]  ;;  %v2705_v9 = vld [vmem:[#allocation5 + $0x22d0] sm:$0xff] }
 0x7a8   :  { %2602 = vmatpush.msra.mxu0 %v2543_v14  ;;  %2642 = vmatpush.msra.mxu2 %v2544_v15  ;;  %v2703_v14 = vld [vmem:[#allocation5 + $0x22c0] sm:$0xff]  ;;  %v2704_v15 = vld [vmem:[#allocation5 + $0x22c8] sm:$0xff] }
 0x7a9   :  { %2620 = vmatpush.msra.mxu1 %v2579_v12  ;;  %2660 = vmatpush.msra.mxu3 %v2580_v13  ;;  %v2742_v12 = vld [vmem:[#allocation5 + $0x23f8] sm:$0xff]  ;;  %v2739_v13 = vld [vmem:[#allocation5 + $0x23e0] sm:$0xff] }
 0x7aa   :  { %2603 = vmatpush.msra.mxu0 %v2541_v18  ;;  %2643 = vmatpush.msra.mxu2 %v2542_v19  ;;  %v2738_v18 = vld [vmem:[#allocation5 + $0x23d8] sm:$0xff]  ;;  %v2701_v19 = vld [vmem:[#allocation5 + $0x22b0] sm:$0xff] }
 0x7ab   :  { %2621 = vmatpush.msra.mxu1 %v2577_v16  ;;  %2661 = vmatpush.msra.mxu3 %v2578_v17  ;;  %v2740_v16 = vld [vmem:[#allocation5 + $0x23e8] sm:$0xff]  ;;  %v2737_v17 = vld [vmem:[#allocation5 + $0x23d0] sm:$0xff] }
 0x7ac   :  { %2604 = vmatpush.msra.mxu0 %v2539_v23  ;;  %2644 = vmatpush.msra.mxu2 %v2540_v24  ;;  %v2699_v23 = vld [vmem:[#allocation5 + $0x22a0] sm:$0xff]  ;;  %v2700_v24 = vld [vmem:[#allocation5 + $0x22a8] sm:$0xff] }
 0x7ad   :  { %2622 = vmatpush.msra.mxu1 %v2575_v21  ;;  %2662 = vmatpush.msra.mxu3 %v2576_v22  ;;  %v2735_v21 = vld [vmem:[#allocation5 + $0x23c0] sm:$0xff]  ;;  %v2736_v22 = vld [vmem:[#allocation5 + $0x23c8] sm:$0xff] }
 0x7ae   :  { %2605 = vmatpush.msra.mxu0 %v2537_v26  ;;  %2645 = vmatpush.msra.mxu2 %v2538_v27  ;;  %v2734_v26 = vld [vmem:[#allocation5 + $0x23b8] sm:$0xff]  ;;  %v2697_v27 = vld [vmem:[#allocation5 + $0x2290] sm:$0xff] }
 0x7af   :  { %2623 = vmatpush.msra.mxu1 %v2573_v40  ;;  %2663 = vmatpush.msra.mxu3 %v2574_v42  ;;  %v2692_v40 = vld [vmem:[#allocation5 + $0x2268] sm:$0xff] }
 0x7b0   :  { %2606 = vmatpush.msra.mxu0 %v2535_v39  ;;  %2646 = vmatpush.msra.mxu2 %v2536_v41  ;;  %v2691_v39 = vld [vmem:[#allocation5 + $0x2260] sm:$0xff] }
 0x7b1   :  { %2624 = vmatpush.msra.mxu1 %v2571_v44  ;;  %2664 = vmatpush.msra.mxu3 %v2572_v46 }
 0x7b2   :  { %2607 = vmatpush.msra.mxu0 %v2533_v43  ;;  %2647 = vmatpush.msra.mxu2 %v2534_v45 }
 0x7b3   :  { %2625 = vmatpush.msra.mxu1 %v2569_v48  ;;  %2665 = vmatpush.msra.mxu3 %v2570_v50 }
 0x7b4   :  { %2608 = vmatpush.msra.mxu0 %v2531_v47  ;;  %2648 = vmatpush.msra.mxu2 %v2532_v49 }
 0x7b5   :  { %2626 = vmatpush.msra.mxu1 %v2567_v52  ;;  %2666 = vmatpush.msra.mxu3 %v2568_v54  ;;  %v2689_v52 = vld [vmem:[#allocation5 + $0x2250] sm:$0xff]  ;;  %v2690_v54 = vld [vmem:[#allocation5 + $0x2258] sm:$0xff] }
 0x7b6   :  { %2609 = vmatpush.msra.mxu0 %v2529_v51  ;;  %2649 = vmatpush.msra.mxu2 %v2530_v53  ;;  %v2727_v53 = vld [vmem:[#allocation5 + $0x2380] sm:$0xff] }
 0x7b7   :  { %2627 = vmatpush.msra.mxu1 %v2565_v56  ;;  %2667 = vmatpush.msra.mxu3 %v2566_v58  ;;  %v2687_v56 = vld [vmem:[#allocation5 + $0x2240] sm:$0xff]  ;;  %v2688_v58 = vld [vmem:[#allocation5 + $0x2248] sm:$0xff] }
 0x7b8   :  { %2610 = vmatpush.msra.mxu0 %v2527_v55  ;;  %2650 = vmatpush.msra.mxu2 %v2528_v57  ;;  %v2728_v55 = vld [vmem:[#allocation5 + $0x2388] sm:$0xff]  ;;  %v2725_v57 = vld [vmem:[#allocation5 + $0x2370] sm:$0xff] }
 0x7b9   :  { %2628 = vmatpush.msra.mxu1 %v2563_v60  ;;  %2668 = vmatpush.msra.mxu3 %v2564_v62  ;;  %v2685_v60 = vld [vmem:[#allocation5 + $0x2230] sm:$0xff]  ;;  %v2686_v62 = vld [vmem:[#allocation5 + $0x2238] sm:$0xff] }
 0x7ba   :  { %2611 = vmatpush.msra.mxu0 %v2525_v59  ;;  %2651 = vmatpush.msra.mxu2 %v2526_v61  ;;  %v2726_v59 = vld [vmem:[#allocation5 + $0x2378] sm:$0xff]  ;;  %v2723_v61 = vld [vmem:[#allocation5 + $0x2360] sm:$0xff] }
 0x7bb   :  { %2629 = vmatpush.msra.mxu1 %v2561_v63  ;;  %2669 = vmatpush.msra.mxu3 %v2562_v0  ;;  %v2724_v63 = vld [vmem:[#allocation5 + $0x2368] sm:$0xff]  ;;  %v2683_v0 = vld [vmem:[#allocation5 + $0x2220] sm:$0xff] }
 0x7bd   :  { %2630 = vmatpush.msra.mxu1 %v2559_v1  ;;  %2670 = vmatpush.msra.mxu3 %v2560_v2  ;;  %v2721_v1 = vld [vmem:[#allocation5 + $0x2350] sm:$0xff]  ;;  %v2684_v2 = vld [vmem:[#allocation5 + $0x2228] sm:$0xff] }
 0x7bf   :  { %2631 = vmatpush.msra.mxu1 %v2557_v3  ;;  %2671 = vmatpush.msra.mxu3 %v2558_v4  ;;  %v2722_v3 = vld [vmem:[#allocation5 + $0x2358] sm:$0xff]  ;;  %v2681_v4 = vld [vmem:[#allocation5 + $0x2210] sm:$0xff] }
 0x817   :  { %v2305_v28 = vpop.f32.mrf.mxu0 }
 0x818   :  { %v2306_v29 = vadd.f32 %v2305_v28, %v2284_v25  ;;  %v2733_v25 = vld [vmem:[#allocation5 + $0x23b0] sm:$0xff]  ;;  %v2698_v28 = vld [vmem:[#allocation5 + $0x2298] sm:$0xff] }
 0x81d   :  { %v2325_v30 = vpop.f32.mrf.mxu1  ;;  %v2345_v33 = vpop.f32.mrf.mxu2 }
 0x81e   :  { %v2326_v31 = vadd.f32 %v2325_v30, %v2306_v29  ;;  %v2346_v35 = vadd.f32 %v2345_v33, %v2285_v32  ;;  %v2731_v29 = vld [vmem:[#allocation5 + $0x23a0] sm:$0xff]  ;;  %v2732_v30 = vld [vmem:[#allocation5 + $0x23a8] sm:$0xff]  ;;  %v2436_v33 = vld [vmem:[#allocation7 + $0x1e] sm:$0x3] }
 0x81f   :  { %v2696_v32 = vld [vmem:[#allocation5 + $0x2288] sm:$0xff]  ;;  %v2439_v45 = vperm.slane %v2436_v33, 1 }
 0x820   :  { %v2368_v34 = vmax.f32 %v2326_v31, 0.0  ;;  %v2695_v31 = vld [vmem:[#allocation5 + $0x2280] sm:$0xff] }
 0x822   :  { %2458 = vmatmul.f32.vlgmr.msrb.gmra.mxu0 %v2368_v34  ;;  %2498 = vmatmul.f32.vlgmr.msrb.gmra.mxu2 %v2368_v34  ;;  %v2729_v34 = vld [vmem:[#allocation5 + $0x2390] sm:$0xff] }
 0x823   :  { %v2365_v36 = vpop.f32.mrf.mxu3  ;;  %2750 = vmatpush.msrb.mxu0 %v2709_v5  ;;  %2790 = vmatpush.msrb.mxu2 %v2710_v6  ;;  %v2719_v5 = vld [vmem:[#allocation5 + $0x2340] sm:$0xff]  ;;  %v2682_v6 = vld [vmem:[#allocation5 + $0x2218] sm:$0xff] }
 0x824   :  { %v2366_v37 = vadd.f32 %v2365_v36, %v2346_v35  ;;  %v2730_v35 = vld [vmem:[#allocation5 + $0x2398] sm:$0xff]  ;;  %v2693_v36 = vld [vmem:[#allocation5 + $0x2270] sm:$0xff] }
 0x825   :  { %2751 = vmatpush.msrb.mxu0 %v2707_v7  ;;  %2791 = vmatpush.msrb.mxu2 %v2708_v8  ;;  %v2720_v7 = vld [vmem:[#allocation5 + $0x2348] sm:$0xff]  ;;  %v2679_v8 = vld [vmem:[#allocation5 + $0x2200] sm:$0xff] }
 0x826   :  { %v2369_v38 = vmax.f32 %v2366_v37, 0.0  ;;  %v2694_v37 = vld [vmem:[#allocation5 + $0x2278] sm:$0xff] }
 0x827   :  { %2752 = vmatpush.msrb.mxu0 %v2705_v9  ;;  %2792 = vmatpush.msrb.mxu2 %v2706_v10  ;;  %v2717_v9 = vld [vmem:[#allocation5 + $0x2330] sm:$0xff]  ;;  %v2680_v10 = vld [vmem:[#allocation5 + $0x2208] sm:$0xff] }
 0x828   :  { %2478 = vmatmul.f32.vlgmr.msrb.gmra.mxu1 %v2369_v38  ;;  %2518 = vmatmul.f32.vlgmr.msrb.gmra.mxu3 %v2369_v38  ;;  %v2438_v38 = vperm.slane %v2436_v33, 0  ;;  %v2856_v33 = vld [vmem:[#allocation5 + $0x24b8] sm:$0xff] }
 0x829   :  { %2770 = vmatpush.msrb.mxu1 %v2741_v11  ;;  %2810 = vmatpush.msrb.mxu3 %v2742_v12  ;;  %v2718_v11 = vld [vmem:[#allocation5 + $0x2338] sm:$0xff]  ;;  %v2715_v12 = vld [vmem:[#allocation5 + $0x2320] sm:$0xff] }
 0x82a   :  { %2753 = vmatpush.msrb.mxu0 %v2703_v14  ;;  %2793 = vmatpush.msrb.mxu2 %v2704_v15  ;;  %v2713_v14 = vld [vmem:[#allocation5 + $0x2310] sm:$0xff]  ;;  %v2714_v15 = vld [vmem:[#allocation5 + $0x2318] sm:$0xff] }
 0x82b   :  { %2771 = vmatpush.msrb.mxu1 %v2739_v13  ;;  %2811 = vmatpush.msrb.mxu3 %v2740_v16  ;;  %v2716_v13 = vld [vmem:[#allocation5 + $0x2328] sm:$0xff]  ;;  %v2711_v16 = vld [vmem:[#allocation5 + $0x2300] sm:$0xff] }
 0x82c   :  { %2754 = vmatpush.msrb.mxu0 %v2701_v19  ;;  %2794 = vmatpush.msrb.mxu2 %v2702_v20  ;;  %v2864_v19 = vld [vmem:[#allocation5 + $0x24f8] sm:$0xff]  ;;  %v2861_v20 = vld [vmem:[#allocation5 + $0x24e0] sm:$0xff] }
 0x82d   :  { %2772 = vmatpush.msrb.mxu1 %v2737_v17  ;;  %2812 = vmatpush.msrb.mxu3 %v2738_v18  ;;  %v2712_v17 = vld [vmem:[#allocation5 + $0x2308] sm:$0xff]  ;;  %v2863_v18 = vld [vmem:[#allocation5 + $0x24f0] sm:$0xff] }
 0x82e   :  { %2755 = vmatpush.msrb.mxu0 %v2699_v23  ;;  %2795 = vmatpush.msrb.mxu2 %v2700_v24  ;;  %v2860_v23 = vld [vmem:[#allocation5 + $0x24d8] sm:$0xff]  ;;  %v2895_v24 = vld [vmem:[#allocation5 + $0x25f0] sm:$0xff] }
 0x82f   :  { %2773 = vmatpush.msrb.mxu1 %v2735_v21  ;;  %2813 = vmatpush.msrb.mxu3 %v2736_v22  ;;  %v2862_v21 = vld [vmem:[#allocation5 + $0x24e8] sm:$0xff]  ;;  %v2859_v22 = vld [vmem:[#allocation5 + $0x24d0] sm:$0xff] }
 0x830   :  { %2756 = vmatpush.msrb.mxu0 %v2697_v27  ;;  %2796 = vmatpush.msrb.mxu2 %v2698_v28  ;;  %v2857_v27 = vld [vmem:[#allocation5 + $0x24c0] sm:$0xff]  ;;  %v2858_v28 = vld [vmem:[#allocation5 + $0x24c8] sm:$0xff] }
 0x831   :  { %2774 = vmatpush.msrb.mxu1 %v2733_v25  ;;  %2814 = vmatpush.msrb.mxu3 %v2734_v26  ;;  %v2896_v25 = vld [vmem:[#allocation5 + $0x25f8] sm:$0xff]  ;;  %v2893_v26 = vld [vmem:[#allocation5 + $0x25e0] sm:$0xff] }
 0x832   :  { %2757 = vmatpush.msrb.mxu0 %v2695_v31  ;;  %2797 = vmatpush.msrb.mxu2 %v2696_v32  ;;  %v2892_v31 = vld [vmem:[#allocation5 + $0x25d8] sm:$0xff]  ;;  %v2855_v32 = vld [vmem:[#allocation5 + $0x24b0] sm:$0xff] }
 0x833   :  { %2775 = vmatpush.msrb.mxu1 %v2731_v29  ;;  %2815 = vmatpush.msrb.mxu3 %v2732_v30  ;;  %v2894_v29 = vld [vmem:[#allocation5 + $0x25e8] sm:$0xff]  ;;  %v2891_v30 = vld [vmem:[#allocation5 + $0x25d0] sm:$0xff] }
 0x834   :  { %2758 = vmatpush.msrb.mxu0 %v2693_v36  ;;  %2798 = vmatpush.msrb.mxu2 %v2694_v37  ;;  %v2853_v36 = vld [vmem:[#allocation5 + $0x24a0] sm:$0xff]  ;;  %v2854_v37 = vld [vmem:[#allocation5 + $0x24a8] sm:$0xff] }
 0x835   :  { %2776 = vmatpush.msrb.mxu1 %v2729_v34  ;;  %2816 = vmatpush.msrb.mxu3 %v2730_v35  ;;  %v2889_v34 = vld [vmem:[#allocation5 + $0x25c0] sm:$0xff]  ;;  %v2890_v35 = vld [vmem:[#allocation5 + $0x25c8] sm:$0xff] }
 0x836   :  { %2759 = vmatpush.msrb.mxu0 %v2691_v39  ;;  %2799 = vmatpush.msrb.mxu2 %v2692_v40  ;;  %v2888_v39 = vld [vmem:[#allocation5 + $0x25b8] sm:$0xff]  ;;  %v2851_v40 = vld [vmem:[#allocation5 + $0x2490] sm:$0xff] }
 0x837   :  { %2777 = vmatpush.msrb.mxu1 %v2727_v53  ;;  %2817 = vmatpush.msrb.mxu3 %v2728_v55  ;;  %v2846_v53 = vld [vmem:[#allocation5 + $0x2468] sm:$0xff] }
 0x838   :  { %2760 = vmatpush.msrb.mxu0 %v2689_v52  ;;  %2800 = vmatpush.msrb.mxu2 %v2690_v54  ;;  %v2845_v52 = vld [vmem:[#allocation5 + $0x2460] sm:$0xff] }
 0x839   :  { %2778 = vmatpush.msrb.mxu1 %v2725_v57  ;;  %2818 = vmatpush.msrb.mxu3 %v2726_v59 }
 0x83a   :  { %2761 = vmatpush.msrb.mxu0 %v2687_v56  ;;  %2801 = vmatpush.msrb.mxu2 %v2688_v58 }
 0x83b   :  { %2779 = vmatpush.msrb.mxu1 %v2723_v61  ;;  %2819 = vmatpush.msrb.mxu3 %v2724_v63 }
 0x83c   :  { %2762 = vmatpush.msrb.mxu0 %v2685_v60  ;;  %2802 = vmatpush.msrb.mxu2 %v2686_v62 }
 0x83d   :  { %2780 = vmatpush.msrb.mxu1 %v2721_v1  ;;  %2820 = vmatpush.msrb.mxu3 %v2722_v3  ;;  %v2843_v1 = vld [vmem:[#allocation5 + $0x2450] sm:$0xff]  ;;  %v2844_v3 = vld [vmem:[#allocation5 + $0x2458] sm:$0xff] }
 0x83e   :  { %2763 = vmatpush.msrb.mxu0 %v2683_v0  ;;  %2803 = vmatpush.msrb.mxu2 %v2684_v2  ;;  %v2881_v2 = vld [vmem:[#allocation5 + $0x2580] sm:$0xff] }
 0x83f   :  { %2781 = vmatpush.msrb.mxu1 %v2719_v5  ;;  %2821 = vmatpush.msrb.mxu3 %v2720_v7  ;;  %v2841_v5 = vld [vmem:[#allocation5 + $0x2440] sm:$0xff]  ;;  %v2842_v7 = vld [vmem:[#allocation5 + $0x2448] sm:$0xff] }
 0x840   :  { %2764 = vmatpush.msrb.mxu0 %v2681_v4  ;;  %2804 = vmatpush.msrb.mxu2 %v2682_v6  ;;  %v2882_v4 = vld [vmem:[#allocation5 + $0x2588] sm:$0xff]  ;;  %v2879_v6 = vld [vmem:[#allocation5 + $0x2570] sm:$0xff] }
 0x841   :  { %2782 = vmatpush.msrb.mxu1 %v2717_v9  ;;  %2822 = vmatpush.msrb.mxu3 %v2718_v11  ;;  %v2839_v9 = vld [vmem:[#allocation5 + $0x2430] sm:$0xff]  ;;  %v2840_v11 = vld [vmem:[#allocation5 + $0x2438] sm:$0xff] }
 0x842   :  { %2765 = vmatpush.msrb.mxu0 %v2679_v8  ;;  %2805 = vmatpush.msrb.mxu2 %v2680_v10  ;;  %v2880_v8 = vld [vmem:[#allocation5 + $0x2578] sm:$0xff]  ;;  %v2877_v10 = vld [vmem:[#allocation5 + $0x2560] sm:$0xff] }
 0x843   :  { %2783 = vmatpush.msrb.mxu1 %v2715_v12  ;;  %2823 = vmatpush.msrb.mxu3 %v2716_v13  ;;  %v2878_v12 = vld [vmem:[#allocation5 + $0x2568] sm:$0xff]  ;;  %v2837_v13 = vld [vmem:[#allocation5 + $0x2420] sm:$0xff] }
 0x845   :  { %2784 = vmatpush.msrb.mxu1 %v2713_v14  ;;  %2824 = vmatpush.msrb.mxu3 %v2714_v15  ;;  %v2875_v14 = vld [vmem:[#allocation5 + $0x2550] sm:$0xff]  ;;  %v2838_v15 = vld [vmem:[#allocation5 + $0x2428] sm:$0xff] }
 0x847   :  { %2785 = vmatpush.msrb.mxu1 %v2711_v16  ;;  %2825 = vmatpush.msrb.mxu3 %v2712_v17  ;;  %v2876_v16 = vld [vmem:[#allocation5 + $0x2558] sm:$0xff]  ;;  %v2835_v17 = vld [vmem:[#allocation5 + $0x2410] sm:$0xff] }
 0x89f   :  { %v2459_v41 = vpop.f32.mrf.mxu0 }
 0x8a0   :  { %v2460_v42 = vadd.f32 %v2459_v41, %v2438_v38  ;;  %v2887_v38 = vld [vmem:[#allocation5 + $0x25b0] sm:$0xff]  ;;  %v2852_v41 = vld [vmem:[#allocation5 + $0x2498] sm:$0xff] }
 0x8a5   :  { %v2479_v43 = vpop.f32.mrf.mxu1  ;;  %v2499_v46 = vpop.f32.mrf.mxu2 }
 0x8a6   :  { %v2480_v44 = vadd.f32 %v2479_v43, %v2460_v42  ;;  %v2500_v48 = vadd.f32 %v2499_v46, %v2439_v45  ;;  %v2885_v42 = vld [vmem:[#allocation5 + $0x25a0] sm:$0xff]  ;;  %v2886_v43 = vld [vmem:[#allocation5 + $0x25a8] sm:$0xff] }
 0x8a7   :  { %v2850_v45 = vld [vmem:[#allocation5 + $0x2488] sm:$0xff]  ;;  %v2590_v46 = vld [vmem:[#allocation7 + $0x20] sm:$0x3] }
 0x8a8   :  { %v2522_v47 = vmax.f32 %v2480_v44, 0.0  ;;  %v2849_v44 = vld [vmem:[#allocation5 + $0x2480] sm:$0xff]  ;;  %v2593_v58 = vperm.slane %v2590_v46, 1 }
 0x8aa   :  { %2612 = vmatmul.f32.vlgmr.msra.gmra.mxu0 %v2522_v47  ;;  %2652 = vmatmul.f32.vlgmr.msra.gmra.mxu2 %v2522_v47  ;;  %v2883_v47 = vld [vmem:[#allocation5 + $0x2590] sm:$0xff] }
 0x8ab   :  { %v2519_v49 = vpop.f32.mrf.mxu3  ;;  %2904 = vmatpush.msra.mxu0 %v2863_v18  ;;  %2944 = vmatpush.msra.mxu2 %v2864_v19  ;;  %v2873_v18 = vld [vmem:[#allocation5 + $0x2540] sm:$0xff]  ;;  %v2836_v19 = vld [vmem:[#allocation5 + $0x2418] sm:$0xff] }
 0x8ac   :  { %v2520_v50 = vadd.f32 %v2519_v49, %v2500_v48  ;;  %v2884_v48 = vld [vmem:[#allocation5 + $0x2598] sm:$0xff]  ;;  %v2847_v49 = vld [vmem:[#allocation5 + $0x2470] sm:$0xff] }
 0x8ad   :  { %2905 = vmatpush.msra.mxu0 %v2861_v20  ;;  %2945 = vmatpush.msra.mxu2 %v2862_v21  ;;  %v2874_v20 = vld [vmem:[#allocation5 + $0x2548] sm:$0xff]  ;;  %v2833_v21 = vld [vmem:[#allocation5 + $0x2400] sm:$0xff] }
 0x8ae   :  { %v2523_v51 = vmax.f32 %v2520_v50, 0.0  ;;  %v2848_v50 = vld [vmem:[#allocation5 + $0x2478] sm:$0xff] }
 0x8af   :  { %2906 = vmatpush.msra.mxu0 %v2859_v22  ;;  %2946 = vmatpush.msra.mxu2 %v2860_v23  ;;  %v2871_v22 = vld [vmem:[#allocation5 + $0x2530] sm:$0xff]  ;;  %v2834_v23 = vld [vmem:[#allocation5 + $0x2408] sm:$0xff] }
 0x8b0   :  { %2632 = vmatmul.f32.vlgmr.msra.gmra.mxu1 %v2523_v51  ;;  %2672 = vmatmul.f32.vlgmr.msra.gmra.mxu3 %v2523_v51  ;;  %v2592_v51 = vperm.slane %v2590_v46, 0  ;;  %v3010_v46 = vld [vmem:[#allocation5 + $0x26b8] sm:$0xff] }
 0x8b1   :  { %2924 = vmatpush.msra.mxu1 %v2895_v24  ;;  %2964 = vmatpush.msra.mxu3 %v2896_v25  ;;  %v2872_v24 = vld [vmem:[#allocation5 + $0x2538] sm:$0xff]  ;;  %v2869_v25 = vld [vmem:[#allocation5 + $0x2520] sm:$0xff] }
 0x8b2   :  { %2907 = vmatpush.msra.mxu0 %v2857_v27  ;;  %2947 = vmatpush.msra.mxu2 %v2858_v28  ;;  %v2867_v27 = vld [vmem:[#allocation5 + $0x2510] sm:$0xff]  ;;  %v2868_v28 = vld [vmem:[#allocation5 + $0x2518] sm:$0xff] }
 0x8b3   :  { %2925 = vmatpush.msra.mxu1 %v2893_v26  ;;  %2965 = vmatpush.msra.mxu3 %v2894_v29  ;;  %v2870_v26 = vld [vmem:[#allocation5 + $0x2528] sm:$0xff]  ;;  %v2865_v29 = vld [vmem:[#allocation5 + $0x2500] sm:$0xff] }
 0x8b4   :  { %2908 = vmatpush.msra.mxu0 %v2855_v32  ;;  %2948 = vmatpush.msra.mxu2 %v2856_v33  ;;  %v3018_v32 = vld [vmem:[#allocation5 + $0x26f8] sm:$0xff]  ;;  %v3015_v33 = vld [vmem:[#allocation5 + $0x26e0] sm:$0xff] }
 0x8b5   :  { %2926 = vmatpush.msra.mxu1 %v2891_v30  ;;  %2966 = vmatpush.msra.mxu3 %v2892_v31  ;;  %v2866_v30 = vld [vmem:[#allocation5 + $0x2508] sm:$0xff]  ;;  %v3017_v31 = vld [vmem:[#allocation5 + $0x26f0] sm:$0xff] }
 0x8b6   :  { %2909 = vmatpush.msra.mxu0 %v2853_v36  ;;  %2949 = vmatpush.msra.mxu2 %v2854_v37  ;;  %v3014_v36 = vld [vmem:[#allocation5 + $0x26d8] sm:$0xff]  ;;  %v3049_v37 = vld [vmem:[#allocation5 + $0x27f0] sm:$0xff] }
 0x8b7   :  { %2927 = vmatpush.msra.mxu1 %v2889_v34  ;;  %2967 = vmatpush.msra.mxu3 %v2890_v35  ;;  %v3016_v34 = vld [vmem:[#allocation5 + $0x26e8] sm:$0xff]  ;;  %v3013_v35 = vld [vmem:[#allocation5 + $0x26d0] sm:$0xff] }
 0x8b8   :  { %2910 = vmatpush.msra.mxu0 %v2851_v40  ;;  %2950 = vmatpush.msra.mxu2 %v2852_v41  ;;  %v3011_v40 = vld [vmem:[#allocation5 + $0x26c0] sm:$0xff]  ;;  %v3012_v41 = vld [vmem:[#allocation5 + $0x26c8] sm:$0xff] }
 0x8b9   :  { %2928 = vmatpush.msra.mxu1 %v2887_v38  ;;  %2968 = vmatpush.msra.mxu3 %v2888_v39  ;;  %v3050_v38 = vld [vmem:[#allocation5 + $0x27f8] sm:$0xff]  ;;  %v3047_v39 = vld [vmem:[#allocation5 + $0x27e0] sm:$0xff] }
 0x8ba   :  { %2911 = vmatpush.msra.mxu0 %v2849_v44  ;;  %2951 = vmatpush.msra.mxu2 %v2850_v45  ;;  %v3046_v44 = vld [vmem:[#allocation5 + $0x27d8] sm:$0xff]  ;;  %v3009_v45 = vld [vmem:[#allocation5 + $0x26b0] sm:$0xff] }
 0x8bb   :  { %2929 = vmatpush.msra.mxu1 %v2885_v42  ;;  %2969 = vmatpush.msra.mxu3 %v2886_v43  ;;  %v3048_v42 = vld [vmem:[#allocation5 + $0x27e8] sm:$0xff]  ;;  %v3045_v43 = vld [vmem:[#allocation5 + $0x27d0] sm:$0xff] }
 0x8bc   :  { %2912 = vmatpush.msra.mxu0 %v2847_v49  ;;  %2952 = vmatpush.msra.mxu2 %v2848_v50  ;;  %v3007_v49 = vld [vmem:[#allocation5 + $0x26a0] sm:$0xff]  ;;  %v3008_v50 = vld [vmem:[#allocation5 + $0x26a8] sm:$0xff] }
 0x8bd   :  { %2930 = vmatpush.msra.mxu1 %v2883_v47  ;;  %2970 = vmatpush.msra.mxu3 %v2884_v48  ;;  %v3043_v47 = vld [vmem:[#allocation5 + $0x27c0] sm:$0xff]  ;;  %v3044_v48 = vld [vmem:[#allocation5 + $0x27c8] sm:$0xff] }
 0x8be   :  { %2913 = vmatpush.msra.mxu0 %v2845_v52  ;;  %2953 = vmatpush.msra.mxu2 %v2846_v53  ;;  %v3042_v52 = vld [vmem:[#allocation5 + $0x27b8] sm:$0xff]  ;;  %v3005_v53 = vld [vmem:[#allocation5 + $0x2690] sm:$0xff] }
 0x8bf   :  { %2931 = vmatpush.msra.mxu1 %v2881_v2  ;;  %2971 = vmatpush.msra.mxu3 %v2882_v4  ;;  %v3000_v2 = vld [vmem:[#allocation5 + $0x2668] sm:$0xff] }
 0x8c0   :  { %2914 = vmatpush.msra.mxu0 %v2843_v1  ;;  %2954 = vmatpush.msra.mxu2 %v2844_v3  ;;  %v2999_v1 = vld [vmem:[#allocation5 + $0x2660] sm:$0xff] }
 0x8c1   :  { %2932 = vmatpush.msra.mxu1 %v2879_v6  ;;  %2972 = vmatpush.msra.mxu3 %v2880_v8 }
 0x8c2   :  { %2915 = vmatpush.msra.mxu0 %v2841_v5  ;;  %2955 = vmatpush.msra.mxu2 %v2842_v7 }
 0x8c3   :  { %2933 = vmatpush.msra.mxu1 %v2877_v10  ;;  %2973 = vmatpush.msra.mxu3 %v2878_v12 }
 0x8c4   :  { %2916 = vmatpush.msra.mxu0 %v2839_v9  ;;  %2956 = vmatpush.msra.mxu2 %v2840_v11 }
 0x8c5   :  { %2934 = vmatpush.msra.mxu1 %v2875_v14  ;;  %2974 = vmatpush.msra.mxu3 %v2876_v16  ;;  %v2997_v14 = vld [vmem:[#allocation5 + $0x2650] sm:$0xff]  ;;  %v2998_v16 = vld [vmem:[#allocation5 + $0x2658] sm:$0xff] }
 0x8c6   :  { %2917 = vmatpush.msra.mxu0 %v2837_v13  ;;  %2957 = vmatpush.msra.mxu2 %v2838_v15  ;;  %v3035_v15 = vld [vmem:[#allocation5 + $0x2780] sm:$0xff] }
 0x8c7   :  { %2935 = vmatpush.msra.mxu1 %v2873_v18  ;;  %2975 = vmatpush.msra.mxu3 %v2874_v20  ;;  %v2995_v18 = vld [vmem:[#allocation5 + $0x2640] sm:$0xff]  ;;  %v2996_v20 = vld [vmem:[#allocation5 + $0x2648] sm:$0xff] }
 0x8c8   :  { %2918 = vmatpush.msra.mxu0 %v2835_v17  ;;  %2958 = vmatpush.msra.mxu2 %v2836_v19  ;;  %v3036_v17 = vld [vmem:[#allocation5 + $0x2788] sm:$0xff]  ;;  %v3033_v19 = vld [vmem:[#allocation5 + $0x2770] sm:$0xff] }
 0x8c9   :  { %2936 = vmatpush.msra.mxu1 %v2871_v22  ;;  %2976 = vmatpush.msra.mxu3 %v2872_v24  ;;  %v2993_v22 = vld [vmem:[#allocation5 + $0x2630] sm:$0xff]  ;;  %v2994_v24 = vld [vmem:[#allocation5 + $0x2638] sm:$0xff] }
 0x8ca   :  { %2919 = vmatpush.msra.mxu0 %v2833_v21  ;;  %2959 = vmatpush.msra.mxu2 %v2834_v23  ;;  %v3034_v21 = vld [vmem:[#allocation5 + $0x2778] sm:$0xff]  ;;  %v3031_v23 = vld [vmem:[#allocation5 + $0x2760] sm:$0xff] }
 0x8cb   :  { %2937 = vmatpush.msra.mxu1 %v2869_v25  ;;  %2977 = vmatpush.msra.mxu3 %v2870_v26  ;;  %v3032_v25 = vld [vmem:[#allocation5 + $0x2768] sm:$0xff]  ;;  %v2991_v26 = vld [vmem:[#allocation5 + $0x2620] sm:$0xff] }
 0x8cd   :  { %2938 = vmatpush.msra.mxu1 %v2867_v27  ;;  %2978 = vmatpush.msra.mxu3 %v2868_v28  ;;  %v3029_v27 = vld [vmem:[#allocation5 + $0x2750] sm:$0xff]  ;;  %v2992_v28 = vld [vmem:[#allocation5 + $0x2628] sm:$0xff] }
 0x8cf   :  { %2939 = vmatpush.msra.mxu1 %v2865_v29  ;;  %2979 = vmatpush.msra.mxu3 %v2866_v30  ;;  %v3030_v29 = vld [vmem:[#allocation5 + $0x2758] sm:$0xff]  ;;  %v2989_v30 = vld [vmem:[#allocation5 + $0x2610] sm:$0xff] }
 0x927   :  { %v2613_v54 = vpop.f32.mrf.mxu0 }
 0x928   :  { %v2614_v55 = vadd.f32 %v2613_v54, %v2592_v51  ;;  %v3041_v51 = vld [vmem:[#allocation5 + $0x27b0] sm:$0xff]  ;;  %v3006_v54 = vld [vmem:[#allocation5 + $0x2698] sm:$0xff] }
 0x92d   :  { %v2633_v56 = vpop.f32.mrf.mxu1  ;;  %v2653_v59 = vpop.f32.mrf.mxu2 }
 0x92e   :  { %v2634_v57 = vadd.f32 %v2633_v56, %v2614_v55  ;;  %v2654_v61 = vadd.f32 %v2653_v59, %v2593_v58  ;;  %v3039_v55 = vld [vmem:[#allocation5 + $0x27a0] sm:$0xff]  ;;  %v3040_v56 = vld [vmem:[#allocation5 + $0x27a8] sm:$0xff] }
 0x92f   :  { %v3004_v58 = vld [vmem:[#allocation5 + $0x2688] sm:$0xff]  ;;  %v2744_v59 = vld [vmem:[#allocation7 + $0x22] sm:$0x3] }
 0x930   :  { %v2676_v60 = vmax.f32 %v2634_v57, 0.0  ;;  %v3003_v57 = vld [vmem:[#allocation5 + $0x2680] sm:$0xff]  ;;  %v2747_v7 = vperm.slane %v2744_v59, 1 }
 0x932   :  { %2766 = vmatmul.f32.vlgmr.msrb.gmra.mxu0 %v2676_v60  ;;  %2806 = vmatmul.f32.vlgmr.msrb.gmra.mxu2 %v2676_v60  ;;  %v3037_v60 = vld [vmem:[#allocation5 + $0x2790] sm:$0xff] }
 0x933   :  { %v2673_v62 = vpop.f32.mrf.mxu3  ;;  %3058 = vmatpush.msrb.mxu0 %v3017_v31  ;;  %3098 = vmatpush.msrb.mxu2 %v3018_v32  ;;  %v3027_v31 = vld [vmem:[#allocation5 + $0x2740] sm:$0xff]  ;;  %v2990_v32 = vld [vmem:[#allocation5 + $0x2618] sm:$0xff] }
 0x934   :  { %v2674_v63 = vadd.f32 %v2673_v62, %v2654_v61  ;;  %v3038_v61 = vld [vmem:[#allocation5 + $0x2798] sm:$0xff]  ;;  %v3001_v62 = vld [vmem:[#allocation5 + $0x2670] sm:$0xff] }
 0x935   :  { %3059 = vmatpush.msrb.mxu0 %v3015_v33  ;;  %3099 = vmatpush.msrb.mxu2 %v3016_v34  ;;  %v3028_v33 = vld [vmem:[#allocation5 + $0x2748] sm:$0xff]  ;;  %v2987_v34 = vld [vmem:[#allocation5 + $0x2600] sm:$0xff] }
 0x936   :  { %v2677_v0 = vmax.f32 %v2674_v63, 0.0  ;;  %v3002_v63 = vld [vmem:[#allocation5 + $0x2678] sm:$0xff] }
 0x937   :  { %3060 = vmatpush.msrb.mxu0 %v3013_v35  ;;  %3100 = vmatpush.msrb.mxu2 %v3014_v36  ;;  %v3025_v35 = vld [vmem:[#allocation5 + $0x2730] sm:$0xff]  ;;  %v2988_v36 = vld [vmem:[#allocation5 + $0x2608] sm:$0xff] }
 0x938   :  { %2786 = vmatmul.f32.vlgmr.msrb.gmra.mxu1 %v2677_v0  ;;  %2826 = vmatmul.f32.vlgmr.msrb.gmra.mxu3 %v2677_v0  ;;  %v2746_v0 = vperm.slane %v2744_v59, 0 }
 0x939   :  { %3078 = vmatpush.msrb.mxu1 %v3049_v37  ;;  %3118 = vmatpush.msrb.mxu3 %v3050_v38  ;;  %v3026_v37 = vld [vmem:[#allocation5 + $0x2738] sm:$0xff]  ;;  %v3023_v38 = vld [vmem:[#allocation5 + $0x2720] sm:$0xff] }
 0x93a   :  { %3061 = vmatpush.msrb.mxu0 %v3011_v40  ;;  %3101 = vmatpush.msrb.mxu2 %v3012_v41  ;;  %v3021_v40 = vld [vmem:[#allocation5 + $0x2710] sm:$0xff]  ;;  %v3022_v41 = vld [vmem:[#allocation5 + $0x2718] sm:$0xff] }
 0x93b   :  { %3079 = vmatpush.msrb.mxu1 %v3047_v39  ;;  %3119 = vmatpush.msrb.mxu3 %v3048_v42  ;;  %v3024_v39 = vld [vmem:[#allocation5 + $0x2728] sm:$0xff]  ;;  %v3019_v42 = vld [vmem:[#allocation5 + $0x2700] sm:$0xff] }
 0x93c   :  { %3062 = vmatpush.msrb.mxu0 %v3009_v45  ;;  %3102 = vmatpush.msrb.mxu2 %v3010_v46 }
 0x93d   :  { %3080 = vmatpush.msrb.mxu1 %v3045_v43  ;;  %3120 = vmatpush.msrb.mxu3 %v3046_v44  ;;  %v3020_v43 = vld [vmem:[#allocation5 + $0x2708] sm:$0xff]  ;;  %v2898_v44 = vld [vmem:[#allocation7 + $0x24] sm:$0x3] }
 0x93e   :  { %3063 = vmatpush.msrb.mxu0 %v3007_v49  ;;  %3103 = vmatpush.msrb.mxu2 %v3008_v50  ;;  %v2900_v45 = vperm.slane %v2898_v44, 0  ;;  %v2901_v50 = vperm.slane %v2898_v44, 1 }
 0x93f   :  { %3081 = vmatpush.msrb.mxu1 %v3043_v47  ;;  %3121 = vmatpush.msrb.mxu3 %v3044_v48 }
 0x940   :  { %3064 = vmatpush.msrb.mxu0 %v3005_v53  ;;  %3104 = vmatpush.msrb.mxu2 %v3006_v54 }
 0x941   :  { %3082 = vmatpush.msrb.mxu1 %v3041_v51  ;;  %3122 = vmatpush.msrb.mxu3 %v3042_v52 }
 0x942   :  { %3065 = vmatpush.msrb.mxu0 %v3003_v57  ;;  %3105 = vmatpush.msrb.mxu2 %v3004_v58  ;;  %v3052_v57 = vld [vmem:[#allocation7 + $0x26] sm:$0x3] }
 0x943   :  { %3083 = vmatpush.msrb.mxu1 %v3039_v55  ;;  %3123 = vmatpush.msrb.mxu3 %v3040_v56  ;;  %v3054_v58 = vperm.slane %v3052_v57, 0 }
 0x944   :  { %3066 = vmatpush.msrb.mxu0 %v3001_v62  ;;  %3106 = vmatpush.msrb.mxu2 %v3002_v63  ;;  %v3055_v63 = vperm.slane %v3052_v57, 1 }
 0x945   :  { %3084 = vmatpush.msrb.mxu1 %v3037_v60  ;;  %3124 = vmatpush.msrb.mxu3 %v3038_v61 }
 0x946   :  { %3067 = vmatpush.msrb.mxu0 %v2999_v1  ;;  %3107 = vmatpush.msrb.mxu2 %v3000_v2 }
 0x947   :  { %3085 = vmatpush.msrb.mxu1 %v3035_v15  ;;  %3125 = vmatpush.msrb.mxu3 %v3036_v17 }
 0x948   :  { %3068 = vmatpush.msrb.mxu0 %v2997_v14  ;;  %3108 = vmatpush.msrb.mxu2 %v2998_v16 }
 0x949   :  { %3086 = vmatpush.msrb.mxu1 %v3033_v19  ;;  %3126 = vmatpush.msrb.mxu3 %v3034_v21 }
 0x94a   :  { %3069 = vmatpush.msrb.mxu0 %v2995_v18  ;;  %3109 = vmatpush.msrb.mxu2 %v2996_v20 }
 0x94b   :  { %3087 = vmatpush.msrb.mxu1 %v3031_v23  ;;  %3127 = vmatpush.msrb.mxu3 %v3032_v25 }
 0x94c   :  { %3070 = vmatpush.msrb.mxu0 %v2993_v22  ;;  %3110 = vmatpush.msrb.mxu2 %v2994_v24 }
 0x94d   :  { %3088 = vmatpush.msrb.mxu1 %v3029_v27  ;;  %3128 = vmatpush.msrb.mxu3 %v3030_v29 }
 0x94e   :  { %3071 = vmatpush.msrb.mxu0 %v2991_v26  ;;  %3111 = vmatpush.msrb.mxu2 %v2992_v28 }
 0x94f   :  { %3089 = vmatpush.msrb.mxu1 %v3027_v31  ;;  %3129 = vmatpush.msrb.mxu3 %v3028_v33 }
 0x950   :  { %3072 = vmatpush.msrb.mxu0 %v2989_v30  ;;  %3112 = vmatpush.msrb.mxu2 %v2990_v32 }
 0x951   :  { %3090 = vmatpush.msrb.mxu1 %v3025_v35  ;;  %3130 = vmatpush.msrb.mxu3 %v3026_v37 }
 0x952   :  { %3073 = vmatpush.msrb.mxu0 %v2987_v34  ;;  %3113 = vmatpush.msrb.mxu2 %v2988_v36 }
 0x953   :  { %3091 = vmatpush.msrb.mxu1 %v3023_v38  ;;  %3131 = vmatpush.msrb.mxu3 %v3024_v39 }
 0x955   :  { %3092 = vmatpush.msrb.mxu1 %v3021_v40  ;;  %3132 = vmatpush.msrb.mxu3 %v3022_v41 }
 0x957   :  { %3093 = vmatpush.msrb.mxu1 %v3019_v42  ;;  %3133 = vmatpush.msrb.mxu3 %v3020_v43 }
 0x9af   :  { %v2767_v3 = vpop.f32.mrf.mxu0 }
 0x9b0   :  { %v2768_v4 = vadd.f32 %v2767_v3, %v2746_v0 }
 0x9b5   :  { %v2787_v5 = vpop.f32.mrf.mxu1  ;;  %v2807_v8 = vpop.f32.mrf.mxu2 }
 0x9b6   :  { %v2788_v6 = vadd.f32 %v2787_v5, %v2768_v4  ;;  %v2808_v10 = vadd.f32 %v2807_v8, %v2747_v7 }
 0x9b8   :  { %v2830_v9 = vmax.f32 %v2788_v6, 0.0 }
 0x9ba   :  { %2920 = vmatmul.f32.vlgmr.msra.gmra.mxu0 %v2830_v9  ;;  %2960 = vmatmul.f32.vlgmr.msra.gmra.mxu2 %v2830_v9 }
 0x9bb   :  { %v2827_v11 = vpop.f32.mrf.mxu3 }
 0x9bc   :  { %v2828_v12 = vadd.f32 %v2827_v11, %v2808_v10 }
 0x9be   :  { %v2831_v13 = vmax.f32 %v2828_v12, 0.0 }
 0x9c0   :  { %2940 = vmatmul.f32.vlgmr.msra.gmra.mxu1 %v2831_v13  ;;  %2980 = vmatmul.f32.vlgmr.msra.gmra.mxu3 %v2831_v13 }
 0xa37   :  { %v2921_v46 = vpop.f32.mrf.mxu0 }
 0xa38   :  { %v2922_v47 = vadd.f32 %v2921_v46, %v2900_v45 }
 0xa3d   :  { %v2941_v48 = vpop.f32.mrf.mxu1  ;;  %v2961_v51 = vpop.f32.mrf.mxu2 }
 0xa3e   :  { %v2942_v49 = vadd.f32 %v2941_v48, %v2922_v47  ;;  %v2962_v53 = vadd.f32 %v2961_v51, %v2901_v50 }
 0xa40   :  { %v2984_v52 = vmax.f32 %v2942_v49, 0.0 }
 0xa42   :  { %3074 = vmatmul.f32.vlgmr.msrb.gmra.mxu0 %v2984_v52  ;;  %3114 = vmatmul.f32.vlgmr.msrb.gmra.mxu2 %v2984_v52 }
 0xa43   :  { %v2981_v54 = vpop.f32.mrf.mxu3 }
 0xa44   :  { %v2982_v55 = vadd.f32 %v2981_v54, %v2962_v53 }
 0xa46   :  { %v2985_v56 = vmax.f32 %v2982_v55, 0.0 }
 0xa48   :  { %3094 = vmatmul.f32.vlgmr.msrb.gmra.mxu1 %v2985_v56  ;;  %3134 = vmatmul.f32.vlgmr.msrb.gmra.mxu3 %v2985_v56 }
 0xabf   :  { %v3075_v59 = vpop.f32.mrf.mxu0 }
 0xac0   :  { %v3076_v60 = vadd.f32 %v3075_v59, %v3054_v58 }
 0xac5   :  { %v3095_v61 = vpop.f32.mrf.mxu1  ;;  %v3115_v0 = vpop.f32.mrf.mxu2 }
 0xac6   :  { %v3096_v62 = vadd.f32 %v3095_v61, %v3076_v60  ;;  %v3116_v2 = vadd.f32 %v3115_v0, %v3055_v63 }
 0xac8   :  { %v3138_v1 = vmax.f32 %v3096_v62, 0.0 }
 0xaca   :  { %3140 = vst [vmem:[#allocation8] sm:$0xff] %v3138_v1 }
 0xacb   :  { %v3135_v3 = vpop.f32.mrf.mxu3 }
 0xacc   :  { %v3136_v4 = vadd.f32 %v3135_v3, %v3116_v2 }
 0xace   :  { %v3139_v5 = vmax.f32 %v3136_v4, 0.0 }
 0xad0   :  { %3141 = vst [vmem:[#allocation8 + $0x8] sm:$0xff] %v3139_v5 }
 0xad1   :  { %3152 = dma.vmem_to_hbm [thread:$0]  %s3148_s2, 256, %s3150_s5, [#allocation4]  }
 0xad2   :  { %3268 = dma.done.wait [#allocation4], 256  }
 0xad3   :  { %3269 = vsyncadd [#allocation4], 4294967040 }
 0xad4   :  { %3157 = vsyncpa [#allocation3], 1 }
 0xad5   :  { %3158 = vsyncpa [#allocation6], 1 }
 0xad6   :  { %3159 = vsyncpa [#allocation4], 1 }

</bundles_post_ra>
